<compile_context>
chip_gen: v7x
topology: tpu7x:2x2x1
jax: 0.10.0
libtpu: 0.0.40
codegen_flags: <defaults>
</compile_context>

<pallas_src>
import functools

import jax
import jax.numpy as jnp
from jax.experimental import pallas as pl
from jax.experimental.pallas import tpu as pltpu


def _conv_bn_prelu_kernel(w_ref, b_ref, a_ref, *refs, C, kH, kW, TH, Wout):
    """Fused stride-(1,2) conv + folded-BN bias + PReLU for one (b, H-block).

    w_ref  : (C*kH*kW*C,) folded conv weights in SMEM (scalar prefetch),
             flat index = ((ci*kH + kh)*kW + kw)*C + co
    b_ref  : (C,) folded bias (SMEM scalar prefetch)
    a_ref  : (C,) PReLU alpha (SMEM scalar prefetch)
    refs   : kW lane-aligned input phases, each (1, C, TH_in, Wout) in VMEM,
             followed by the output block (1, C, TH, Wout) (W lane-dense).
    """
    phase = refs[:kW]
    o_ref = refs[kW]

    # Accumulators start at the folded-BN bias (no epilogue bias add).
    acc = [jnp.full((TH, Wout), b_ref[co], jnp.float32) for co in range(C)]

    # Tap loop: one aligned [0:Wout) slice per (ci, kh, kw), then C scalar FMAs.
    for ci in range(C):
        for kh in range(kH):
            for kw in range(kW):
                xs = phase[kw][0, ci, kh:kh + TH, :].astype(jnp.float32)
                base = ((ci * kH + kh) * kW + kw) * C
                for co in range(C):
                    acc[co] = acc[co] + w_ref[base + co] * xs

    # Epilogue: per-channel PReLU, store in output dtype.
    for co in range(C):
        y = acc[co]
        o_ref[0, co] = jnp.where(y >= 0.0, y, a_ref[co] * y).astype(o_ref.dtype)


def conv2d_unit(x, params, k):
    """Conv2dUnit forward: x (B, C, H, W) NCHW -> (B, C, Hout, Wout)."""
    kH, kW = k
    B, C, H, W = x.shape
    assert W >= kW and H >= kH, "input smaller than conv kernel"
    Hout = H - kH + 1
    Wout = (W - kW) // 2 + 1
    assert Hout >= 1 and Wout >= 1

    # Fold inference-mode BatchNorm into the conv weights / bias.
    scale = params["gamma"] / jnp.sqrt(params["var"] + 1e-5)              # (C,)
    w_f = params["w"] * scale[:, None, None, None]                        # (C, C, kH, kW)
    b_f = (params["b"] - params["mean"]) * scale + params["beta"]         # (C,)
    # Flat SMEM layout: index = ((ci*kH + kh)*kW + kw)*C + co
    w_flat = jnp.transpose(w_f, (1, 2, 3, 0)).reshape(-1)
    alpha = params["alpha"]

    # One lane-aligned phase per kw tap (only host-side layout op).  Each phase
    # is exactly Wout lanes wide, so every in-kernel tap load starts at lane 0.
    phases = [x[..., kw::2][..., :Wout] for kw in range(kW)]

    if kH == 1:
        # Cap TH so the C live (TH, Wout) f32 accumulators stay within ~half the
        # 64-entry vreg file: C * ceil(TH/8) * ceil(Wout/128) <= 32.
        lane_tiles = pl.cdiv(Wout, 128)
        th_cap = max(8, (32 // max(1, C * lane_tiles)) * 8)
        TH = min(Hout, th_cap)
        # v7x feeds its 2 TensorCores from parallel grid axes: if B == 1 make
        # sure there are at least 2 H blocks (when Hout allows it).
        if B == 1 and Hout > 8 and pl.cdiv(Hout, TH) < 2:
            TH = (((Hout + 1) // 2) + 7) // 8 * 8
        TH_in = TH
    else:
        # No halo support in the index_map -> whole H strip per block.
        TH = Hout
        TH_in = H
    nH = pl.cdiv(Hout, TH)

    kernel = functools.partial(_conv_bn_prelu_kernel,
                               C=C, kH=kH, kW=kW, TH=TH, Wout=Wout)

    # index_maps receive the scalar-prefetch refs as trailing positional args.
    phase_spec = pl.BlockSpec((1, C, TH_in, Wout), lambda b, h, *_: (b, 0, h, 0))
    out_spec = pl.BlockSpec((1, C, TH, Wout), lambda b, h, *_: (b, 0, h, 0))

    grid_spec = pltpu.PrefetchScalarGridSpec(
        num_scalar_prefetch=3,
        grid=(B, nH),
        in_specs=[phase_spec] * kW,
        out_specs=out_spec,
    )

    return pl.pallas_call(
        kernel,
        out_shape=jax.ShapeDtypeStruct((B, C, Hout, Wout), x.dtype),
        grid_spec=grid_spec,
        compiler_params=pltpu.CompilerParams(
            dimension_semantics=("parallel", "parallel")),
    )(w_flat, b_f, alpha, *phases)


# ----------------------------------------------------------------------------
# Pure-JAX reference (PyTorch semantics: cross-correlation, eval-mode BN, PReLU)
# ----------------------------------------------------------------------------
def conv2d_unit_reference(x, params, k):
    y = jax.lax.conv_general_dilated(
        x, params["w"], window_strides=(1, 2), padding="VALID",
        dimension_numbers=("NCHW", "OIHW", "NCHW"),
        precision=jax.lax.Precision.HIGHEST)
    y = y + params["b"][None, :, None, None]
    scale = params["gamma"] / jnp.sqrt(params["var"] + 1e-5)
    y = (y - params["mean"][None, :, None, None]) * scale[None, :, None, None] \
        + params["beta"][None, :, None, None]
    return jnp.where(y >= 0.0, y, params["alpha"][None, :, None, None] * y)


def init_params(key, C, k):
    kH, kW = k
    kw_, kb, kg, kbe, km, kv, ka = jax.random.split(key, 7)
    fan_in = C * kH * kW
    return {
        "w": jax.random.normal(kw_, (C, C, kH, kW), jnp.float32) / jnp.sqrt(fan_in),
        "b": 0.1 * jax.random.normal(kb, (C,), jnp.float32),
        "gamma": 1.0 + 0.1 * jax.random.normal(kg, (C,), jnp.float32),
        "beta": 0.1 * jax.random.normal(kbe, (C,), jnp.float32),
        "mean": 0.1 * jax.random.normal(km, (C,), jnp.float32),
        "var": 1.0 + 0.1 * jnp.abs(jax.random.normal(kv, (C,), jnp.float32)),
        "alpha": 0.25 + 0.05 * jax.random.normal(ka, (C,), jnp.float32),
    }


if __name__ == "__main__":
    B, C = 2, 8
    k = (1, 3)            # as used by the network: Conv2dUnit((1, 3), emb_dim)
    H, W = 16, 257        # -> Hout = 16, Wout = 128 (full 128-lane output rows)

    key = jax.random.PRNGKey(0)
    kp, kx = jax.random.split(key)
    params = init_params(kp, C, k)
    x = jax.random.normal(kx, (B, C, H, W), jnp.float32)

    fwd = jax.jit(lambda inp: conv2d_unit(inp, params, k))
    y = fwd(x)
    jax.block_until_ready(y)

    Hout, Wout = H - k[0] + 1, (W - k[1]) // 2 + 1
    assert y.shape == (B, C, Hout, Wout), y.shape
    assert bool(jnp.all(jnp.isfinite(y)))

    y_ref = conv2d_unit_reference(x, params, k)
    err = float(jnp.max(jnp.abs(y - y_ref)))
    assert err < 1e-3, f"max abs error vs reference: {err}"

    print("KERNEL_OK")
</pallas_src>

<mosaic_0001>
module attributes {stable_mosaic.version = 11 : i64} {
  func.func @_conv_bn_prelu_kernel(%arg0: i32, %arg1: i32, %arg2: memref<192xf32, #tpu.memory_space<smem>>, %arg3: memref<8xf32, #tpu.memory_space<smem>>, %arg4: memref<8xf32, #tpu.memory_space<smem>>, %arg5: memref<1x8x16x128xf32, #tpu.memory_space<vmem>>, %arg6: memref<1x8x16x128xf32, #tpu.memory_space<vmem>>, %arg7: memref<1x8x16x128xf32, #tpu.memory_space<vmem>>, %arg8: memref<1x8x16x128xf32, #tpu.memory_space<vmem>>) attributes {dimension_semantics = [#tpu.dimension_semantics<parallel>, #tpu.dimension_semantics<parallel>], iteration_bounds = array<i64: 2, 1>, scalar_prefetch = 3 : i64, scratch_operands = 0 : i64, tpu.core_type = #tpu.core_type<tc>, window_params = [{transform_indices = @transform_0, window_bounds = array<i64: 1, 8, 16, 128>}, {transform_indices = @transform_1, window_bounds = array<i64: 1, 8, 16, 128>}, {transform_indices = @transform_2, window_bounds = array<i64: 1, 8, 16, 128>}, {transform_indices = @transform_3, window_bounds = array<i64: 1, 8, 16, 128>}]} {
    %c0 = arith.constant 0 : index
    %0 = memref.load %arg3[%c0] : memref<8xf32, #tpu.memory_space<smem>>
    %1 = vector.broadcast %0 : f32 to vector<16x128xf32>
    %c1 = arith.constant 1 : index
    %2 = memref.load %arg3[%c1] : memref<8xf32, #tpu.memory_space<smem>>
    %3 = vector.broadcast %2 : f32 to vector<16x128xf32>
    %c2 = arith.constant 2 : index
    %4 = memref.load %arg3[%c2] : memref<8xf32, #tpu.memory_space<smem>>
    %5 = vector.broadcast %4 : f32 to vector<16x128xf32>
    %c3 = arith.constant 3 : index
    %6 = memref.load %arg3[%c3] : memref<8xf32, #tpu.memory_space<smem>>
    %7 = vector.broadcast %6 : f32 to vector<16x128xf32>
    %c4 = arith.constant 4 : index
    %8 = memref.load %arg3[%c4] : memref<8xf32, #tpu.memory_space<smem>>
    %9 = vector.broadcast %8 : f32 to vector<16x128xf32>
    %c5 = arith.constant 5 : index
    %10 = memref.load %arg3[%c5] : memref<8xf32, #tpu.memory_space<smem>>
    %11 = vector.broadcast %10 : f32 to vector<16x128xf32>
    %c6 = arith.constant 6 : index
    %12 = memref.load %arg3[%c6] : memref<8xf32, #tpu.memory_space<smem>>
    %13 = vector.broadcast %12 : f32 to vector<16x128xf32>
    %c7 = arith.constant 7 : index
    %14 = memref.load %arg3[%c7] : memref<8xf32, #tpu.memory_space<smem>>
    %15 = vector.broadcast %14 : f32 to vector<16x128xf32>
    %c0_0 = arith.constant 0 : index
    %c0_1 = arith.constant 0 : index
    %c0_2 = arith.constant 0 : index
    %c0_3 = arith.constant 0 : index
    %16 = vector.load %arg5[%c0_0, %c0_1, %c0_2, %c0_3] : memref<1x8x16x128xf32, #tpu.memory_space<vmem>>, vector<1x1x16x128xf32>
    %17 = vector.shape_cast %16 : vector<1x1x16x128xf32> to vector<16x128xf32>
    %c0_4 = arith.constant 0 : index
    %18 = memref.load %arg2[%c0_4] : memref<192xf32, #tpu.memory_space<smem>>
    %19 = vector.broadcast %18 : f32 to vector<16x128xf32>
    %20 = arith.mulf %19, %17 : vector<16x128xf32>
    %21 = arith.addf %1, %20 : vector<16x128xf32>
    %c1_5 = arith.constant 1 : index
    %22 = memref.load %arg2[%c1_5] : memref<192xf32, #tpu.memory_space<smem>>
    %23 = vector.broadcast %22 : f32 to vector<16x128xf32>
    %24 = arith.mulf %23, %17 : vector<16x128xf32>
    %25 = arith.addf %3, %24 : vector<16x128xf32>
    %c2_6 = arith.constant 2 : index
    %26 = memref.load %arg2[%c2_6] : memref<192xf32, #tpu.memory_space<smem>>
    %27 = vector.broadcast %26 : f32 to vector<16x128xf32>
    %28 = arith.mulf %27, %17 : vector<16x128xf32>
    %29 = arith.addf %5, %28 : vector<16x128xf32>
    %c3_7 = arith.constant 3 : index
    %30 = memref.load %arg2[%c3_7] : memref<192xf32, #tpu.memory_space<smem>>
    %31 = vector.broadcast %30 : f32 to vector<16x128xf32>
    %32 = arith.mulf %31, %17 : vector<16x128xf32>
    %33 = arith.addf %7, %32 : vector<16x128xf32>
    %c4_8 = arith.constant 4 : index
    %34 = memref.load %arg2[%c4_8] : memref<192xf32, #tpu.memory_space<smem>>
    %35 = vector.broadcast %34 : f32 to vector<16x128xf32>
    %36 = arith.mulf %35, %17 : vector<16x128xf32>
    %37 = arith.addf %9, %36 : vector<16x128xf32>
    %c5_9 = arith.constant 5 : index
    %38 = memref.load %arg2[%c5_9] : memref<192xf32, #tpu.memory_space<smem>>
    %39 = vector.broadcast %38 : f32 to vector<16x128xf32>
    %40 = arith.mulf %39, %17 : vector<16x128xf32>
    %41 = arith.addf %11, %40 : vector<16x128xf32>
    %c6_10 = arith.constant 6 : index
    %42 = memref.load %arg2[%c6_10] : memref<192xf32, #tpu.memory_space<smem>>
    %43 = vector.broadcast %42 : f32 to vector<16x128xf32>
    %44 = arith.mulf %43, %17 : vector<16x128xf32>
    %45 = arith.addf %13, %44 : vector<16x128xf32>
    %c7_11 = arith.constant 7 : index
    %46 = memref.load %arg2[%c7_11] : memref<192xf32, #tpu.memory_space<smem>>
    %47 = vector.broadcast %46 : f32 to vector<16x128xf32>
    %48 = arith.mulf %47, %17 : vector<16x128xf32>
    %49 = arith.addf %15, %48 : vector<16x128xf32>
    %c0_12 = arith.constant 0 : index
    %c0_13 = arith.constant 0 : index
    %c0_14 = arith.constant 0 : index
    %c0_15 = arith.constant 0 : index
    %50 = vector.load %arg6[%c0_12, %c0_13, %c0_14, %c0_15] : memref<1x8x16x128xf32, #tpu.memory_space<vmem>>, vector<1x1x16x128xf32>
    %51 = vector.shape_cast %50 : vector<1x1x16x128xf32> to vector<16x128xf32>
    %c8 = arith.constant 8 : index
    %52 = memref.load %arg2[%c8] : memref<192xf32, #tpu.memory_space<smem>>
    %53 = vector.broadcast %52 : f32 to vector<16x128xf32>
    %54 = arith.mulf %53, %51 : vector<16x128xf32>
    %55 = arith.addf %21, %54 : vector<16x128xf32>
    %c9 = arith.constant 9 : index
    %56 = memref.load %arg2[%c9] : memref<192xf32, #tpu.memory_space<smem>>
    %57 = vector.broadcast %56 : f32 to vector<16x128xf32>
    %58 = arith.mulf %57, %51 : vector<16x128xf32>
    %59 = arith.addf %25, %58 : vector<16x128xf32>
    %c10 = arith.constant 10 : index
    %60 = memref.load %arg2[%c10] : memref<192xf32, #tpu.memory_space<smem>>
    %61 = vector.broadcast %60 : f32 to vector<16x128xf32>
    %62 = arith.mulf %61, %51 : vector<16x128xf32>
    %63 = arith.addf %29, %62 : vector<16x128xf32>
    %c11 = arith.constant 11 : index
    %64 = memref.load %arg2[%c11] : memref<192xf32, #tpu.memory_space<smem>>
    %65 = vector.broadcast %64 : f32 to vector<16x128xf32>
    %66 = arith.mulf %65, %51 : vector<16x128xf32>
    %67 = arith.addf %33, %66 : vector<16x128xf32>
    %c12 = arith.constant 12 : index
    %68 = memref.load %arg2[%c12] : memref<192xf32, #tpu.memory_space<smem>>
    %69 = vector.broadcast %68 : f32 to vector<16x128xf32>
    %70 = arith.mulf %69, %51 : vector<16x128xf32>
    %71 = arith.addf %37, %70 : vector<16x128xf32>
    %c13 = arith.constant 13 : index
    %72 = memref.load %arg2[%c13] : memref<192xf32, #tpu.memory_space<smem>>
    %73 = vector.broadcast %72 : f32 to vector<16x128xf32>
    %74 = arith.mulf %73, %51 : vector<16x128xf32>
    %75 = arith.addf %41, %74 : vector<16x128xf32>
    %c14 = arith.constant 14 : index
    %76 = memref.load %arg2[%c14] : memref<192xf32, #tpu.memory_space<smem>>
    %77 = vector.broadcast %76 : f32 to vector<16x128xf32>
    %78 = arith.mulf %77, %51 : vector<16x128xf32>
    %79 = arith.addf %45, %78 : vector<16x128xf32>
    %c15 = arith.constant 15 : index
    %80 = memref.load %arg2[%c15] : memref<192xf32, #tpu.memory_space<smem>>
    %81 = vector.broadcast %80 : f32 to vector<16x128xf32>
    %82 = arith.mulf %81, %51 : vector<16x128xf32>
    %83 = arith.addf %49, %82 : vector<16x128xf32>
    %c0_16 = arith.constant 0 : index
    %c0_17 = arith.constant 0 : index
    %c0_18 = arith.constant 0 : index
    %c0_19 = arith.constant 0 : index
    %84 = vector.load %arg7[%c0_16, %c0_17, %c0_18, %c0_19] : memref<1x8x16x128xf32, #tpu.memory_space<vmem>>, vector<1x1x16x128xf32>
    %85 = vector.shape_cast %84 : vector<1x1x16x128xf32> to vector<16x128xf32>
    %c16 = arith.constant 16 : index
    %86 = memref.load %arg2[%c16] : memref<192xf32, #tpu.memory_space<smem>>
    %87 = vector.broadcast %86 : f32 to vector<16x128xf32>
    %88 = arith.mulf %87, %85 : vector<16x128xf32>
    %89 = arith.addf %55, %88 : vector<16x128xf32>
    %c17 = arith.constant 17 : index
    %90 = memref.load %arg2[%c17] : memref<192xf32, #tpu.memory_space<smem>>
    %91 = vector.broadcast %90 : f32 to vector<16x128xf32>
    %92 = arith.mulf %91, %85 : vector<16x128xf32>
    %93 = arith.addf %59, %92 : vector<16x128xf32>
    %c18 = arith.constant 18 : index
    %94 = memref.load %arg2[%c18] : memref<192xf32, #tpu.memory_space<smem>>
    %95 = vector.broadcast %94 : f32 to vector<16x128xf32>
    %96 = arith.mulf %95, %85 : vector<16x128xf32>
    %97 = arith.addf %63, %96 : vector<16x128xf32>
    %c19 = arith.constant 19 : index
    %98 = memref.load %arg2[%c19] : memref<192xf32, #tpu.memory_space<smem>>
    %99 = vector.broadcast %98 : f32 to vector<16x128xf32>
    %100 = arith.mulf %99, %85 : vector<16x128xf32>
    %101 = arith.addf %67, %100 : vector<16x128xf32>
    %c20 = arith.constant 20 : index
    %102 = memref.load %arg2[%c20] : memref<192xf32, #tpu.memory_space<smem>>
    %103 = vector.broadcast %102 : f32 to vector<16x128xf32>
    %104 = arith.mulf %103, %85 : vector<16x128xf32>
    %105 = arith.addf %71, %104 : vector<16x128xf32>
    %c21 = arith.constant 21 : index
    %106 = memref.load %arg2[%c21] : memref<192xf32, #tpu.memory_space<smem>>
    %107 = vector.broadcast %106 : f32 to vector<16x128xf32>
    %108 = arith.mulf %107, %85 : vector<16x128xf32>
    %109 = arith.addf %75, %108 : vector<16x128xf32>
    %c22 = arith.constant 22 : index
    %110 = memref.load %arg2[%c22] : memref<192xf32, #tpu.memory_space<smem>>
    %111 = vector.broadcast %110 : f32 to vector<16x128xf32>
    %112 = arith.mulf %111, %85 : vector<16x128xf32>
    %113 = arith.addf %79, %112 : vector<16x128xf32>
    %c23 = arith.constant 23 : index
    %114 = memref.load %arg2[%c23] : memref<192xf32, #tpu.memory_space<smem>>
    %115 = vector.broadcast %114 : f32 to vector<16x128xf32>
    %116 = arith.mulf %115, %85 : vector<16x128xf32>
    %117 = arith.addf %83, %116 : vector<16x128xf32>
    %c0_20 = arith.constant 0 : index
    %c1_21 = arith.constant 1 : index
    %c0_22 = arith.constant 0 : index
    %c0_23 = arith.constant 0 : index
    %118 = vector.load %arg5[%c0_20, %c1_21, %c0_22, %c0_23] : memref<1x8x16x128xf32, #tpu.memory_space<vmem>>, vector<1x1x16x128xf32>
    %119 = vector.shape_cast %118 : vector<1x1x16x128xf32> to vector<16x128xf32>
    %c24 = arith.constant 24 : index
    %120 = memref.load %arg2[%c24] : memref<192xf32, #tpu.memory_space<smem>>
    %121 = vector.broadcast %120 : f32 to vector<16x128xf32>
    %122 = arith.mulf %121, %119 : vector<16x128xf32>
    %123 = arith.addf %89, %122 : vector<16x128xf32>
    %c25 = arith.constant 25 : index
    %124 = memref.load %arg2[%c25] : memref<192xf32, #tpu.memory_space<smem>>
    %125 = vector.broadcast %124 : f32 to vector<16x128xf32>
    %126 = arith.mulf %125, %119 : vector<16x128xf32>
    %127 = arith.addf %93, %126 : vector<16x128xf32>
    %c26 = arith.constant 26 : index
    %128 = memref.load %arg2[%c26] : memref<192xf32, #tpu.memory_space<smem>>
    %129 = vector.broadcast %128 : f32 to vector<16x128xf32>
    %130 = arith.mulf %129, %119 : vector<16x128xf32>
    %131 = arith.addf %97, %130 : vector<16x128xf32>
    %c27 = arith.constant 27 : index
    %132 = memref.load %arg2[%c27] : memref<192xf32, #tpu.memory_space<smem>>
    %133 = vector.broadcast %132 : f32 to vector<16x128xf32>
    %134 = arith.mulf %133, %119 : vector<16x128xf32>
    %135 = arith.addf %101, %134 : vector<16x128xf32>
    %c28 = arith.constant 28 : index
    %136 = memref.load %arg2[%c28] : memref<192xf32, #tpu.memory_space<smem>>
    %137 = vector.broadcast %136 : f32 to vector<16x128xf32>
    %138 = arith.mulf %137, %119 : vector<16x128xf32>
    %139 = arith.addf %105, %138 : vector<16x128xf32>
    %c29 = arith.constant 29 : index
    %140 = memref.load %arg2[%c29] : memref<192xf32, #tpu.memory_space<smem>>
    %141 = vector.broadcast %140 : f32 to vector<16x128xf32>
    %142 = arith.mulf %141, %119 : vector<16x128xf32>
    %143 = arith.addf %109, %142 : vector<16x128xf32>
    %c30 = arith.constant 30 : index
    %144 = memref.load %arg2[%c30] : memref<192xf32, #tpu.memory_space<smem>>
    %145 = vector.broadcast %144 : f32 to vector<16x128xf32>
    %146 = arith.mulf %145, %119 : vector<16x128xf32>
    %147 = arith.addf %113, %146 : vector<16x128xf32>
    %c31 = arith.constant 31 : index
    %148 = memref.load %arg2[%c31] : memref<192xf32, #tpu.memory_space<smem>>
    %149 = vector.broadcast %148 : f32 to vector<16x128xf32>
    %150 = arith.mulf %149, %119 : vector<16x128xf32>
    %151 = arith.addf %117, %150 : vector<16x128xf32>
    %c0_24 = arith.constant 0 : index
    %c1_25 = arith.constant 1 : index
    %c0_26 = arith.constant 0 : index
    %c0_27 = arith.constant 0 : index
    %152 = vector.load %arg6[%c0_24, %c1_25, %c0_26, %c0_27] : memref<1x8x16x128xf32, #tpu.memory_space<vmem>>, vector<1x1x16x128xf32>
    %153 = vector.shape_cast %152 : vector<1x1x16x128xf32> to vector<16x128xf32>
    %c32 = arith.constant 32 : index
    %154 = memref.load %arg2[%c32] : memref<192xf32, #tpu.memory_space<smem>>
    %155 = vector.broadcast %154 : f32 to vector<16x128xf32>
    %156 = arith.mulf %155, %153 : vector<16x128xf32>
    %157 = arith.addf %123, %156 : vector<16x128xf32>
    %c33 = arith.constant 33 : index
    %158 = memref.load %arg2[%c33] : memref<192xf32, #tpu.memory_space<smem>>
    %159 = vector.broadcast %158 : f32 to vector<16x128xf32>
    %160 = arith.mulf %159, %153 : vector<16x128xf32>
    %161 = arith.addf %127, %160 : vector<16x128xf32>
    %c34 = arith.constant 34 : index
    %162 = memref.load %arg2[%c34] : memref<192xf32, #tpu.memory_space<smem>>
    %163 = vector.broadcast %162 : f32 to vector<16x128xf32>
    %164 = arith.mulf %163, %153 : vector<16x128xf32>
    %165 = arith.addf %131, %164 : vector<16x128xf32>
    %c35 = arith.constant 35 : index
    %166 = memref.load %arg2[%c35] : memref<192xf32, #tpu.memory_space<smem>>
    %167 = vector.broadcast %166 : f32 to vector<16x128xf32>
    %168 = arith.mulf %167, %153 : vector<16x128xf32>
    %169 = arith.addf %135, %168 : vector<16x128xf32>
    %c36 = arith.constant 36 : index
    %170 = memref.load %arg2[%c36] : memref<192xf32, #tpu.memory_space<smem>>
    %171 = vector.broadcast %170 : f32 to vector<16x128xf32>
    %172 = arith.mulf %171, %153 : vector<16x128xf32>
    %173 = arith.addf %139, %172 : vector<16x128xf32>
    %c37 = arith.constant 37 : index
    %174 = memref.load %arg2[%c37] : memref<192xf32, #tpu.memory_space<smem>>
    %175 = vector.broadcast %174 : f32 to vector<16x128xf32>
    %176 = arith.mulf %175, %153 : vector<16x128xf32>
    %177 = arith.addf %143, %176 : vector<16x128xf32>
    %c38 = arith.constant 38 : index
    %178 = memref.load %arg2[%c38] : memref<192xf32, #tpu.memory_space<smem>>
    %179 = vector.broadcast %178 : f32 to vector<16x128xf32>
    %180 = arith.mulf %179, %153 : vector<16x128xf32>
    %181 = arith.addf %147, %180 : vector<16x128xf32>
    %c39 = arith.constant 39 : index
    %182 = memref.load %arg2[%c39] : memref<192xf32, #tpu.memory_space<smem>>
    %183 = vector.broadcast %182 : f32 to vector<16x128xf32>
    %184 = arith.mulf %183, %153 : vector<16x128xf32>
    %185 = arith.addf %151, %184 : vector<16x128xf32>
    %c0_28 = arith.constant 0 : index
    %c1_29 = arith.constant 1 : index
    %c0_30 = arith.constant 0 : index
    %c0_31 = arith.constant 0 : index
    %186 = vector.load %arg7[%c0_28, %c1_29, %c0_30, %c0_31] : memref<1x8x16x128xf32, #tpu.memory_space<vmem>>, vector<1x1x16x128xf32>
    %187 = vector.shape_cast %186 : vector<1x1x16x128xf32> to vector<16x128xf32>
    %c40 = arith.constant 40 : index
    %188 = memref.load %arg2[%c40] : memref<192xf32, #tpu.memory_space<smem>>
    %189 = vector.broadcast %188 : f32 to vector<16x128xf32>
    %190 = arith.mulf %189, %187 : vector<16x128xf32>
    %191 = arith.addf %157, %190 : vector<16x128xf32>
    %c41 = arith.constant 41 : index
    %192 = memref.load %arg2[%c41] : memref<192xf32, #tpu.memory_space<smem>>
    %193 = vector.broadcast %192 : f32 to vector<16x128xf32>
    %194 = arith.mulf %193, %187 : vector<16x128xf32>
    %195 = arith.addf %161, %194 : vector<16x128xf32>
    %c42 = arith.constant 42 : index
    %196 = memref.load %arg2[%c42] : memref<192xf32, #tpu.memory_space<smem>>
    %197 = vector.broadcast %196 : f32 to vector<16x128xf32>
    %198 = arith.mulf %197, %187 : vector<16x128xf32>
    %199 = arith.addf %165, %198 : vector<16x128xf32>
    %c43 = arith.constant 43 : index
    %200 = memref.load %arg2[%c43] : memref<192xf32, #tpu.memory_space<smem>>
    %201 = vector.broadcast %200 : f32 to vector<16x128xf32>
    %202 = arith.mulf %201, %187 : vector<16x128xf32>
    %203 = arith.addf %169, %202 : vector<16x128xf32>
    %c44 = arith.constant 44 : index
    %204 = memref.load %arg2[%c44] : memref<192xf32, #tpu.memory_space<smem>>
    %205 = vector.broadcast %204 : f32 to vector<16x128xf32>
    %206 = arith.mulf %205, %187 : vector<16x128xf32>
    %207 = arith.addf %173, %206 : vector<16x128xf32>
    %c45 = arith.constant 45 : index
    %208 = memref.load %arg2[%c45] : memref<192xf32, #tpu.memory_space<smem>>
    %209 = vector.broadcast %208 : f32 to vector<16x128xf32>
    %210 = arith.mulf %209, %187 : vector<16x128xf32>
    %211 = arith.addf %177, %210 : vector<16x128xf32>
    %c46 = arith.constant 46 : index
    %212 = memref.load %arg2[%c46] : memref<192xf32, #tpu.memory_space<smem>>
    %213 = vector.broadcast %212 : f32 to vector<16x128xf32>
    %214 = arith.mulf %213, %187 : vector<16x128xf32>
    %215 = arith.addf %181, %214 : vector<16x128xf32>
    %c47 = arith.constant 47 : index
    %216 = memref.load %arg2[%c47] : memref<192xf32, #tpu.memory_space<smem>>
    %217 = vector.broadcast %216 : f32 to vector<16x128xf32>
    %218 = arith.mulf %217, %187 : vector<16x128xf32>
    %219 = arith.addf %185, %218 : vector<16x128xf32>
    %c0_32 = arith.constant 0 : index
    %c2_33 = arith.constant 2 : index
    %c0_34 = arith.constant 0 : index
    %c0_35 = arith.constant 0 : index
    %220 = vector.load %arg5[%c0_32, %c2_33, %c0_34, %c0_35] : memref<1x8x16x128xf32, #tpu.memory_space<vmem>>, vector<1x1x16x128xf32>
    %221 = vector.shape_cast %220 : vector<1x1x16x128xf32> to vector<16x128xf32>
    %c48 = arith.constant 48 : index
    %222 = memref.load %arg2[%c48] : memref<192xf32, #tpu.memory_space<smem>>
    %223 = vector.broadcast %222 : f32 to vector<16x128xf32>
    %224 = arith.mulf %223, %221 : vector<16x128xf32>
    %225 = arith.addf %191, %224 : vector<16x128xf32>
    %c49 = arith.constant 49 : index
    %226 = memref.load %arg2[%c49] : memref<192xf32, #tpu.memory_space<smem>>
    %227 = vector.broadcast %226 : f32 to vector<16x128xf32>
    %228 = arith.mulf %227, %221 : vector<16x128xf32>
    %229 = arith.addf %195, %228 : vector<16x128xf32>
    %c50 = arith.constant 50 : index
    %230 = memref.load %arg2[%c50] : memref<192xf32, #tpu.memory_space<smem>>
    %231 = vector.broadcast %230 : f32 to vector<16x128xf32>
    %232 = arith.mulf %231, %221 : vector<16x128xf32>
    %233 = arith.addf %199, %232 : vector<16x128xf32>
    %c51 = arith.constant 51 : index
    %234 = memref.load %arg2[%c51] : memref<192xf32, #tpu.memory_space<smem>>
    %235 = vector.broadcast %234 : f32 to vector<16x128xf32>
    %236 = arith.mulf %235, %221 : vector<16x128xf32>
    %237 = arith.addf %203, %236 : vector<16x128xf32>
    %c52 = arith.constant 52 : index
    %238 = memref.load %arg2[%c52] : memref<192xf32, #tpu.memory_space<smem>>
    %239 = vector.broadcast %238 : f32 to vector<16x128xf32>
    %240 = arith.mulf %239, %221 : vector<16x128xf32>
    %241 = arith.addf %207, %240 : vector<16x128xf32>
    %c53 = arith.constant 53 : index
    %242 = memref.load %arg2[%c53] : memref<192xf32, #tpu.memory_space<smem>>
    %243 = vector.broadcast %242 : f32 to vector<16x128xf32>
    %244 = arith.mulf %243, %221 : vector<16x128xf32>
    %245 = arith.addf %211, %244 : vector<16x128xf32>
    %c54 = arith.constant 54 : index
    %246 = memref.load %arg2[%c54] : memref<192xf32, #tpu.memory_space<smem>>
    %247 = vector.broadcast %246 : f32 to vector<16x128xf32>
    %248 = arith.mulf %247, %221 : vector<16x128xf32>
    %249 = arith.addf %215, %248 : vector<16x128xf32>
    %c55 = arith.constant 55 : index
    %250 = memref.load %arg2[%c55] : memref<192xf32, #tpu.memory_space<smem>>
    %251 = vector.broadcast %250 : f32 to vector<16x128xf32>
    %252 = arith.mulf %251, %221 : vector<16x128xf32>
    %253 = arith.addf %219, %252 : vector<16x128xf32>
    %c0_36 = arith.constant 0 : index
    %c2_37 = arith.constant 2 : index
    %c0_38 = arith.constant 0 : index
    %c0_39 = arith.constant 0 : index
    %254 = vector.load %arg6[%c0_36, %c2_37, %c0_38, %c0_39] : memref<1x8x16x128xf32, #tpu.memory_space<vmem>>, vector<1x1x16x128xf32>
    %255 = vector.shape_cast %254 : vector<1x1x16x128xf32> to vector<16x128xf32>
    %c56 = arith.constant 56 : index
    %256 = memref.load %arg2[%c56] : memref<192xf32, #tpu.memory_space<smem>>
    %257 = vector.broadcast %256 : f32 to vector<16x128xf32>
    %258 = arith.mulf %257, %255 : vector<16x128xf32>
    %259 = arith.addf %225, %258 : vector<16x128xf32>
    %c57 = arith.constant 57 : index
    %260 = memref.load %arg2[%c57] : memref<192xf32, #tpu.memory_space<smem>>
    %261 = vector.broadcast %260 : f32 to vector<16x128xf32>
    %262 = arith.mulf %261, %255 : vector<16x128xf32>
    %263 = arith.addf %229, %262 : vector<16x128xf32>
    %c58 = arith.constant 58 : index
    %264 = memref.load %arg2[%c58] : memref<192xf32, #tpu.memory_space<smem>>
    %265 = vector.broadcast %264 : f32 to vector<16x128xf32>
    %266 = arith.mulf %265, %255 : vector<16x128xf32>
    %267 = arith.addf %233, %266 : vector<16x128xf32>
    %c59 = arith.constant 59 : index
    %268 = memref.load %arg2[%c59] : memref<192xf32, #tpu.memory_space<smem>>
    %269 = vector.broadcast %268 : f32 to vector<16x128xf32>
    %270 = arith.mulf %269, %255 : vector<16x128xf32>
    %271 = arith.addf %237, %270 : vector<16x128xf32>
    %c60 = arith.constant 60 : index
    %272 = memref.load %arg2[%c60] : memref<192xf32, #tpu.memory_space<smem>>
    %273 = vector.broadcast %272 : f32 to vector<16x128xf32>
    %274 = arith.mulf %273, %255 : vector<16x128xf32>
    %275 = arith.addf %241, %274 : vector<16x128xf32>
    %c61 = arith.constant 61 : index
    %276 = memref.load %arg2[%c61] : memref<192xf32, #tpu.memory_space<smem>>
    %277 = vector.broadcast %276 : f32 to vector<16x128xf32>
    %278 = arith.mulf %277, %255 : vector<16x128xf32>
    %279 = arith.addf %245, %278 : vector<16x128xf32>
    %c62 = arith.constant 62 : index
    %280 = memref.load %arg2[%c62] : memref<192xf32, #tpu.memory_space<smem>>
    %281 = vector.broadcast %280 : f32 to vector<16x128xf32>
    %282 = arith.mulf %281, %255 : vector<16x128xf32>
    %283 = arith.addf %249, %282 : vector<16x128xf32>
    %c63 = arith.constant 63 : index
    %284 = memref.load %arg2[%c63] : memref<192xf32, #tpu.memory_space<smem>>
    %285 = vector.broadcast %284 : f32 to vector<16x128xf32>
    %286 = arith.mulf %285, %255 : vector<16x128xf32>
    %287 = arith.addf %253, %286 : vector<16x128xf32>
    %c0_40 = arith.constant 0 : index
    %c2_41 = arith.constant 2 : index
    %c0_42 = arith.constant 0 : index
    %c0_43 = arith.constant 0 : index
    %288 = vector.load %arg7[%c0_40, %c2_41, %c0_42, %c0_43] : memref<1x8x16x128xf32, #tpu.memory_space<vmem>>, vector<1x1x16x128xf32>
    %289 = vector.shape_cast %288 : vector<1x1x16x128xf32> to vector<16x128xf32>
    %c64 = arith.constant 64 : index
    %290 = memref.load %arg2[%c64] : memref<192xf32, #tpu.memory_space<smem>>
    %291 = vector.broadcast %290 : f32 to vector<16x128xf32>
    %292 = arith.mulf %291, %289 : vector<16x128xf32>
    %293 = arith.addf %259, %292 : vector<16x128xf32>
    %c65 = arith.constant 65 : index
    %294 = memref.load %arg2[%c65] : memref<192xf32, #tpu.memory_space<smem>>
    %295 = vector.broadcast %294 : f32 to vector<16x128xf32>
    %296 = arith.mulf %295, %289 : vector<16x128xf32>
    %297 = arith.addf %263, %296 : vector<16x128xf32>
    %c66 = arith.constant 66 : index
    %298 = memref.load %arg2[%c66] : memref<192xf32, #tpu.memory_space<smem>>
    %299 = vector.broadcast %298 : f32 to vector<16x128xf32>
    %300 = arith.mulf %299, %289 : vector<16x128xf32>
    %301 = arith.addf %267, %300 : vector<16x128xf32>
    %c67 = arith.constant 67 : index
    %302 = memref.load %arg2[%c67] : memref<192xf32, #tpu.memory_space<smem>>
    %303 = vector.broadcast %302 : f32 to vector<16x128xf32>
    %304 = arith.mulf %303, %289 : vector<16x128xf32>
    %305 = arith.addf %271, %304 : vector<16x128xf32>
    %c68 = arith.constant 68 : index
    %306 = memref.load %arg2[%c68] : memref<192xf32, #tpu.memory_space<smem>>
    %307 = vector.broadcast %306 : f32 to vector<16x128xf32>
    %308 = arith.mulf %307, %289 : vector<16x128xf32>
    %309 = arith.addf %275, %308 : vector<16x128xf32>
    %c69 = arith.constant 69 : index
    %310 = memref.load %arg2[%c69] : memref<192xf32, #tpu.memory_space<smem>>
    %311 = vector.broadcast %310 : f32 to vector<16x128xf32>
    %312 = arith.mulf %311, %289 : vector<16x128xf32>
    %313 = arith.addf %279, %312 : vector<16x128xf32>
    %c70 = arith.constant 70 : index
    %314 = memref.load %arg2[%c70] : memref<192xf32, #tpu.memory_space<smem>>
    %315 = vector.broadcast %314 : f32 to vector<16x128xf32>
    %316 = arith.mulf %315, %289 : vector<16x128xf32>
    %317 = arith.addf %283, %316 : vector<16x128xf32>
    %c71 = arith.constant 71 : index
    %318 = memref.load %arg2[%c71] : memref<192xf32, #tpu.memory_space<smem>>
    %319 = vector.broadcast %318 : f32 to vector<16x128xf32>
    %320 = arith.mulf %319, %289 : vector<16x128xf32>
    %321 = arith.addf %287, %320 : vector<16x128xf32>
    %c0_44 = arith.constant 0 : index
    %c3_45 = arith.constant 3 : index
    %c0_46 = arith.constant 0 : index
    %c0_47 = arith.constant 0 : index
    %322 = vector.load %arg5[%c0_44, %c3_45, %c0_46, %c0_47] : memref<1x8x16x128xf32, #tpu.memory_space<vmem>>, vector<1x1x16x128xf32>
    %323 = vector.shape_cast %322 : vector<1x1x16x128xf32> to vector<16x128xf32>
    %c72 = arith.constant 72 : index
    %324 = memref.load %arg2[%c72] : memref<192xf32, #tpu.memory_space<smem>>
    %325 = vector.broadcast %324 : f32 to vector<16x128xf32>
    %326 = arith.mulf %325, %323 : vector<16x128xf32>
    %327 = arith.addf %293, %326 : vector<16x128xf32>
    %c73 = arith.constant 73 : index
    %328 = memref.load %arg2[%c73] : memref<192xf32, #tpu.memory_space<smem>>
    %329 = vector.broadcast %328 : f32 to vector<16x128xf32>
    %330 = arith.mulf %329, %323 : vector<16x128xf32>
    %331 = arith.addf %297, %330 : vector<16x128xf32>
    %c74 = arith.constant 74 : index
    %332 = memref.load %arg2[%c74] : memref<192xf32, #tpu.memory_space<smem>>
    %333 = vector.broadcast %332 : f32 to vector<16x128xf32>
    %334 = arith.mulf %333, %323 : vector<16x128xf32>
    %335 = arith.addf %301, %334 : vector<16x128xf32>
    %c75 = arith.constant 75 : index
    %336 = memref.load %arg2[%c75] : memref<192xf32, #tpu.memory_space<smem>>
    %337 = vector.broadcast %336 : f32 to vector<16x128xf32>
    %338 = arith.mulf %337, %323 : vector<16x128xf32>
    %339 = arith.addf %305, %338 : vector<16x128xf32>
    %c76 = arith.constant 76 : index
    %340 = memref.load %arg2[%c76] : memref<192xf32, #tpu.memory_space<smem>>
    %341 = vector.broadcast %340 : f32 to vector<16x128xf32>
    %342 = arith.mulf %341, %323 : vector<16x128xf32>
    %343 = arith.addf %309, %342 : vector<16x128xf32>
    %c77 = arith.constant 77 : index
    %344 = memref.load %arg2[%c77] : memref<192xf32, #tpu.memory_space<smem>>
    %345 = vector.broadcast %344 : f32 to vector<16x128xf32>
    %346 = arith.mulf %345, %323 : vector<16x128xf32>
    %347 = arith.addf %313, %346 : vector<16x128xf32>
    %c78 = arith.constant 78 : index
    %348 = memref.load %arg2[%c78] : memref<192xf32, #tpu.memory_space<smem>>
    %349 = vector.broadcast %348 : f32 to vector<16x128xf32>
    %350 = arith.mulf %349, %323 : vector<16x128xf32>
    %351 = arith.addf %317, %350 : vector<16x128xf32>
    %c79 = arith.constant 79 : index
    %352 = memref.load %arg2[%c79] : memref<192xf32, #tpu.memory_space<smem>>
    %353 = vector.broadcast %352 : f32 to vector<16x128xf32>
    %354 = arith.mulf %353, %323 : vector<16x128xf32>
    %355 = arith.addf %321, %354 : vector<16x128xf32>
    %c0_48 = arith.constant 0 : index
    %c3_49 = arith.constant 3 : index
    %c0_50 = arith.constant 0 : index
    %c0_51 = arith.constant 0 : index
    %356 = vector.load %arg6[%c0_48, %c3_49, %c0_50, %c0_51] : memref<1x8x16x128xf32, #tpu.memory_space<vmem>>, vector<1x1x16x128xf32>
    %357 = vector.shape_cast %356 : vector<1x1x16x128xf32> to vector<16x128xf32>
    %c80 = arith.constant 80 : index
    %358 = memref.load %arg2[%c80] : memref<192xf32, #tpu.memory_space<smem>>
    %359 = vector.broadcast %358 : f32 to vector<16x128xf32>
    %360 = arith.mulf %359, %357 : vector<16x128xf32>
    %361 = arith.addf %327, %360 : vector<16x128xf32>
    %c81 = arith.constant 81 : index
    %362 = memref.load %arg2[%c81] : memref<192xf32, #tpu.memory_space<smem>>
    %363 = vector.broadcast %362 : f32 to vector<16x128xf32>
    %364 = arith.mulf %363, %357 : vector<16x128xf32>
    %365 = arith.addf %331, %364 : vector<16x128xf32>
    %c82 = arith.constant 82 : index
    %366 = memref.load %arg2[%c82] : memref<192xf32, #tpu.memory_space<smem>>
    %367 = vector.broadcast %366 : f32 to vector<16x128xf32>
    %368 = arith.mulf %367, %357 : vector<16x128xf32>
    %369 = arith.addf %335, %368 : vector<16x128xf32>
    %c83 = arith.constant 83 : index
    %370 = memref.load %arg2[%c83] : memref<192xf32, #tpu.memory_space<smem>>
    %371 = vector.broadcast %370 : f32 to vector<16x128xf32>
    %372 = arith.mulf %371, %357 : vector<16x128xf32>
    %373 = arith.addf %339, %372 : vector<16x128xf32>
    %c84 = arith.constant 84 : index
    %374 = memref.load %arg2[%c84] : memref<192xf32, #tpu.memory_space<smem>>
    %375 = vector.broadcast %374 : f32 to vector<16x128xf32>
    %376 = arith.mulf %375, %357 : vector<16x128xf32>
    %377 = arith.addf %343, %376 : vector<16x128xf32>
    %c85 = arith.constant 85 : index
    %378 = memref.load %arg2[%c85] : memref<192xf32, #tpu.memory_space<smem>>
    %379 = vector.broadcast %378 : f32 to vector<16x128xf32>
    %380 = arith.mulf %379, %357 : vector<16x128xf32>
    %381 = arith.addf %347, %380 : vector<16x128xf32>
    %c86 = arith.constant 86 : index
    %382 = memref.load %arg2[%c86] : memref<192xf32, #tpu.memory_space<smem>>
    %383 = vector.broadcast %382 : f32 to vector<16x128xf32>
    %384 = arith.mulf %383, %357 : vector<16x128xf32>
    %385 = arith.addf %351, %384 : vector<16x128xf32>
    %c87 = arith.constant 87 : index
    %386 = memref.load %arg2[%c87] : memref<192xf32, #tpu.memory_space<smem>>
    %387 = vector.broadcast %386 : f32 to vector<16x128xf32>
    %388 = arith.mulf %387, %357 : vector<16x128xf32>
    %389 = arith.addf %355, %388 : vector<16x128xf32>
    %c0_52 = arith.constant 0 : index
    %c3_53 = arith.constant 3 : index
    %c0_54 = arith.constant 0 : index
    %c0_55 = arith.constant 0 : index
    %390 = vector.load %arg7[%c0_52, %c3_53, %c0_54, %c0_55] : memref<1x8x16x128xf32, #tpu.memory_space<vmem>>, vector<1x1x16x128xf32>
    %391 = vector.shape_cast %390 : vector<1x1x16x128xf32> to vector<16x128xf32>
    %c88 = arith.constant 88 : index
    %392 = memref.load %arg2[%c88] : memref<192xf32, #tpu.memory_space<smem>>
    %393 = vector.broadcast %392 : f32 to vector<16x128xf32>
    %394 = arith.mulf %393, %391 : vector<16x128xf32>
    %395 = arith.addf %361, %394 : vector<16x128xf32>
    %c89 = arith.constant 89 : index
    %396 = memref.load %arg2[%c89] : memref<192xf32, #tpu.memory_space<smem>>
    %397 = vector.broadcast %396 : f32 to vector<16x128xf32>
    %398 = arith.mulf %397, %391 : vector<16x128xf32>
    %399 = arith.addf %365, %398 : vector<16x128xf32>
    %c90 = arith.constant 90 : index
    %400 = memref.load %arg2[%c90] : memref<192xf32, #tpu.memory_space<smem>>
    %401 = vector.broadcast %400 : f32 to vector<16x128xf32>
    %402 = arith.mulf %401, %391 : vector<16x128xf32>
    %403 = arith.addf %369, %402 : vector<16x128xf32>
    %c91 = arith.constant 91 : index
    %404 = memref.load %arg2[%c91] : memref<192xf32, #tpu.memory_space<smem>>
    %405 = vector.broadcast %404 : f32 to vector<16x128xf32>
    %406 = arith.mulf %405, %391 : vector<16x128xf32>
    %407 = arith.addf %373, %406 : vector<16x128xf32>
    %c92 = arith.constant 92 : index
    %408 = memref.load %arg2[%c92] : memref<192xf32, #tpu.memory_space<smem>>
    %409 = vector.broadcast %408 : f32 to vector<16x128xf32>
    %410 = arith.mulf %409, %391 : vector<16x128xf32>
    %411 = arith.addf %377, %410 : vector<16x128xf32>
    %c93 = arith.constant 93 : index
    %412 = memref.load %arg2[%c93] : memref<192xf32, #tpu.memory_space<smem>>
    %413 = vector.broadcast %412 : f32 to vector<16x128xf32>
    %414 = arith.mulf %413, %391 : vector<16x128xf32>
    %415 = arith.addf %381, %414 : vector<16x128xf32>
    %c94 = arith.constant 94 : index
    %416 = memref.load %arg2[%c94] : memref<192xf32, #tpu.memory_space<smem>>
    %417 = vector.broadcast %416 : f32 to vector<16x128xf32>
    %418 = arith.mulf %417, %391 : vector<16x128xf32>
    %419 = arith.addf %385, %418 : vector<16x128xf32>
    %c95 = arith.constant 95 : index
    %420 = memref.load %arg2[%c95] : memref<192xf32, #tpu.memory_space<smem>>
    %421 = vector.broadcast %420 : f32 to vector<16x128xf32>
    %422 = arith.mulf %421, %391 : vector<16x128xf32>
    %423 = arith.addf %389, %422 : vector<16x128xf32>
    %c0_56 = arith.constant 0 : index
    %c4_57 = arith.constant 4 : index
    %c0_58 = arith.constant 0 : index
    %c0_59 = arith.constant 0 : index
    %424 = vector.load %arg5[%c0_56, %c4_57, %c0_58, %c0_59] : memref<1x8x16x128xf32, #tpu.memory_space<vmem>>, vector<1x1x16x128xf32>
    %425 = vector.shape_cast %424 : vector<1x1x16x128xf32> to vector<16x128xf32>
    %c96 = arith.constant 96 : index
    %426 = memref.load %arg2[%c96] : memref<192xf32, #tpu.memory_space<smem>>
    %427 = vector.broadcast %426 : f32 to vector<16x128xf32>
    %428 = arith.mulf %427, %425 : vector<16x128xf32>
    %429 = arith.addf %395, %428 : vector<16x128xf32>
    %c97 = arith.constant 97 : index
    %430 = memref.load %arg2[%c97] : memref<192xf32, #tpu.memory_space<smem>>
    %431 = vector.broadcast %430 : f32 to vector<16x128xf32>
    %432 = arith.mulf %431, %425 : vector<16x128xf32>
    %433 = arith.addf %399, %432 : vector<16x128xf32>
    %c98 = arith.constant 98 : index
    %434 = memref.load %arg2[%c98] : memref<192xf32, #tpu.memory_space<smem>>
    %435 = vector.broadcast %434 : f32 to vector<16x128xf32>
    %436 = arith.mulf %435, %425 : vector<16x128xf32>
    %437 = arith.addf %403, %436 : vector<16x128xf32>
    %c99 = arith.constant 99 : index
    %438 = memref.load %arg2[%c99] : memref<192xf32, #tpu.memory_space<smem>>
    %439 = vector.broadcast %438 : f32 to vector<16x128xf32>
    %440 = arith.mulf %439, %425 : vector<16x128xf32>
    %441 = arith.addf %407, %440 : vector<16x128xf32>
    %c100 = arith.constant 100 : index
    %442 = memref.load %arg2[%c100] : memref<192xf32, #tpu.memory_space<smem>>
    %443 = vector.broadcast %442 : f32 to vector<16x128xf32>
    %444 = arith.mulf %443, %425 : vector<16x128xf32>
    %445 = arith.addf %411, %444 : vector<16x128xf32>
    %c101 = arith.constant 101 : index
    %446 = memref.load %arg2[%c101] : memref<192xf32, #tpu.memory_space<smem>>
    %447 = vector.broadcast %446 : f32 to vector<16x128xf32>
    %448 = arith.mulf %447, %425 : vector<16x128xf32>
    %449 = arith.addf %415, %448 : vector<16x128xf32>
    %c102 = arith.constant 102 : index
    %450 = memref.load %arg2[%c102] : memref<192xf32, #tpu.memory_space<smem>>
    %451 = vector.broadcast %450 : f32 to vector<16x128xf32>
    %452 = arith.mulf %451, %425 : vector<16x128xf32>
    %453 = arith.addf %419, %452 : vector<16x128xf32>
    %c103 = arith.constant 103 : index
    %454 = memref.load %arg2[%c103] : memref<192xf32, #tpu.memory_space<smem>>
    %455 = vector.broadcast %454 : f32 to vector<16x128xf32>
    %456 = arith.mulf %455, %425 : vector<16x128xf32>
    %457 = arith.addf %423, %456 : vector<16x128xf32>
    %c0_60 = arith.constant 0 : index
    %c4_61 = arith.constant 4 : index
    %c0_62 = arith.constant 0 : index
    %c0_63 = arith.constant 0 : index
    %458 = vector.load %arg6[%c0_60, %c4_61, %c0_62, %c0_63] : memref<1x8x16x128xf32, #tpu.memory_space<vmem>>, vector<1x1x16x128xf32>
    %459 = vector.shape_cast %458 : vector<1x1x16x128xf32> to vector<16x128xf32>
    %c104 = arith.constant 104 : index
    %460 = memref.load %arg2[%c104] : memref<192xf32, #tpu.memory_space<smem>>
    %461 = vector.broadcast %460 : f32 to vector<16x128xf32>
    %462 = arith.mulf %461, %459 : vector<16x128xf32>
    %463 = arith.addf %429, %462 : vector<16x128xf32>
    %c105 = arith.constant 105 : index
    %464 = memref.load %arg2[%c105] : memref<192xf32, #tpu.memory_space<smem>>
    %465 = vector.broadcast %464 : f32 to vector<16x128xf32>
    %466 = arith.mulf %465, %459 : vector<16x128xf32>
    %467 = arith.addf %433, %466 : vector<16x128xf32>
    %c106 = arith.constant 106 : index
    %468 = memref.load %arg2[%c106] : memref<192xf32, #tpu.memory_space<smem>>
    %469 = vector.broadcast %468 : f32 to vector<16x128xf32>
    %470 = arith.mulf %469, %459 : vector<16x128xf32>
    %471 = arith.addf %437, %470 : vector<16x128xf32>
    %c107 = arith.constant 107 : index
    %472 = memref.load %arg2[%c107] : memref<192xf32, #tpu.memory_space<smem>>
    %473 = vector.broadcast %472 : f32 to vector<16x128xf32>
    %474 = arith.mulf %473, %459 : vector<16x128xf32>
    %475 = arith.addf %441, %474 : vector<16x128xf32>
    %c108 = arith.constant 108 : index
    %476 = memref.load %arg2[%c108] : memref<192xf32, #tpu.memory_space<smem>>
    %477 = vector.broadcast %476 : f32 to vector<16x128xf32>
    %478 = arith.mulf %477, %459 : vector<16x128xf32>
    %479 = arith.addf %445, %478 : vector<16x128xf32>
    %c109 = arith.constant 109 : index
    %480 = memref.load %arg2[%c109] : memref<192xf32, #tpu.memory_space<smem>>
    %481 = vector.broadcast %480 : f32 to vector<16x128xf32>
    %482 = arith.mulf %481, %459 : vector<16x128xf32>
    %483 = arith.addf %449, %482 : vector<16x128xf32>
    %c110 = arith.constant 110 : index
    %484 = memref.load %arg2[%c110] : memref<192xf32, #tpu.memory_space<smem>>
    %485 = vector.broadcast %484 : f32 to vector<16x128xf32>
    %486 = arith.mulf %485, %459 : vector<16x128xf32>
    %487 = arith.addf %453, %486 : vector<16x128xf32>
    %c111 = arith.constant 111 : index
    %488 = memref.load %arg2[%c111] : memref<192xf32, #tpu.memory_space<smem>>
    %489 = vector.broadcast %488 : f32 to vector<16x128xf32>
    %490 = arith.mulf %489, %459 : vector<16x128xf32>
    %491 = arith.addf %457, %490 : vector<16x128xf32>
    %c0_64 = arith.constant 0 : index
    %c4_65 = arith.constant 4 : index
    %c0_66 = arith.constant 0 : index
    %c0_67 = arith.constant 0 : index
    %492 = vector.load %arg7[%c0_64, %c4_65, %c0_66, %c0_67] : memref<1x8x16x128xf32, #tpu.memory_space<vmem>>, vector<1x1x16x128xf32>
    %493 = vector.shape_cast %492 : vector<1x1x16x128xf32> to vector<16x128xf32>
    %c112 = arith.constant 112 : index
    %494 = memref.load %arg2[%c112] : memref<192xf32, #tpu.memory_space<smem>>
    %495 = vector.broadcast %494 : f32 to vector<16x128xf32>
    %496 = arith.mulf %495, %493 : vector<16x128xf32>
    %497 = arith.addf %463, %496 : vector<16x128xf32>
    %c113 = arith.constant 113 : index
    %498 = memref.load %arg2[%c113] : memref<192xf32, #tpu.memory_space<smem>>
    %499 = vector.broadcast %498 : f32 to vector<16x128xf32>
    %500 = arith.mulf %499, %493 : vector<16x128xf32>
    %501 = arith.addf %467, %500 : vector<16x128xf32>
    %c114 = arith.constant 114 : index
    %502 = memref.load %arg2[%c114] : memref<192xf32, #tpu.memory_space<smem>>
    %503 = vector.broadcast %502 : f32 to vector<16x128xf32>
    %504 = arith.mulf %503, %493 : vector<16x128xf32>
    %505 = arith.addf %471, %504 : vector<16x128xf32>
    %c115 = arith.constant 115 : index
    %506 = memref.load %arg2[%c115] : memref<192xf32, #tpu.memory_space<smem>>
    %507 = vector.broadcast %506 : f32 to vector<16x128xf32>
    %508 = arith.mulf %507, %493 : vector<16x128xf32>
    %509 = arith.addf %475, %508 : vector<16x128xf32>
    %c116 = arith.constant 116 : index
    %510 = memref.load %arg2[%c116] : memref<192xf32, #tpu.memory_space<smem>>
    %511 = vector.broadcast %510 : f32 to vector<16x128xf32>
    %512 = arith.mulf %511, %493 : vector<16x128xf32>
    %513 = arith.addf %479, %512 : vector<16x128xf32>
    %c117 = arith.constant 117 : index
    %514 = memref.load %arg2[%c117] : memref<192xf32, #tpu.memory_space<smem>>
    %515 = vector.broadcast %514 : f32 to vector<16x128xf32>
    %516 = arith.mulf %515, %493 : vector<16x128xf32>
    %517 = arith.addf %483, %516 : vector<16x128xf32>
    %c118 = arith.constant 118 : index
    %518 = memref.load %arg2[%c118] : memref<192xf32, #tpu.memory_space<smem>>
    %519 = vector.broadcast %518 : f32 to vector<16x128xf32>
    %520 = arith.mulf %519, %493 : vector<16x128xf32>
    %521 = arith.addf %487, %520 : vector<16x128xf32>
    %c119 = arith.constant 119 : index
    %522 = memref.load %arg2[%c119] : memref<192xf32, #tpu.memory_space<smem>>
    %523 = vector.broadcast %522 : f32 to vector<16x128xf32>
    %524 = arith.mulf %523, %493 : vector<16x128xf32>
    %525 = arith.addf %491, %524 : vector<16x128xf32>
    %c0_68 = arith.constant 0 : index
    %c5_69 = arith.constant 5 : index
    %c0_70 = arith.constant 0 : index
    %c0_71 = arith.constant 0 : index
    %526 = vector.load %arg5[%c0_68, %c5_69, %c0_70, %c0_71] : memref<1x8x16x128xf32, #tpu.memory_space<vmem>>, vector<1x1x16x128xf32>
    %527 = vector.shape_cast %526 : vector<1x1x16x128xf32> to vector<16x128xf32>
    %c120 = arith.constant 120 : index
    %528 = memref.load %arg2[%c120] : memref<192xf32, #tpu.memory_space<smem>>
    %529 = vector.broadcast %528 : f32 to vector<16x128xf32>
    %530 = arith.mulf %529, %527 : vector<16x128xf32>
    %531 = arith.addf %497, %530 : vector<16x128xf32>
    %c121 = arith.constant 121 : index
    %532 = memref.load %arg2[%c121] : memref<192xf32, #tpu.memory_space<smem>>
    %533 = vector.broadcast %532 : f32 to vector<16x128xf32>
    %534 = arith.mulf %533, %527 : vector<16x128xf32>
    %535 = arith.addf %501, %534 : vector<16x128xf32>
    %c122 = arith.constant 122 : index
    %536 = memref.load %arg2[%c122] : memref<192xf32, #tpu.memory_space<smem>>
    %537 = vector.broadcast %536 : f32 to vector<16x128xf32>
    %538 = arith.mulf %537, %527 : vector<16x128xf32>
    %539 = arith.addf %505, %538 : vector<16x128xf32>
    %c123 = arith.constant 123 : index
    %540 = memref.load %arg2[%c123] : memref<192xf32, #tpu.memory_space<smem>>
    %541 = vector.broadcast %540 : f32 to vector<16x128xf32>
    %542 = arith.mulf %541, %527 : vector<16x128xf32>
    %543 = arith.addf %509, %542 : vector<16x128xf32>
    %c124 = arith.constant 124 : index
    %544 = memref.load %arg2[%c124] : memref<192xf32, #tpu.memory_space<smem>>
    %545 = vector.broadcast %544 : f32 to vector<16x128xf32>
    %546 = arith.mulf %545, %527 : vector<16x128xf32>
    %547 = arith.addf %513, %546 : vector<16x128xf32>
    %c125 = arith.constant 125 : index
    %548 = memref.load %arg2[%c125] : memref<192xf32, #tpu.memory_space<smem>>
    %549 = vector.broadcast %548 : f32 to vector<16x128xf32>
    %550 = arith.mulf %549, %527 : vector<16x128xf32>
    %551 = arith.addf %517, %550 : vector<16x128xf32>
    %c126 = arith.constant 126 : index
    %552 = memref.load %arg2[%c126] : memref<192xf32, #tpu.memory_space<smem>>
    %553 = vector.broadcast %552 : f32 to vector<16x128xf32>
    %554 = arith.mulf %553, %527 : vector<16x128xf32>
    %555 = arith.addf %521, %554 : vector<16x128xf32>
    %c127 = arith.constant 127 : index
    %556 = memref.load %arg2[%c127] : memref<192xf32, #tpu.memory_space<smem>>
    %557 = vector.broadcast %556 : f32 to vector<16x128xf32>
    %558 = arith.mulf %557, %527 : vector<16x128xf32>
    %559 = arith.addf %525, %558 : vector<16x128xf32>
    %c0_72 = arith.constant 0 : index
    %c5_73 = arith.constant 5 : index
    %c0_74 = arith.constant 0 : index
    %c0_75 = arith.constant 0 : index
    %560 = vector.load %arg6[%c0_72, %c5_73, %c0_74, %c0_75] : memref<1x8x16x128xf32, #tpu.memory_space<vmem>>, vector<1x1x16x128xf32>
    %561 = vector.shape_cast %560 : vector<1x1x16x128xf32> to vector<16x128xf32>
    %c128 = arith.constant 128 : index
    %562 = memref.load %arg2[%c128] : memref<192xf32, #tpu.memory_space<smem>>
    %563 = vector.broadcast %562 : f32 to vector<16x128xf32>
    %564 = arith.mulf %563, %561 : vector<16x128xf32>
    %565 = arith.addf %531, %564 : vector<16x128xf32>
    %c129 = arith.constant 129 : index
    %566 = memref.load %arg2[%c129] : memref<192xf32, #tpu.memory_space<smem>>
    %567 = vector.broadcast %566 : f32 to vector<16x128xf32>
    %568 = arith.mulf %567, %561 : vector<16x128xf32>
    %569 = arith.addf %535, %568 : vector<16x128xf32>
    %c130 = arith.constant 130 : index
    %570 = memref.load %arg2[%c130] : memref<192xf32, #tpu.memory_space<smem>>
    %571 = vector.broadcast %570 : f32 to vector<16x128xf32>
    %572 = arith.mulf %571, %561 : vector<16x128xf32>
    %573 = arith.addf %539, %572 : vector<16x128xf32>
    %c131 = arith.constant 131 : index
    %574 = memref.load %arg2[%c131] : memref<192xf32, #tpu.memory_space<smem>>
    %575 = vector.broadcast %574 : f32 to vector<16x128xf32>
    %576 = arith.mulf %575, %561 : vector<16x128xf32>
    %577 = arith.addf %543, %576 : vector<16x128xf32>
    %c132 = arith.constant 132 : index
    %578 = memref.load %arg2[%c132] : memref<192xf32, #tpu.memory_space<smem>>
    %579 = vector.broadcast %578 : f32 to vector<16x128xf32>
    %580 = arith.mulf %579, %561 : vector<16x128xf32>
    %581 = arith.addf %547, %580 : vector<16x128xf32>
    %c133 = arith.constant 133 : index
    %582 = memref.load %arg2[%c133] : memref<192xf32, #tpu.memory_space<smem>>
    %583 = vector.broadcast %582 : f32 to vector<16x128xf32>
    %584 = arith.mulf %583, %561 : vector<16x128xf32>
    %585 = arith.addf %551, %584 : vector<16x128xf32>
    %c134 = arith.constant 134 : index
    %586 = memref.load %arg2[%c134] : memref<192xf32, #tpu.memory_space<smem>>
    %587 = vector.broadcast %586 : f32 to vector<16x128xf32>
    %588 = arith.mulf %587, %561 : vector<16x128xf32>
    %589 = arith.addf %555, %588 : vector<16x128xf32>
    %c135 = arith.constant 135 : index
    %590 = memref.load %arg2[%c135] : memref<192xf32, #tpu.memory_space<smem>>
    %591 = vector.broadcast %590 : f32 to vector<16x128xf32>
    %592 = arith.mulf %591, %561 : vector<16x128xf32>
    %593 = arith.addf %559, %592 : vector<16x128xf32>
    %c0_76 = arith.constant 0 : index
    %c5_77 = arith.constant 5 : index
    %c0_78 = arith.constant 0 : index
    %c0_79 = arith.constant 0 : index
    %594 = vector.load %arg7[%c0_76, %c5_77, %c0_78, %c0_79] : memref<1x8x16x128xf32, #tpu.memory_space<vmem>>, vector<1x1x16x128xf32>
    %595 = vector.shape_cast %594 : vector<1x1x16x128xf32> to vector<16x128xf32>
    %c136 = arith.constant 136 : index
    %596 = memref.load %arg2[%c136] : memref<192xf32, #tpu.memory_space<smem>>
    %597 = vector.broadcast %596 : f32 to vector<16x128xf32>
    %598 = arith.mulf %597, %595 : vector<16x128xf32>
    %599 = arith.addf %565, %598 : vector<16x128xf32>
    %c137 = arith.constant 137 : index
    %600 = memref.load %arg2[%c137] : memref<192xf32, #tpu.memory_space<smem>>
    %601 = vector.broadcast %600 : f32 to vector<16x128xf32>
    %602 = arith.mulf %601, %595 : vector<16x128xf32>
    %603 = arith.addf %569, %602 : vector<16x128xf32>
    %c138 = arith.constant 138 : index
    %604 = memref.load %arg2[%c138] : memref<192xf32, #tpu.memory_space<smem>>
    %605 = vector.broadcast %604 : f32 to vector<16x128xf32>
    %606 = arith.mulf %605, %595 : vector<16x128xf32>
    %607 = arith.addf %573, %606 : vector<16x128xf32>
    %c139 = arith.constant 139 : index
    %608 = memref.load %arg2[%c139] : memref<192xf32, #tpu.memory_space<smem>>
    %609 = vector.broadcast %608 : f32 to vector<16x128xf32>
    %610 = arith.mulf %609, %595 : vector<16x128xf32>
    %611 = arith.addf %577, %610 : vector<16x128xf32>
    %c140 = arith.constant 140 : index
    %612 = memref.load %arg2[%c140] : memref<192xf32, #tpu.memory_space<smem>>
    %613 = vector.broadcast %612 : f32 to vector<16x128xf32>
    %614 = arith.mulf %613, %595 : vector<16x128xf32>
    %615 = arith.addf %581, %614 : vector<16x128xf32>
    %c141 = arith.constant 141 : index
    %616 = memref.load %arg2[%c141] : memref<192xf32, #tpu.memory_space<smem>>
    %617 = vector.broadcast %616 : f32 to vector<16x128xf32>
    %618 = arith.mulf %617, %595 : vector<16x128xf32>
    %619 = arith.addf %585, %618 : vector<16x128xf32>
    %c142 = arith.constant 142 : index
    %620 = memref.load %arg2[%c142] : memref<192xf32, #tpu.memory_space<smem>>
    %621 = vector.broadcast %620 : f32 to vector<16x128xf32>
    %622 = arith.mulf %621, %595 : vector<16x128xf32>
    %623 = arith.addf %589, %622 : vector<16x128xf32>
    %c143 = arith.constant 143 : index
    %624 = memref.load %arg2[%c143] : memref<192xf32, #tpu.memory_space<smem>>
    %625 = vector.broadcast %624 : f32 to vector<16x128xf32>
    %626 = arith.mulf %625, %595 : vector<16x128xf32>
    %627 = arith.addf %593, %626 : vector<16x128xf32>
    %c0_80 = arith.constant 0 : index
    %c6_81 = arith.constant 6 : index
    %c0_82 = arith.constant 0 : index
    %c0_83 = arith.constant 0 : index
    %628 = vector.load %arg5[%c0_80, %c6_81, %c0_82, %c0_83] : memref<1x8x16x128xf32, #tpu.memory_space<vmem>>, vector<1x1x16x128xf32>
    %629 = vector.shape_cast %628 : vector<1x1x16x128xf32> to vector<16x128xf32>
    %c144 = arith.constant 144 : index
    %630 = memref.load %arg2[%c144] : memref<192xf32, #tpu.memory_space<smem>>
    %631 = vector.broadcast %630 : f32 to vector<16x128xf32>
    %632 = arith.mulf %631, %629 : vector<16x128xf32>
    %633 = arith.addf %599, %632 : vector<16x128xf32>
    %c145 = arith.constant 145 : index
    %634 = memref.load %arg2[%c145] : memref<192xf32, #tpu.memory_space<smem>>
    %635 = vector.broadcast %634 : f32 to vector<16x128xf32>
    %636 = arith.mulf %635, %629 : vector<16x128xf32>
    %637 = arith.addf %603, %636 : vector<16x128xf32>
    %c146 = arith.constant 146 : index
    %638 = memref.load %arg2[%c146] : memref<192xf32, #tpu.memory_space<smem>>
    %639 = vector.broadcast %638 : f32 to vector<16x128xf32>
    %640 = arith.mulf %639, %629 : vector<16x128xf32>
    %641 = arith.addf %607, %640 : vector<16x128xf32>
    %c147 = arith.constant 147 : index
    %642 = memref.load %arg2[%c147] : memref<192xf32, #tpu.memory_space<smem>>
    %643 = vector.broadcast %642 : f32 to vector<16x128xf32>
    %644 = arith.mulf %643, %629 : vector<16x128xf32>
    %645 = arith.addf %611, %644 : vector<16x128xf32>
    %c148 = arith.constant 148 : index
    %646 = memref.load %arg2[%c148] : memref<192xf32, #tpu.memory_space<smem>>
    %647 = vector.broadcast %646 : f32 to vector<16x128xf32>
    %648 = arith.mulf %647, %629 : vector<16x128xf32>
    %649 = arith.addf %615, %648 : vector<16x128xf32>
    %c149 = arith.constant 149 : index
    %650 = memref.load %arg2[%c149] : memref<192xf32, #tpu.memory_space<smem>>
    %651 = vector.broadcast %650 : f32 to vector<16x128xf32>
    %652 = arith.mulf %651, %629 : vector<16x128xf32>
    %653 = arith.addf %619, %652 : vector<16x128xf32>
    %c150 = arith.constant 150 : index
    %654 = memref.load %arg2[%c150] : memref<192xf32, #tpu.memory_space<smem>>
    %655 = vector.broadcast %654 : f32 to vector<16x128xf32>
    %656 = arith.mulf %655, %629 : vector<16x128xf32>
    %657 = arith.addf %623, %656 : vector<16x128xf32>
    %c151 = arith.constant 151 : index
    %658 = memref.load %arg2[%c151] : memref<192xf32, #tpu.memory_space<smem>>
    %659 = vector.broadcast %658 : f32 to vector<16x128xf32>
    %660 = arith.mulf %659, %629 : vector<16x128xf32>
    %661 = arith.addf %627, %660 : vector<16x128xf32>
    %c0_84 = arith.constant 0 : index
    %c6_85 = arith.constant 6 : index
    %c0_86 = arith.constant 0 : index
    %c0_87 = arith.constant 0 : index
    %662 = vector.load %arg6[%c0_84, %c6_85, %c0_86, %c0_87] : memref<1x8x16x128xf32, #tpu.memory_space<vmem>>, vector<1x1x16x128xf32>
    %663 = vector.shape_cast %662 : vector<1x1x16x128xf32> to vector<16x128xf32>
    %c152 = arith.constant 152 : index
    %664 = memref.load %arg2[%c152] : memref<192xf32, #tpu.memory_space<smem>>
    %665 = vector.broadcast %664 : f32 to vector<16x128xf32>
    %666 = arith.mulf %665, %663 : vector<16x128xf32>
    %667 = arith.addf %633, %666 : vector<16x128xf32>
    %c153 = arith.constant 153 : index
    %668 = memref.load %arg2[%c153] : memref<192xf32, #tpu.memory_space<smem>>
    %669 = vector.broadcast %668 : f32 to vector<16x128xf32>
    %670 = arith.mulf %669, %663 : vector<16x128xf32>
    %671 = arith.addf %637, %670 : vector<16x128xf32>
    %c154 = arith.constant 154 : index
    %672 = memref.load %arg2[%c154] : memref<192xf32, #tpu.memory_space<smem>>
    %673 = vector.broadcast %672 : f32 to vector<16x128xf32>
    %674 = arith.mulf %673, %663 : vector<16x128xf32>
    %675 = arith.addf %641, %674 : vector<16x128xf32>
    %c155 = arith.constant 155 : index
    %676 = memref.load %arg2[%c155] : memref<192xf32, #tpu.memory_space<smem>>
    %677 = vector.broadcast %676 : f32 to vector<16x128xf32>
    %678 = arith.mulf %677, %663 : vector<16x128xf32>
    %679 = arith.addf %645, %678 : vector<16x128xf32>
    %c156 = arith.constant 156 : index
    %680 = memref.load %arg2[%c156] : memref<192xf32, #tpu.memory_space<smem>>
    %681 = vector.broadcast %680 : f32 to vector<16x128xf32>
    %682 = arith.mulf %681, %663 : vector<16x128xf32>
    %683 = arith.addf %649, %682 : vector<16x128xf32>
    %c157 = arith.constant 157 : index
    %684 = memref.load %arg2[%c157] : memref<192xf32, #tpu.memory_space<smem>>
    %685 = vector.broadcast %684 : f32 to vector<16x128xf32>
    %686 = arith.mulf %685, %663 : vector<16x128xf32>
    %687 = arith.addf %653, %686 : vector<16x128xf32>
    %c158 = arith.constant 158 : index
    %688 = memref.load %arg2[%c158] : memref<192xf32, #tpu.memory_space<smem>>
    %689 = vector.broadcast %688 : f32 to vector<16x128xf32>
    %690 = arith.mulf %689, %663 : vector<16x128xf32>
    %691 = arith.addf %657, %690 : vector<16x128xf32>
    %c159 = arith.constant 159 : index
    %692 = memref.load %arg2[%c159] : memref<192xf32, #tpu.memory_space<smem>>
    %693 = vector.broadcast %692 : f32 to vector<16x128xf32>
    %694 = arith.mulf %693, %663 : vector<16x128xf32>
    %695 = arith.addf %661, %694 : vector<16x128xf32>
    %c0_88 = arith.constant 0 : index
    %c6_89 = arith.constant 6 : index
    %c0_90 = arith.constant 0 : index
    %c0_91 = arith.constant 0 : index
    %696 = vector.load %arg7[%c0_88, %c6_89, %c0_90, %c0_91] : memref<1x8x16x128xf32, #tpu.memory_space<vmem>>, vector<1x1x16x128xf32>
    %697 = vector.shape_cast %696 : vector<1x1x16x128xf32> to vector<16x128xf32>
    %c160 = arith.constant 160 : index
    %698 = memref.load %arg2[%c160] : memref<192xf32, #tpu.memory_space<smem>>
    %699 = vector.broadcast %698 : f32 to vector<16x128xf32>
    %700 = arith.mulf %699, %697 : vector<16x128xf32>
    %701 = arith.addf %667, %700 : vector<16x128xf32>
    %c161 = arith.constant 161 : index
    %702 = memref.load %arg2[%c161] : memref<192xf32, #tpu.memory_space<smem>>
    %703 = vector.broadcast %702 : f32 to vector<16x128xf32>
    %704 = arith.mulf %703, %697 : vector<16x128xf32>
    %705 = arith.addf %671, %704 : vector<16x128xf32>
    %c162 = arith.constant 162 : index
    %706 = memref.load %arg2[%c162] : memref<192xf32, #tpu.memory_space<smem>>
    %707 = vector.broadcast %706 : f32 to vector<16x128xf32>
    %708 = arith.mulf %707, %697 : vector<16x128xf32>
    %709 = arith.addf %675, %708 : vector<16x128xf32>
    %c163 = arith.constant 163 : index
    %710 = memref.load %arg2[%c163] : memref<192xf32, #tpu.memory_space<smem>>
    %711 = vector.broadcast %710 : f32 to vector<16x128xf32>
    %712 = arith.mulf %711, %697 : vector<16x128xf32>
    %713 = arith.addf %679, %712 : vector<16x128xf32>
    %c164 = arith.constant 164 : index
    %714 = memref.load %arg2[%c164] : memref<192xf32, #tpu.memory_space<smem>>
    %715 = vector.broadcast %714 : f32 to vector<16x128xf32>
    %716 = arith.mulf %715, %697 : vector<16x128xf32>
    %717 = arith.addf %683, %716 : vector<16x128xf32>
    %c165 = arith.constant 165 : index
    %718 = memref.load %arg2[%c165] : memref<192xf32, #tpu.memory_space<smem>>
    %719 = vector.broadcast %718 : f32 to vector<16x128xf32>
    %720 = arith.mulf %719, %697 : vector<16x128xf32>
    %721 = arith.addf %687, %720 : vector<16x128xf32>
    %c166 = arith.constant 166 : index
    %722 = memref.load %arg2[%c166] : memref<192xf32, #tpu.memory_space<smem>>
    %723 = vector.broadcast %722 : f32 to vector<16x128xf32>
    %724 = arith.mulf %723, %697 : vector<16x128xf32>
    %725 = arith.addf %691, %724 : vector<16x128xf32>
    %c167 = arith.constant 167 : index
    %726 = memref.load %arg2[%c167] : memref<192xf32, #tpu.memory_space<smem>>
    %727 = vector.broadcast %726 : f32 to vector<16x128xf32>
    %728 = arith.mulf %727, %697 : vector<16x128xf32>
    %729 = arith.addf %695, %728 : vector<16x128xf32>
    %c0_92 = arith.constant 0 : index
    %c7_93 = arith.constant 7 : index
    %c0_94 = arith.constant 0 : index
    %c0_95 = arith.constant 0 : index
    %730 = vector.load %arg5[%c0_92, %c7_93, %c0_94, %c0_95] : memref<1x8x16x128xf32, #tpu.memory_space<vmem>>, vector<1x1x16x128xf32>
    %731 = vector.shape_cast %730 : vector<1x1x16x128xf32> to vector<16x128xf32>
    %c168 = arith.constant 168 : index
    %732 = memref.load %arg2[%c168] : memref<192xf32, #tpu.memory_space<smem>>
    %733 = vector.broadcast %732 : f32 to vector<16x128xf32>
    %734 = arith.mulf %733, %731 : vector<16x128xf32>
    %735 = arith.addf %701, %734 : vector<16x128xf32>
    %c169 = arith.constant 169 : index
    %736 = memref.load %arg2[%c169] : memref<192xf32, #tpu.memory_space<smem>>
    %737 = vector.broadcast %736 : f32 to vector<16x128xf32>
    %738 = arith.mulf %737, %731 : vector<16x128xf32>
    %739 = arith.addf %705, %738 : vector<16x128xf32>
    %c170 = arith.constant 170 : index
    %740 = memref.load %arg2[%c170] : memref<192xf32, #tpu.memory_space<smem>>
    %741 = vector.broadcast %740 : f32 to vector<16x128xf32>
    %742 = arith.mulf %741, %731 : vector<16x128xf32>
    %743 = arith.addf %709, %742 : vector<16x128xf32>
    %c171 = arith.constant 171 : index
    %744 = memref.load %arg2[%c171] : memref<192xf32, #tpu.memory_space<smem>>
    %745 = vector.broadcast %744 : f32 to vector<16x128xf32>
    %746 = arith.mulf %745, %731 : vector<16x128xf32>
    %747 = arith.addf %713, %746 : vector<16x128xf32>
    %c172 = arith.constant 172 : index
    %748 = memref.load %arg2[%c172] : memref<192xf32, #tpu.memory_space<smem>>
    %749 = vector.broadcast %748 : f32 to vector<16x128xf32>
    %750 = arith.mulf %749, %731 : vector<16x128xf32>
    %751 = arith.addf %717, %750 : vector<16x128xf32>
    %c173 = arith.constant 173 : index
    %752 = memref.load %arg2[%c173] : memref<192xf32, #tpu.memory_space<smem>>
    %753 = vector.broadcast %752 : f32 to vector<16x128xf32>
    %754 = arith.mulf %753, %731 : vector<16x128xf32>
    %755 = arith.addf %721, %754 : vector<16x128xf32>
    %c174 = arith.constant 174 : index
    %756 = memref.load %arg2[%c174] : memref<192xf32, #tpu.memory_space<smem>>
    %757 = vector.broadcast %756 : f32 to vector<16x128xf32>
    %758 = arith.mulf %757, %731 : vector<16x128xf32>
    %759 = arith.addf %725, %758 : vector<16x128xf32>
    %c175 = arith.constant 175 : index
    %760 = memref.load %arg2[%c175] : memref<192xf32, #tpu.memory_space<smem>>
    %761 = vector.broadcast %760 : f32 to vector<16x128xf32>
    %762 = arith.mulf %761, %731 : vector<16x128xf32>
    %763 = arith.addf %729, %762 : vector<16x128xf32>
    %c0_96 = arith.constant 0 : index
    %c7_97 = arith.constant 7 : index
    %c0_98 = arith.constant 0 : index
    %c0_99 = arith.constant 0 : index
    %764 = vector.load %arg6[%c0_96, %c7_97, %c0_98, %c0_99] : memref<1x8x16x128xf32, #tpu.memory_space<vmem>>, vector<1x1x16x128xf32>
    %765 = vector.shape_cast %764 : vector<1x1x16x128xf32> to vector<16x128xf32>
    %c176 = arith.constant 176 : index
    %766 = memref.load %arg2[%c176] : memref<192xf32, #tpu.memory_space<smem>>
    %767 = vector.broadcast %766 : f32 to vector<16x128xf32>
    %768 = arith.mulf %767, %765 : vector<16x128xf32>
    %769 = arith.addf %735, %768 : vector<16x128xf32>
    %c177 = arith.constant 177 : index
    %770 = memref.load %arg2[%c177] : memref<192xf32, #tpu.memory_space<smem>>
    %771 = vector.broadcast %770 : f32 to vector<16x128xf32>
    %772 = arith.mulf %771, %765 : vector<16x128xf32>
    %773 = arith.addf %739, %772 : vector<16x128xf32>
    %c178 = arith.constant 178 : index
    %774 = memref.load %arg2[%c178] : memref<192xf32, #tpu.memory_space<smem>>
    %775 = vector.broadcast %774 : f32 to vector<16x128xf32>
    %776 = arith.mulf %775, %765 : vector<16x128xf32>
    %777 = arith.addf %743, %776 : vector<16x128xf32>
    %c179 = arith.constant 179 : index
    %778 = memref.load %arg2[%c179] : memref<192xf32, #tpu.memory_space<smem>>
    %779 = vector.broadcast %778 : f32 to vector<16x128xf32>
    %780 = arith.mulf %779, %765 : vector<16x128xf32>
    %781 = arith.addf %747, %780 : vector<16x128xf32>
    %c180 = arith.constant 180 : index
    %782 = memref.load %arg2[%c180] : memref<192xf32, #tpu.memory_space<smem>>
    %783 = vector.broadcast %782 : f32 to vector<16x128xf32>
    %784 = arith.mulf %783, %765 : vector<16x128xf32>
    %785 = arith.addf %751, %784 : vector<16x128xf32>
    %c181 = arith.constant 181 : index
    %786 = memref.load %arg2[%c181] : memref<192xf32, #tpu.memory_space<smem>>
    %787 = vector.broadcast %786 : f32 to vector<16x128xf32>
    %788 = arith.mulf %787, %765 : vector<16x128xf32>
    %789 = arith.addf %755, %788 : vector<16x128xf32>
    %c182 = arith.constant 182 : index
    %790 = memref.load %arg2[%c182] : memref<192xf32, #tpu.memory_space<smem>>
    %791 = vector.broadcast %790 : f32 to vector<16x128xf32>
    %792 = arith.mulf %791, %765 : vector<16x128xf32>
    %793 = arith.addf %759, %792 : vector<16x128xf32>
    %c183 = arith.constant 183 : index
    %794 = memref.load %arg2[%c183] : memref<192xf32, #tpu.memory_space<smem>>
    %795 = vector.broadcast %794 : f32 to vector<16x128xf32>
    %796 = arith.mulf %795, %765 : vector<16x128xf32>
    %797 = arith.addf %763, %796 : vector<16x128xf32>
    %c0_100 = arith.constant 0 : index
    %c7_101 = arith.constant 7 : index
    %c0_102 = arith.constant 0 : index
    %c0_103 = arith.constant 0 : index
    %798 = vector.load %arg7[%c0_100, %c7_101, %c0_102, %c0_103] : memref<1x8x16x128xf32, #tpu.memory_space<vmem>>, vector<1x1x16x128xf32>
    %799 = vector.shape_cast %798 : vector<1x1x16x128xf32> to vector<16x128xf32>
    %c184 = arith.constant 184 : index
    %800 = memref.load %arg2[%c184] : memref<192xf32, #tpu.memory_space<smem>>
    %801 = vector.broadcast %800 : f32 to vector<16x128xf32>
    %802 = arith.mulf %801, %799 : vector<16x128xf32>
    %803 = arith.addf %769, %802 : vector<16x128xf32>
    %c185 = arith.constant 185 : index
    %804 = memref.load %arg2[%c185] : memref<192xf32, #tpu.memory_space<smem>>
    %805 = vector.broadcast %804 : f32 to vector<16x128xf32>
    %806 = arith.mulf %805, %799 : vector<16x128xf32>
    %807 = arith.addf %773, %806 : vector<16x128xf32>
    %c186 = arith.constant 186 : index
    %808 = memref.load %arg2[%c186] : memref<192xf32, #tpu.memory_space<smem>>
    %809 = vector.broadcast %808 : f32 to vector<16x128xf32>
    %810 = arith.mulf %809, %799 : vector<16x128xf32>
    %811 = arith.addf %777, %810 : vector<16x128xf32>
    %c187 = arith.constant 187 : index
    %812 = memref.load %arg2[%c187] : memref<192xf32, #tpu.memory_space<smem>>
    %813 = vector.broadcast %812 : f32 to vector<16x128xf32>
    %814 = arith.mulf %813, %799 : vector<16x128xf32>
    %815 = arith.addf %781, %814 : vector<16x128xf32>
    %c188 = arith.constant 188 : index
    %816 = memref.load %arg2[%c188] : memref<192xf32, #tpu.memory_space<smem>>
    %817 = vector.broadcast %816 : f32 to vector<16x128xf32>
    %818 = arith.mulf %817, %799 : vector<16x128xf32>
    %819 = arith.addf %785, %818 : vector<16x128xf32>
    %c189 = arith.constant 189 : index
    %820 = memref.load %arg2[%c189] : memref<192xf32, #tpu.memory_space<smem>>
    %821 = vector.broadcast %820 : f32 to vector<16x128xf32>
    %822 = arith.mulf %821, %799 : vector<16x128xf32>
    %823 = arith.addf %789, %822 : vector<16x128xf32>
    %c190 = arith.constant 190 : index
    %824 = memref.load %arg2[%c190] : memref<192xf32, #tpu.memory_space<smem>>
    %825 = vector.broadcast %824 : f32 to vector<16x128xf32>
    %826 = arith.mulf %825, %799 : vector<16x128xf32>
    %827 = arith.addf %793, %826 : vector<16x128xf32>
    %c191 = arith.constant 191 : index
    %828 = memref.load %arg2[%c191] : memref<192xf32, #tpu.memory_space<smem>>
    %829 = vector.broadcast %828 : f32 to vector<16x128xf32>
    %830 = arith.mulf %829, %799 : vector<16x128xf32>
    %831 = arith.addf %797, %830 : vector<16x128xf32>
    %cst = arith.constant 0.000000e+00 : f32
    %832 = vector.broadcast %cst : f32 to vector<16x128xf32>
    %833 = arith.cmpf oge, %803, %832 : vector<16x128xf32>
    %c0_104 = arith.constant 0 : index
    %834 = memref.load %arg4[%c0_104] : memref<8xf32, #tpu.memory_space<smem>>
    %835 = vector.broadcast %834 : f32 to vector<16x128xf32>
    %836 = arith.mulf %835, %803 : vector<16x128xf32>
    %837 = arith.select %833, %803, %836 : vector<16x128xi1>, vector<16x128xf32>
    %c0_105 = arith.constant 0 : index
    %c0_106 = arith.constant 0 : index
    %c0_107 = arith.constant 0 : index
    %c0_108 = arith.constant 0 : index
    %838 = vector.load %arg8[%c0_105, %c0_106, %c0_107, %c0_108] : memref<1x8x16x128xf32, #tpu.memory_space<vmem>>, vector<1x1x16x128xf32>
    %839 = vector.shape_cast %838 : vector<1x1x16x128xf32> to vector<16x128xf32>
    %840 = vector.shape_cast %837 : vector<16x128xf32> to vector<1x1x16x128xf32>
    tpu.vector_store %arg8[%c0_105, %c0_106, %c0_107, %c0_108], %840 {strides = array<i32>} : memref<1x8x16x128xf32, #tpu.memory_space<vmem>>, vector<1x1x16x128xf32>,
    %cst_109 = arith.constant 0.000000e+00 : f32
    %841 = vector.broadcast %cst_109 : f32 to vector<16x128xf32>
    %842 = arith.cmpf oge, %807, %841 : vector<16x128xf32>
    %c1_110 = arith.constant 1 : index
    %843 = memref.load %arg4[%c1_110] : memref<8xf32, #tpu.memory_space<smem>>
    %844 = vector.broadcast %843 : f32 to vector<16x128xf32>
    %845 = arith.mulf %844, %807 : vector<16x128xf32>
    %846 = arith.select %842, %807, %845 : vector<16x128xi1>, vector<16x128xf32>
    %c0_111 = arith.constant 0 : index
    %c1_112 = arith.constant 1 : index
    %c0_113 = arith.constant 0 : index
    %c0_114 = arith.constant 0 : index
    %847 = vector.load %arg8[%c0_111, %c1_112, %c0_113, %c0_114] : memref<1x8x16x128xf32, #tpu.memory_space<vmem>>, vector<1x1x16x128xf32>
    %848 = vector.shape_cast %847 : vector<1x1x16x128xf32> to vector<16x128xf32>
    %849 = vector.shape_cast %846 : vector<16x128xf32> to vector<1x1x16x128xf32>
    tpu.vector_store %arg8[%c0_111, %c1_112, %c0_113, %c0_114], %849 {strides = array<i32>} : memref<1x8x16x128xf32, #tpu.memory_space<vmem>>, vector<1x1x16x128xf32>,
    %cst_115 = arith.constant 0.000000e+00 : f32
    %850 = vector.broadcast %cst_115 : f32 to vector<16x128xf32>
    %851 = arith.cmpf oge, %811, %850 : vector<16x128xf32>
    %c2_116 = arith.constant 2 : index
    %852 = memref.load %arg4[%c2_116] : memref<8xf32, #tpu.memory_space<smem>>
    %853 = vector.broadcast %852 : f32 to vector<16x128xf32>
    %854 = arith.mulf %853, %811 : vector<16x128xf32>
    %855 = arith.select %851, %811, %854 : vector<16x128xi1>, vector<16x128xf32>
    %c0_117 = arith.constant 0 : index
    %c2_118 = arith.constant 2 : index
    %c0_119 = arith.constant 0 : index
    %c0_120 = arith.constant 0 : index
    %856 = vector.load %arg8[%c0_117, %c2_118, %c0_119, %c0_120] : memref<1x8x16x128xf32, #tpu.memory_space<vmem>>, vector<1x1x16x128xf32>
    %857 = vector.shape_cast %856 : vector<1x1x16x128xf32> to vector<16x128xf32>
    %858 = vector.shape_cast %855 : vector<16x128xf32> to vector<1x1x16x128xf32>
    tpu.vector_store %arg8[%c0_117, %c2_118, %c0_119, %c0_120], %858 {strides = array<i32>} : memref<1x8x16x128xf32, #tpu.memory_space<vmem>>, vector<1x1x16x128xf32>,
    %cst_121 = arith.constant 0.000000e+00 : f32
    %859 = vector.broadcast %cst_121 : f32 to vector<16x128xf32>
    %860 = arith.cmpf oge, %815, %859 : vector<16x128xf32>
    %c3_122 = arith.constant 3 : index
    %861 = memref.load %arg4[%c3_122] : memref<8xf32, #tpu.memory_space<smem>>
    %862 = vector.broadcast %861 : f32 to vector<16x128xf32>
    %863 = arith.mulf %862, %815 : vector<16x128xf32>
    %864 = arith.select %860, %815, %863 : vector<16x128xi1>, vector<16x128xf32>
    %c0_123 = arith.constant 0 : index
    %c3_124 = arith.constant 3 : index
    %c0_125 = arith.constant 0 : index
    %c0_126 = arith.constant 0 : index
    %865 = vector.load %arg8[%c0_123, %c3_124, %c0_125, %c0_126] : memref<1x8x16x128xf32, #tpu.memory_space<vmem>>, vector<1x1x16x128xf32>
    %866 = vector.shape_cast %865 : vector<1x1x16x128xf32> to vector<16x128xf32>
    %867 = vector.shape_cast %864 : vector<16x128xf32> to vector<1x1x16x128xf32>
    tpu.vector_store %arg8[%c0_123, %c3_124, %c0_125, %c0_126], %867 {strides = array<i32>} : memref<1x8x16x128xf32, #tpu.memory_space<vmem>>, vector<1x1x16x128xf32>,
    %cst_127 = arith.constant 0.000000e+00 : f32
    %868 = vector.broadcast %cst_127 : f32 to vector<16x128xf32>
    %869 = arith.cmpf oge, %819, %868 : vector<16x128xf32>
    %c4_128 = arith.constant 4 : index
    %870 = memref.load %arg4[%c4_128] : memref<8xf32, #tpu.memory_space<smem>>
    %871 = vector.broadcast %870 : f32 to vector<16x128xf32>
    %872 = arith.mulf %871, %819 : vector<16x128xf32>
    %873 = arith.select %869, %819, %872 : vector<16x128xi1>, vector<16x128xf32>
    %c0_129 = arith.constant 0 : index
    %c4_130 = arith.constant 4 : index
    %c0_131 = arith.constant 0 : index
    %c0_132 = arith.constant 0 : index
    %874 = vector.load %arg8[%c0_129, %c4_130, %c0_131, %c0_132] : memref<1x8x16x128xf32, #tpu.memory_space<vmem>>, vector<1x1x16x128xf32>
    %875 = vector.shape_cast %874 : vector<1x1x16x128xf32> to vector<16x128xf32>
    %876 = vector.shape_cast %873 : vector<16x128xf32> to vector<1x1x16x128xf32>
    tpu.vector_store %arg8[%c0_129, %c4_130, %c0_131, %c0_132], %876 {strides = array<i32>} : memref<1x8x16x128xf32, #tpu.memory_space<vmem>>, vector<1x1x16x128xf32>,
    %cst_133 = arith.constant 0.000000e+00 : f32
    %877 = vector.broadcast %cst_133 : f32 to vector<16x128xf32>
    %878 = arith.cmpf oge, %823, %877 : vector<16x128xf32>
    %c5_134 = arith.constant 5 : index
    %879 = memref.load %arg4[%c5_134] : memref<8xf32, #tpu.memory_space<smem>>
    %880 = vector.broadcast %879 : f32 to vector<16x128xf32>
    %881 = arith.mulf %880, %823 : vector<16x128xf32>
    %882 = arith.select %878, %823, %881 : vector<16x128xi1>, vector<16x128xf32>
    %c0_135 = arith.constant 0 : index
    %c5_136 = arith.constant 5 : index
    %c0_137 = arith.constant 0 : index
    %c0_138 = arith.constant 0 : index
    %883 = vector.load %arg8[%c0_135, %c5_136, %c0_137, %c0_138] : memref<1x8x16x128xf32, #tpu.memory_space<vmem>>, vector<1x1x16x128xf32>
    %884 = vector.shape_cast %883 : vector<1x1x16x128xf32> to vector<16x128xf32>
    %885 = vector.shape_cast %882 : vector<16x128xf32> to vector<1x1x16x128xf32>
    tpu.vector_store %arg8[%c0_135, %c5_136, %c0_137, %c0_138], %885 {strides = array<i32>} : memref<1x8x16x128xf32, #tpu.memory_space<vmem>>, vector<1x1x16x128xf32>,
    %cst_139 = arith.constant 0.000000e+00 : f32
    %886 = vector.broadcast %cst_139 : f32 to vector<16x128xf32>
    %887 = arith.cmpf oge, %827, %886 : vector<16x128xf32>
    %c6_140 = arith.constant 6 : index
    %888 = memref.load %arg4[%c6_140] : memref<8xf32, #tpu.memory_space<smem>>
    %889 = vector.broadcast %888 : f32 to vector<16x128xf32>
    %890 = arith.mulf %889, %827 : vector<16x128xf32>
    %891 = arith.select %887, %827, %890 : vector<16x128xi1>, vector<16x128xf32>
    %c0_141 = arith.constant 0 : index
    %c6_142 = arith.constant 6 : index
    %c0_143 = arith.constant 0 : index
    %c0_144 = arith.constant 0 : index
    %892 = vector.load %arg8[%c0_141, %c6_142, %c0_143, %c0_144] : memref<1x8x16x128xf32, #tpu.memory_space<vmem>>, vector<1x1x16x128xf32>
    %893 = vector.shape_cast %892 : vector<1x1x16x128xf32> to vector<16x128xf32>
    %894 = vector.shape_cast %891 : vector<16x128xf32> to vector<1x1x16x128xf32>
    tpu.vector_store %arg8[%c0_141, %c6_142, %c0_143, %c0_144], %894 {strides = array<i32>} : memref<1x8x16x128xf32, #tpu.memory_space<vmem>>, vector<1x1x16x128xf32>,
    %cst_145 = arith.constant 0.000000e+00 : f32
    %895 = vector.broadcast %cst_145 : f32 to vector<16x128xf32>
    %896 = arith.cmpf oge, %831, %895 : vector<16x128xf32>
    %c7_146 = arith.constant 7 : index
    %897 = memref.load %arg4[%c7_146] : memref<8xf32, #tpu.memory_space<smem>>
    %898 = vector.broadcast %897 : f32 to vector<16x128xf32>
    %899 = arith.mulf %898, %831 : vector<16x128xf32>
    %900 = arith.select %896, %831, %899 : vector<16x128xi1>, vector<16x128xf32>
    %c0_147 = arith.constant 0 : index
    %c7_148 = arith.constant 7 : index
    %c0_149 = arith.constant 0 : index
    %c0_150 = arith.constant 0 : index
    %901 = vector.load %arg8[%c0_147, %c7_148, %c0_149, %c0_150] : memref<1x8x16x128xf32, #tpu.memory_space<vmem>>, vector<1x1x16x128xf32>
    %902 = vector.shape_cast %901 : vector<1x1x16x128xf32> to vector<16x128xf32>
    %903 = vector.shape_cast %900 : vector<16x128xf32> to vector<1x1x16x128xf32>
    tpu.vector_store %arg8[%c0_147, %c7_148, %c0_149, %c0_150], %903 {strides = array<i32>} : memref<1x8x16x128xf32, #tpu.memory_space<vmem>>, vector<1x1x16x128xf32>,
    return
  }
  func.func @transform_0(%arg0: i32, %arg1: i32, %arg2: memref<192xf32, #tpu.memory_space<smem>>, %arg3: memref<8xf32, #tpu.memory_space<smem>>, %arg4: memref<8xf32, #tpu.memory_space<smem>>) -> (i32, i32, i32, i32) {
    %c0_i32 = arith.constant 0 : i32
    %c0_i32_0 = arith.constant 0 : i32
    %c0_i32_1 = arith.constant 0 : i32
    return %arg0, %c0_i32, %arg1, %c0_i32_0 : i32, i32, i32, i32
  }
  func.func @transform_1(%arg0: i32, %arg1: i32, %arg2: memref<192xf32, #tpu.memory_space<smem>>, %arg3: memref<8xf32, #tpu.memory_space<smem>>, %arg4: memref<8xf32, #tpu.memory_space<smem>>) -> (i32, i32, i32, i32) {
    %c0_i32 = arith.constant 0 : i32
    %c0_i32_0 = arith.constant 0 : i32
    %c0_i32_1 = arith.constant 0 : i32
    return %arg0, %c0_i32, %arg1, %c0_i32_0 : i32, i32, i32, i32
  }
  func.func @transform_2(%arg0: i32, %arg1: i32, %arg2: memref<192xf32, #tpu.memory_space<smem>>, %arg3: memref<8xf32, #tpu.memory_space<smem>>, %arg4: memref<8xf32, #tpu.memory_space<smem>>) -> (i32, i32, i32, i32) {
    %c0_i32 = arith.constant 0 : i32
    %c0_i32_0 = arith.constant 0 : i32
    %c0_i32_1 = arith.constant 0 : i32
    return %arg0, %c0_i32, %arg1, %c0_i32_0 : i32, i32, i32, i32
  }
  func.func @transform_3(%arg0: i32, %arg1: i32, %arg2: memref<192xf32, #tpu.memory_space<smem>>, %arg3: memref<8xf32, #tpu.memory_space<smem>>, %arg4: memref<8xf32, #tpu.memory_space<smem>>) -> (i32, i32, i32, i32) {
    %c0_i32 = arith.constant 0 : i32
    %c0_i32_0 = arith.constant 0 : i32
    %c0_i32_1 = arith.constant 0 : i32
    return %arg0, %c0_i32, %arg1, %c0_i32_0 : i32, i32, i32, i32
  }
}

</mosaic_0001>

<bundles_post_ra>
// kernel: _lambda_.1
= control target key start
LH: loop header
LB: loop body
LE: loop exit
PB: predicated region body
PF: predicated region fallthrough
CT: control target
= control target key end

     0   :  { %s3138_s0 = inlined_call_operand.vmem [shape: f32[192], index: 0, kind: input, shape index: {}]   ;;  %s3139_s3 = inlined_call_operand.vmem [shape: f32[2,8,16,128], index: 3, kind: input, shape index: {}]   ;;  %s3140_s4 = inlined_call_operand.vmem [shape: f32[2,8,16,128], index: 4, kind: input, shape index: {}]   ;;  %s3141_s5 = inlined_call_operand.vmem [shape: f32[2,8,16,128], index: 5, kind: input, shape index: {}]   ;;  %s3142_s6 = inlined_call_operand.hbm [shape: f32[2,8,16,128], index: 6, kind: output, shape index: {}]   ;;  %s3143_s1 = inlined_call_operand.vmem [shape: f32[8], index: 1, kind: input, shape index: {}]   ;;  %s3144_s2 = inlined_call_operand.vmem [shape: f32[8], index: 2, kind: input, shape index: {}]  }
   0x1   :  { %3145 = sst [smem:[#allocation10_spill]] %s3139_s3  ;;  %s11_s23 = sshll.u32 %s3138_s0, 4  ;;  %s12_s23 = int_to_ptr.vmem [resolvable:$true] %s11_s23 }
   0x2   :  { %s15_s26 = sshll.u32 %s3143_s1, 4  ;;  %s2086_s27 = scalar_lea.vmem %s12_s23, 32  ;;  %s16_s26 = int_to_ptr.vmem [resolvable:$true] %s15_s26 }
   0x3   :  { %p2087_p0 = scmp.ne.s32.totalorder %s12_s23, %s2086_s27  ;;  %p2091_p1 = scmp.lt.s32.totalorder %s12_s23, %s12_s23 }
   0x4   :  { %p2092_p2 = scmp.lt.s32.totalorder %s2086_s27, %s2086_s27 }
   0x6   :  { %p2093_p3 = por %p2092_p2, %p2091_p1 }
   0x8   :  { %p2094_p4 = pnand %p2093_p3, %p2087_p0 }
   0xa   :  { %2097 = shalt.err (!%p2094_p4)  }
   0xb   :  { %s2204_s28 = smov [#allocation3]   ;;  %s2098_s29 = scalar_lea.vmem %s16_s26, 16 }
   0xc   :  { %14 = dma.vmem_to_smem %s12_s23, 32, %s2204_s28, [#allocation2] }
   0xd   :  { %p2099_p5 = scmp.ne.s32.totalorder %s16_s26, %s2098_s29  ;;  %p2103_p6 = scmp.lt.s32.totalorder %s16_s26, %s16_s26 }
   0xe   :  { %p2104_p7 = scmp.lt.s32.totalorder %s2098_s29, %s2098_s29 }
  0x10   :  { %p2105_p8 = por %p2104_p7, %p2103_p6 }
  0x12   :  { %p2106_p9 = pnand %p2105_p8, %p2099_p5 }
  0x14   :  { %2109 = shalt.err (!%p2106_p9)  }
  0x15   :  { %s2205_s0 = smov [#allocation4]   ;;  %s19_s7 = sshll.u32 %s3144_s2, 4  ;;  %s20_s7 = int_to_ptr.vmem [resolvable:$true] %s19_s7 }
  0x16   :  { %18 = dma.vmem_to_smem %s16_s26, 16, %s2205_s0, [#allocation2] }
  0x17   :  { %s2110_s8 = scalar_lea.vmem %s20_s7, 16  ;;  %p2115_p11 = scmp.lt.s32.totalorder %s20_s7, %s20_s7 }
  0x18   :  { %p2111_p10 = scmp.ne.s32.totalorder %s20_s7, %s2110_s8  ;;  %p2116_p12 = scmp.lt.s32.totalorder %s2110_s8, %s2110_s8 }
  0x1a   :  { %p2117_p13 = por %p2116_p12, %p2115_p11 }
  0x1c   :  { %p2118_p0 = pnand %p2117_p13, %p2111_p10 }
  0x1e   :  { %2121 = shalt.err (!%p2118_p0)  }
  0x1f   :  { %s2206_s9 = smov [#allocation5]  }
  0x20   :  { %22 = dma.vmem_to_smem %s20_s7, 16, %s2206_s9, [#allocation2] }
  0x21   :  { %2174 = dma.done.wait [#allocation2], 64 }
  0x22   :  { %2175 = vsyncadd [#allocation2], 4294967232 }
  0x23   :  { %24 = sfence }
  0x24   :  { %25 = vsyncpa [#allocation7], 0 }
  0x25   :  { %27 = vsyncpa [#allocation7 + $0x1], 0  ;;  %s2254_s10 = smov 0   ;;  %s2256_s11 = smov 0  }
  0x26   :  { %s2258_s2 = smov 0   ;;  %s2260_s12 = smov 0  }
  0x27   :  { %s2262_s13 = smov 0   ;;  %s2264_s14 = smov 0  }
  0x28 LB: > { %s1744_s15 = sadd.s32 4294967295, %s2202_s14   ;;  %s1745_s16 = sadd.s32 4294967294, %s2202_s14   ;;  %s2202_s14 = sphi %s2264_s14, %s33_s14   ;;  %s2198_s13 = sphi %s2262_s13, %s3153_s13   ;;  %s2194_s12 = sphi %s2260_s12, %s3152_s12   ;;  %s2190_s2 = sphi %s2258_s2, %s3151_s2   ;;  %s2186_s11 = sphi %s2256_s11, %s3150_s11   ;;  %s2182_s10 = sphi %s2254_s10, %s3149_s10  }
  0x29   : > { %s45_s17 = sadd.s32 1, %s2198_s13  ;;  %s138_s18 = sadd.s32 1, %s2190_s2 }
  0x2a   : > { %p47_p1 = scmp.ge.s32.totalorder %s45_s17, 2  ;;  %p148_p2 = scmp.ne.s32.totalorder %s2190_s2, %s2186_s11 }
  0x2b   : > { %p149_p3 = scmp.eq.s32.totalorder %s1744_s15, 1  ;;  %p154_p4 = scmp.ne.s32.totalorder %s2186_s11, %s2182_s10 }
  0x2c   : > { %s3155_s17 = smov (%p47_p1, %s45_s17), 0  ;;  %p155_p6 = scmp.eq.s32.totalorder %s1745_s16, 1 }
  0x2d   : > { %p2294_p5 = por %p149_p3, %p148_p2  ;;  %s133_s20 = ssub.s32 %s2198_s13, %s3155_s17 }
  0x2e   : > { %p1748_p7 = scmp.ge.s32.totalorder %s2202_s14, 1  ;;  %p136_p8 = scmp.eq.s32.totalorder %s133_s20, 0 }
  0x2f   : > { %p2301_p9 = por %p155_p6, %p154_p4  ;;  %p212_p10 = scmp.lt.s32.totalorder %s2202_s14, 3 }
  0x30   : > { %s2307_s22 = scalar_select %p136_p8, %s2190_s2, %s138_s18  }
  0x31   : > { %p213_p11 = pnand %p1748_p7, %p212_p10 }
  0x32   : > { %p259_p12 = scmp.lt.s32.totalorder (!%p213_p11), %s2194_s12, 1  ;;  %s2311_s24 = sld [smem:[#allocation4]] (!%p213_p11) }
  0x33   : > { %216 = sbr.rel (%p213_p11) target bundleno = 333 (0x14d), region = 32  ;;  %s2313_s25 = sld [smem:[#allocation4 + $0x1]] (!%p213_p11) }
  0x34   : > { %s2317_s27 = sld [smem:[#allocation4 + $0x2]] (!%p213_p11)  ;;  %s2319_s28 = sld [smem:[#allocation4 + $0x3]] (!%p213_p11) }
  0x35   : > { %s2321_s29 = sld [smem:[#allocation4 + $0x4]] (!%p213_p11)  ;;  %s3148_s3 = sld [smem:[#allocation10_spill]] (!%p213_p11) }
  0x36   : > { %s2329_s7 = sld [smem:[#allocation4 + $0x5]] (!%p213_p11)  ;;  %s2331_s8 = sld [smem:[#allocation4 + $0x6]] (!%p213_p11) }
  0x37   : > { %s2333_s9 = sld [smem:[#allocation4 + $0x7]] (!%p213_p11)  ;;  %s307_s15 = sld [smem:[#allocation3]] (!%p213_p11) }
  0x38   : > { %s1763_s16 = sld [smem:[#allocation3 + $0x1]] (!%p213_p11)  ;;  %s2335_s18 = sld [smem:[#allocation3 + $0x2]] (!%p213_p11)  ;;  %v290_v0 = vstv (!%p213_p11), %s2311_s24 }
  0x39   : > { %s2337_s20 = sld [smem:[#allocation3 + $0x3]] (!%p213_p11)  ;;  %s2341_s0 = sld [smem:[#allocation3 + $0x5]] (!%p213_p11)  ;;  %v292_v1 = vstv (!%p213_p11), %s2313_s25 }
  0x3a   : > { %s260_s23 = scalar_select %p259_p12, %s2194_s12, 1  ;;  %v294_v4 = vstv %s2317_s27  ;;  %v296_v5 = vstv %s2319_s28 }
  0x3b   : > { %v298_v6 = vstv %s2321_s29  ;;  %s2351_s1 = sld [smem:[#allocation3 + $0x6]]  ;;  %s2357_s24 = sld [smem:[#allocation3 + $0x8]] }
  0x3c   : > { %s2315_s26 = sshll.u32 %s260_s23, 7  ;;  %s2339_s23 = sld [smem:[#allocation3 + $0x4]]  ;;  %v300_v7 = vstv %s2329_s7  ;;  %v302_v8 = vstv %s2331_s8 }
  0x3d   : > { %s2327_s30 = scalar_lea.vmem %s3148_s3, %s2315_s26  ;;  %s2353_s3 = sld [smem:[#allocation3 + $0x7]]  ;;  %v304_v9 = vstv %s2333_s9  ;;  %v308_v10 = vstv %s307_s15 }
  0x3e   : > { %v305_v2 = vld [vmem:[%s2327_s30] sm:$0xff]  ;;  %v306_v3 = vld [vmem:[%s2327_s30 + $0x8] sm:$0xff]  ;;  %v314_v11 = vstv %s1763_s16  ;;  %s2359_s25 = sld [smem:[#allocation3 + $0x9]]  ;;  %v320_v16 = vstv %s2335_s18  ;;  %s2369_s29 = scalar_lea.vmem %s3140_s4, %s2315_s26 }
  0x3f   : > { %v309_v12 = vmul.f32 %v308_v10, %v305_v2  ;;  %v310_v13 = vmul.f32 %v308_v10, %v306_v3  ;;  %v315_v14 = vmul.f32 %v314_v11, %v305_v2  ;;  %v316_v15 = vmul.f32 %v314_v11, %v306_v3  ;;  %s2371_s7 = sld [smem:[#allocation3 + $0xa]]  ;;  %s2373_s8 = sld [smem:[#allocation3 + $0xb]]  ;;  %v355_v40 = vld [vmem:[%s2369_s29] sm:$0xff]  ;;  %v356_v41 = vld [vmem:[%s2369_s29 + $0x8] sm:$0xff] }
  0x40   : > { %v326_v17 = vstv %s2337_s20  ;;  %v338_v19 = vstv %s2341_s0  ;;  %v321_v24 = vmul.f32 %v320_v16, %v305_v2  ;;  %v322_v25 = vmul.f32 %v320_v16, %v306_v3  ;;  %s2375_s9 = sld [smem:[#allocation3 + $0xc]]  ;;  %s2377_s15 = sld [smem:[#allocation3 + $0xd]] }
  0x41   : > { %v311_v20 = vadd.f32 %v309_v12, %v290_v0  ;;  %v312_v21 = vadd.f32 %v310_v13, %v290_v0  ;;  %v317_v22 = vadd.f32 %v315_v14, %v292_v1  ;;  %v318_v23 = vadd.f32 %v316_v15, %v292_v1  ;;  %s2385_s16 = sld [smem:[#allocation3 + $0xe]]  ;;  %s2387_s18 = sld [smem:[#allocation3 + $0xf]] }
  0x42   : > { %v332_v18 = vstv %s2339_s23  ;;  %v327_v26 = vmul.f32 %v326_v17, %v305_v2  ;;  %v328_v27 = vmul.f32 %v326_v17, %v306_v3  ;;  %v339_v30 = vmul.f32 %v338_v19, %v305_v2  ;;  %s2391_s20 = sld [smem:[#allocation3 + $0x11]]  ;;  %s2409_s27 = sld [smem:[#allocation3 + $0x15]] }
  0x43   : > { %v333_v28 = vmul.f32 %v332_v18, %v305_v2  ;;  %v334_v29 = vmul.f32 %v332_v18, %v306_v3  ;;  %v340_v31 = vmul.f32 %v338_v19, %v306_v3  ;;  %v323_v32 = vadd.f32 %v321_v24, %v294_v4  ;;  %s2417_s28 = sld [smem:[#allocation3 + $0x16]]  ;;  %s2445_s23 = sld [smem:[#allocation3 + $0x1f]] }
  0x44   : > { %v324_v33 = vadd.f32 %v322_v25, %v294_v4  ;;  %v329_v34 = vadd.f32 %v327_v26, %v296_v5  ;;  %v330_v35 = vadd.f32 %v328_v27, %v296_v5  ;;  %v341_v38 = vadd.f32 %v339_v30, %v300_v7  ;;  %s2447_s0 = sld [smem:[#allocation3 + $0x20]] }
  0x45   : > { %v335_v36 = vadd.f32 %v333_v28, %v298_v6  ;;  %v336_v37 = vadd.f32 %v334_v29, %v298_v6  ;;  %v342_v39 = vadd.f32 %v340_v31, %v300_v7  ;;  %v344_v42 = vstv %s2351_s1  ;;  %s2397_s1 = scalar_lea.vmem %s3141_s5, %s2315_s26  ;;  %s2407_s26 = sld [smem:[#allocation3 + $0x14]] }
  0x46   : > { %v350_v43 = vstv %s2353_s3  ;;  %v358_v44 = vstv %s2357_s24  ;;  %v364_v45 = vstv %s2359_s25  ;;  %v345_v46 = vmul.f32 %v344_v42, %v305_v2  ;;  %s2389_s3 = sld [smem:[#allocation3 + $0x10]]  ;;  %s2403_s24 = sld [smem:[#allocation3 + $0x12]]  ;;  %v405_v18 = vld [vmem:[%s2397_s1] sm:$0xff] }
  0x47   : > { %v346_v47 = vmul.f32 %v344_v42, %v306_v3  ;;  %v351_v48 = vmul.f32 %v350_v43, %v305_v2  ;;  %v352_v49 = vmul.f32 %v350_v43, %v306_v3  ;;  %v359_v50 = vmul.f32 %v358_v44, %v355_v40  ;;  %s2405_s25 = sld [smem:[#allocation3 + $0x13]]  ;;  %v406_v19 = vld [vmem:[%s2397_s1 + $0x8] sm:$0xff] }
  0x48   : > { %v360_v51 = vmul.f32 %v358_v44, %v356_v41  ;;  %v365_v52 = vmul.f32 %v364_v45, %v355_v40  ;;  %v366_v53 = vmul.f32 %v364_v45, %v356_v41  ;;  %v347_v54 = vadd.f32 %v345_v46, %v302_v8 }
  0x49   : > { %v348_v55 = vadd.f32 %v346_v47, %v302_v8  ;;  %v353_v56 = vadd.f32 %v351_v48, %v304_v9  ;;  %v354_v57 = vadd.f32 %v352_v49, %v304_v9  ;;  %v361_v58 = vadd.f32 %v359_v50, %v311_v20 }
  0x4a   : > { %v362_v59 = vadd.f32 %v360_v51, %v312_v21  ;;  %v367_v60 = vadd.f32 %v365_v52, %v317_v22  ;;  %v368_v61 = vadd.f32 %v366_v53, %v318_v23  ;;  %v370_v62 = vstv %s2371_s7  ;;  %s2419_s7 = sld [smem:[#allocation3 + $0x17]] }
  0x4b   : > { %v376_v63 = vstv %s2373_s8  ;;  %v382_v0 = vstv %s2375_s9  ;;  %v388_v1 = vstv %s2377_s15  ;;  %v371_v2 = vmul.f32 %v370_v62, %v355_v40  ;;  %s2421_s8 = sld [smem:[#allocation3 + $0x18]]  ;;  %s2423_s9 = sld [smem:[#allocation3 + $0x19]] }
  0x4c   : > { %v372_v3 = vmul.f32 %v370_v62, %v356_v41  ;;  %v377_v4 = vmul.f32 %v376_v63, %v355_v40  ;;  %v378_v5 = vmul.f32 %v376_v63, %v356_v41  ;;  %v383_v6 = vmul.f32 %v382_v0, %v355_v40  ;;  %s2429_s15 = sld [smem:[#allocation3 + $0x1a]] }
  0x4d   : > { %v384_v7 = vmul.f32 %v382_v0, %v356_v41  ;;  %v389_v8 = vmul.f32 %v388_v1, %v355_v40  ;;  %v390_v9 = vmul.f32 %v388_v1, %v356_v41  ;;  %v373_v10 = vadd.f32 %v371_v2, %v323_v32 }
  0x4e   : > { %v374_v11 = vadd.f32 %v372_v3, %v324_v33  ;;  %v379_v12 = vadd.f32 %v377_v4, %v329_v34  ;;  %v380_v13 = vadd.f32 %v378_v5, %v330_v35  ;;  %v385_v14 = vadd.f32 %v383_v6, %v335_v36 }
  0x4f   : > { %v386_v15 = vadd.f32 %v384_v7, %v336_v37  ;;  %v391_v16 = vadd.f32 %v389_v8, %v341_v38  ;;  %v392_v17 = vadd.f32 %v390_v9, %v342_v39  ;;  %v394_v20 = vstv %s2385_s16  ;;  %s2431_s16 = sld [smem:[#allocation3 + $0x1b]] }
  0x50   : > { %v400_v21 = vstv %s2387_s18  ;;  %v408_v22 = vstv %s2389_s3  ;;  %v414_v23 = vstv %s2391_s20  ;;  %v395_v24 = vmul.f32 %v394_v20, %v355_v40  ;;  %s2433_s18 = sld [smem:[#allocation3 + $0x1c]]  ;;  %s2435_s3 = sld [smem:[#allocation3 + $0x1d]] }
  0x51   : > { %v396_v25 = vmul.f32 %v394_v20, %v356_v41  ;;  %v401_v26 = vmul.f32 %v400_v21, %v355_v40  ;;  %v402_v27 = vmul.f32 %v400_v21, %v356_v41  ;;  %v409_v28 = vmul.f32 %v408_v22, %v405_v18  ;;  %s2443_s20 = sld [smem:[#allocation3 + $0x1e]] }
  0x52   : > { %v410_v29 = vmul.f32 %v408_v22, %v406_v19  ;;  %v415_v30 = vmul.f32 %v414_v23, %v405_v18  ;;  %v416_v31 = vmul.f32 %v414_v23, %v406_v19  ;;  %v397_v32 = vadd.f32 %v395_v24, %v347_v54 }
  0x53   : > { %v398_v33 = vadd.f32 %v396_v25, %v348_v55  ;;  %v403_v34 = vadd.f32 %v401_v26, %v353_v56  ;;  %v404_v35 = vadd.f32 %v402_v27, %v354_v57  ;;  %v411_v36 = vadd.f32 %v409_v28, %v361_v58 }
  0x54   : > { %v412_v37 = vadd.f32 %v410_v29, %v362_v59  ;;  %v417_v38 = vadd.f32 %v415_v30, %v367_v60  ;;  %v418_v39 = vadd.f32 %v416_v31, %v368_v61  ;;  %v420_v40 = vstv %s2403_s24  ;;  %v1786_v60 = vld [vmem:[%s2327_s30 + $0x10] sm:$0xff]  ;;  %v1787_v61 = vld [vmem:[%s2327_s30 + $0x18] sm:$0xff]  ;;  %s2449_s24 = sld [smem:[#allocation3 + $0x21]] }
  0x55   : > { %v426_v41 = vstv %s2405_s25  ;;  %v432_v42 = vstv %s2407_s26  ;;  %v438_v43 = vstv %s2409_s27  ;;  %v421_v44 = vmul.f32 %v420_v40, %v405_v18  ;;  %s2455_s25 = sld [smem:[#allocation3 + $0x22]]  ;;  %s2457_s26 = sld [smem:[#allocation3 + $0x23]] }
  0x56   : > { %v422_v45 = vmul.f32 %v420_v40, %v406_v19  ;;  %v427_v46 = vmul.f32 %v426_v41, %v405_v18  ;;  %v428_v47 = vmul.f32 %v426_v41, %v406_v19  ;;  %v433_v48 = vmul.f32 %v432_v42, %v405_v18  ;;  %s2459_s27 = sld [smem:[#allocation3 + $0x24]] }
  0x57   : > { %v434_v49 = vmul.f32 %v432_v42, %v406_v19  ;;  %v439_v50 = vmul.f32 %v438_v43, %v405_v18  ;;  %v440_v51 = vmul.f32 %v438_v43, %v406_v19  ;;  %v423_v52 = vadd.f32 %v421_v44, %v373_v10 }
  0x58   : > { %v424_v53 = vadd.f32 %v422_v45, %v374_v11  ;;  %v429_v54 = vadd.f32 %v427_v46, %v379_v12  ;;  %v430_v55 = vadd.f32 %v428_v47, %v380_v13  ;;  %v435_v56 = vadd.f32 %v433_v48, %v385_v14 }
  0x59   : > { %v436_v57 = vadd.f32 %v434_v49, %v386_v15  ;;  %v441_v58 = vadd.f32 %v439_v50, %v391_v16  ;;  %v442_v59 = vadd.f32 %v440_v51, %v392_v17  ;;  %v444_v62 = vstv %s2417_s28  ;;  %s2461_s28 = sld [smem:[#allocation3 + $0x25]] }
  0x5a   : > { %v450_v63 = vstv %s2419_s7  ;;  %v459_v0 = vstv %s2421_s8  ;;  %v465_v1 = vstv %s2423_s9  ;;  %v445_v2 = vmul.f32 %v444_v62, %v405_v18  ;;  %s2469_s7 = sld [smem:[#allocation3 + $0x26]]  ;;  %s2471_s8 = sld [smem:[#allocation3 + $0x27]] }
  0x5b   : > { %v446_v3 = vmul.f32 %v444_v62, %v406_v19  ;;  %v451_v4 = vmul.f32 %v450_v63, %v405_v18  ;;  %v452_v5 = vmul.f32 %v450_v63, %v406_v19  ;;  %v460_v6 = vmul.f32 %v1786_v60, %v459_v0  ;;  %s2473_s9 = sld [smem:[#allocation3 + $0x28]] }
  0x5c   : > { %v461_v7 = vmul.f32 %v1787_v61, %v459_v0  ;;  %v466_v8 = vmul.f32 %v1786_v60, %v465_v1  ;;  %v467_v9 = vmul.f32 %v1787_v61, %v465_v1  ;;  %v447_v10 = vadd.f32 %v445_v2, %v397_v32 }
  0x5d   : > { %v448_v11 = vadd.f32 %v446_v3, %v398_v33  ;;  %v453_v12 = vadd.f32 %v451_v4, %v403_v34  ;;  %v454_v13 = vadd.f32 %v452_v5, %v404_v35  ;;  %v462_v14 = vadd.f32 %v460_v6, %v411_v36 }
  0x5e   : > { %v463_v15 = vadd.f32 %v461_v7, %v412_v37  ;;  %v468_v16 = vadd.f32 %v466_v8, %v417_v38  ;;  %v469_v17 = vadd.f32 %v467_v9, %v418_v39  ;;  %v471_v18 = vstv %s2429_s15  ;;  %v1796_v38 = vld [vmem:[%s2369_s29 + $0x10] sm:$0xff]  ;;  %v1797_v39 = vld [vmem:[%s2369_s29 + $0x18] sm:$0xff]  ;;  %s2475_s15 = sld [smem:[#allocation3 + $0x29]] }
  0x5f   : > { %v477_v19 = vstv %s2431_s16  ;;  %v483_v20 = vstv %s2433_s18  ;;  %v489_v21 = vstv %s2435_s3  ;;  %v472_v22 = vmul.f32 %v1786_v60, %v471_v18  ;;  %s2481_s16 = sld [smem:[#allocation3 + $0x2a]]  ;;  %s2483_s18 = sld [smem:[#allocation3 + $0x2b]] }
  0x60   : > { %v473_v23 = vmul.f32 %v1787_v61, %v471_v18  ;;  %v478_v24 = vmul.f32 %v1786_v60, %v477_v19  ;;  %v479_v25 = vmul.f32 %v1787_v61, %v477_v19  ;;  %v484_v26 = vmul.f32 %v1786_v60, %v483_v20  ;;  %s2485_s3 = sld [smem:[#allocation3 + $0x2c]] }
  0x61   : > { %v485_v27 = vmul.f32 %v1787_v61, %v483_v20  ;;  %v490_v28 = vmul.f32 %v1786_v60, %v489_v21  ;;  %v491_v29 = vmul.f32 %v1787_v61, %v489_v21  ;;  %v474_v30 = vadd.f32 %v472_v22, %v423_v52 }
  0x62   : > { %v475_v31 = vadd.f32 %v473_v23, %v424_v53  ;;  %v480_v32 = vadd.f32 %v478_v24, %v429_v54  ;;  %v481_v33 = vadd.f32 %v479_v25, %v430_v55  ;;  %v486_v34 = vadd.f32 %v484_v26, %v435_v56 }
  0x63   : > { %v487_v35 = vadd.f32 %v485_v27, %v436_v57  ;;  %v492_v36 = vadd.f32 %v490_v28, %v441_v58  ;;  %v493_v37 = vadd.f32 %v491_v29, %v442_v59  ;;  %v495_v40 = vstv %s2443_s20  ;;  %s2487_s20 = sld [smem:[#allocation3 + $0x2d]] }
  0x64   : > { %v501_v41 = vstv %s2445_s23  ;;  %v510_v42 = vstv %s2447_s0  ;;  %v516_v43 = vstv %s2449_s24  ;;  %v496_v44 = vmul.f32 %v1786_v60, %v495_v40  ;;  %s2495_s23 = sld [smem:[#allocation3 + $0x2e]]  ;;  %s2497_s0 = sld [smem:[#allocation3 + $0x2f]] }
  0x65   : > { %v497_v45 = vmul.f32 %v1787_v61, %v495_v40  ;;  %v502_v46 = vmul.f32 %v1786_v60, %v501_v41  ;;  %v503_v47 = vmul.f32 %v1787_v61, %v501_v41  ;;  %v511_v48 = vmul.f32 %v1796_v38, %v510_v42  ;;  %s2499_s24 = sld [smem:[#allocation3 + $0x30]] }
  0x66   : > { %v512_v49 = vmul.f32 %v1797_v39, %v510_v42  ;;  %v517_v50 = vmul.f32 %v1796_v38, %v516_v43  ;;  %v518_v51 = vmul.f32 %v1797_v39, %v516_v43  ;;  %v498_v52 = vadd.f32 %v496_v44, %v447_v10 }
  0x67   : > { %v499_v53 = vadd.f32 %v497_v45, %v448_v11  ;;  %v504_v54 = vadd.f32 %v502_v46, %v453_v12  ;;  %v505_v55 = vadd.f32 %v503_v47, %v454_v13  ;;  %v513_v56 = vadd.f32 %v511_v48, %v462_v14 }
  0x68   : > { %v514_v57 = vadd.f32 %v512_v49, %v463_v15  ;;  %v519_v58 = vadd.f32 %v517_v50, %v468_v16  ;;  %v520_v59 = vadd.f32 %v518_v51, %v469_v17  ;;  %v522_v60 = vstv %s2455_s25  ;;  %v1806_v16 = vld [vmem:[%s2397_s1 + $0x10] sm:$0xff]  ;;  %v1807_v17 = vld [vmem:[%s2397_s1 + $0x18] sm:$0xff]  ;;  %s2501_s25 = sld [smem:[#allocation3 + $0x31]] }
  0x69   : > { %v528_v61 = vstv %s2457_s26  ;;  %v534_v62 = vstv %s2459_s27  ;;  %v540_v63 = vstv %s2461_s28  ;;  %v523_v0 = vmul.f32 %v1796_v38, %v522_v60  ;;  %s2507_s26 = sld [smem:[#allocation3 + $0x32]]  ;;  %s2509_s27 = sld [smem:[#allocation3 + $0x33]] }
  0x6a   : > { %v524_v1 = vmul.f32 %v1797_v39, %v522_v60  ;;  %v529_v2 = vmul.f32 %v1796_v38, %v528_v61  ;;  %v530_v3 = vmul.f32 %v1797_v39, %v528_v61  ;;  %v535_v4 = vmul.f32 %v1796_v38, %v534_v62  ;;  %s2511_s28 = sld [smem:[#allocation3 + $0x34]] }
  0x6b   : > { %v536_v5 = vmul.f32 %v1797_v39, %v534_v62  ;;  %v541_v6 = vmul.f32 %v1796_v38, %v540_v63  ;;  %v542_v7 = vmul.f32 %v1797_v39, %v540_v63  ;;  %v525_v8 = vadd.f32 %v523_v0, %v474_v30 }
  0x6c   : > { %v526_v9 = vadd.f32 %v524_v1, %v475_v31  ;;  %v531_v10 = vadd.f32 %v529_v2, %v480_v32  ;;  %v532_v11 = vadd.f32 %v530_v3, %v481_v33  ;;  %v537_v12 = vadd.f32 %v535_v4, %v486_v34 }
  0x6d   : > { %v538_v13 = vadd.f32 %v536_v5, %v487_v35  ;;  %v543_v14 = vadd.f32 %v541_v6, %v492_v36  ;;  %v544_v15 = vadd.f32 %v542_v7, %v493_v37  ;;  %v546_v18 = vstv %s2469_s7  ;;  %s2513_s7 = sld [smem:[#allocation3 + $0x35]] }
  0x6e   : > { %v552_v19 = vstv %s2471_s8  ;;  %v561_v20 = vstv %s2473_s9  ;;  %v567_v21 = vstv %s2475_s15  ;;  %v547_v22 = vmul.f32 %v1796_v38, %v546_v18  ;;  %s2521_s8 = sld [smem:[#allocation3 + $0x36]]  ;;  %s2523_s9 = sld [smem:[#allocation3 + $0x37]] }
  0x6f   : > { %v548_v23 = vmul.f32 %v1797_v39, %v546_v18  ;;  %v553_v24 = vmul.f32 %v1796_v38, %v552_v19  ;;  %v554_v25 = vmul.f32 %v1797_v39, %v552_v19  ;;  %v562_v26 = vmul.f32 %v1806_v16, %v561_v20  ;;  %s2525_s15 = sld [smem:[#allocation3 + $0x38]] }
  0x70   : > { %v563_v27 = vmul.f32 %v1807_v17, %v561_v20  ;;  %v568_v28 = vmul.f32 %v1806_v16, %v567_v21  ;;  %v569_v29 = vmul.f32 %v1807_v17, %v567_v21  ;;  %v549_v30 = vadd.f32 %v547_v22, %v498_v52 }
  0x71   : > { %v550_v31 = vadd.f32 %v548_v23, %v499_v53  ;;  %v555_v32 = vadd.f32 %v553_v24, %v504_v54  ;;  %v556_v33 = vadd.f32 %v554_v25, %v505_v55  ;;  %v564_v34 = vadd.f32 %v562_v26, %v513_v56 }
  0x72   : > { %v565_v35 = vadd.f32 %v563_v27, %v514_v57  ;;  %v570_v36 = vadd.f32 %v568_v28, %v519_v58  ;;  %v571_v37 = vadd.f32 %v569_v29, %v520_v59  ;;  %v573_v38 = vstv %s2481_s16  ;;  %v1816_v58 = vld [vmem:[%s2327_s30 + $0x20] sm:$0xff]  ;;  %v1817_v59 = vld [vmem:[%s2327_s30 + $0x28] sm:$0xff]  ;;  %s2527_s16 = sld [smem:[#allocation3 + $0x39]] }
  0x73   : > { %v579_v39 = vstv %s2483_s18  ;;  %v585_v40 = vstv %s2485_s3  ;;  %v591_v41 = vstv %s2487_s20  ;;  %v574_v42 = vmul.f32 %v1806_v16, %v573_v38  ;;  %s2533_s18 = sld [smem:[#allocation3 + $0x3a]]  ;;  %s2535_s3 = sld [smem:[#allocation3 + $0x3b]] }
  0x74   : > { %v575_v43 = vmul.f32 %v1807_v17, %v573_v38  ;;  %v580_v44 = vmul.f32 %v1806_v16, %v579_v39  ;;  %v581_v45 = vmul.f32 %v1807_v17, %v579_v39  ;;  %v586_v46 = vmul.f32 %v1806_v16, %v585_v40  ;;  %s2537_s20 = sld [smem:[#allocation3 + $0x3c]] }
  0x75   : > { %v587_v47 = vmul.f32 %v1807_v17, %v585_v40  ;;  %v592_v48 = vmul.f32 %v1806_v16, %v591_v41  ;;  %v593_v49 = vmul.f32 %v1807_v17, %v591_v41  ;;  %v576_v50 = vadd.f32 %v574_v42, %v525_v8 }
  0x76   : > { %v577_v51 = vadd.f32 %v575_v43, %v526_v9  ;;  %v582_v52 = vadd.f32 %v580_v44, %v531_v10  ;;  %v583_v53 = vadd.f32 %v581_v45, %v532_v11  ;;  %v588_v54 = vadd.f32 %v586_v46, %v537_v12 }
  0x77   : > { %v589_v55 = vadd.f32 %v587_v47, %v538_v13  ;;  %v594_v56 = vadd.f32 %v592_v48, %v543_v14  ;;  %v595_v57 = vadd.f32 %v593_v49, %v544_v15  ;;  %v597_v60 = vstv %s2495_s23  ;;  %s2539_s23 = sld [smem:[#allocation3 + $0x3d]] }
  0x78   : > { %v603_v61 = vstv %s2497_s0  ;;  %v612_v62 = vstv %s2499_s24  ;;  %v618_v63 = vstv %s2501_s25  ;;  %v598_v0 = vmul.f32 %v1806_v16, %v597_v60  ;;  %s2547_s0 = sld [smem:[#allocation3 + $0x3e]]  ;;  %s2549_s24 = sld [smem:[#allocation3 + $0x3f]] }
  0x79   : > { %v599_v1 = vmul.f32 %v1807_v17, %v597_v60  ;;  %v604_v2 = vmul.f32 %v1806_v16, %v603_v61  ;;  %v605_v3 = vmul.f32 %v1807_v17, %v603_v61  ;;  %v613_v4 = vmul.f32 %v1816_v58, %v612_v62  ;;  %s2551_s25 = sld [smem:[#allocation3 + $0x40]] }
  0x7a   : > { %v614_v5 = vmul.f32 %v1817_v59, %v612_v62  ;;  %v619_v6 = vmul.f32 %v1816_v58, %v618_v63  ;;  %v620_v7 = vmul.f32 %v1817_v59, %v618_v63  ;;  %v600_v8 = vadd.f32 %v598_v0, %v549_v30 }
  0x7b   : > { %v601_v9 = vadd.f32 %v599_v1, %v550_v31  ;;  %v606_v10 = vadd.f32 %v604_v2, %v555_v32  ;;  %v607_v11 = vadd.f32 %v605_v3, %v556_v33  ;;  %v615_v12 = vadd.f32 %v613_v4, %v564_v34 }
  0x7c   : > { %v616_v13 = vadd.f32 %v614_v5, %v565_v35  ;;  %v621_v14 = vadd.f32 %v619_v6, %v570_v36  ;;  %v622_v15 = vadd.f32 %v620_v7, %v571_v37  ;;  %v624_v16 = vstv %s2507_s26  ;;  %v1826_v36 = vld [vmem:[%s2369_s29 + $0x20] sm:$0xff]  ;;  %v1827_v37 = vld [vmem:[%s2369_s29 + $0x28] sm:$0xff]  ;;  %s2553_s26 = sld [smem:[#allocation3 + $0x41]] }
  0x7d   : > { %v630_v17 = vstv %s2509_s27  ;;  %v636_v18 = vstv %s2511_s28  ;;  %v642_v19 = vstv %s2513_s7  ;;  %v625_v20 = vmul.f32 %v1816_v58, %v624_v16  ;;  %s2559_s27 = sld [smem:[#allocation3 + $0x42]]  ;;  %s2561_s28 = sld [smem:[#allocation3 + $0x43]] }
  0x7e   : > { %v626_v21 = vmul.f32 %v1817_v59, %v624_v16  ;;  %v631_v22 = vmul.f32 %v1816_v58, %v630_v17  ;;  %v632_v23 = vmul.f32 %v1817_v59, %v630_v17  ;;  %v637_v24 = vmul.f32 %v1816_v58, %v636_v18  ;;  %s2563_s7 = sld [smem:[#allocation3 + $0x44]] }
  0x7f   : > { %v638_v25 = vmul.f32 %v1817_v59, %v636_v18  ;;  %v643_v26 = vmul.f32 %v1816_v58, %v642_v19  ;;  %v644_v27 = vmul.f32 %v1817_v59, %v642_v19  ;;  %v627_v28 = vadd.f32 %v625_v20, %v576_v50 }
  0x80   : > { %v628_v29 = vadd.f32 %v626_v21, %v577_v51  ;;  %v633_v30 = vadd.f32 %v631_v22, %v582_v52  ;;  %v634_v31 = vadd.f32 %v632_v23, %v583_v53  ;;  %v639_v32 = vadd.f32 %v637_v24, %v588_v54 }
  0x81   : > { %v640_v33 = vadd.f32 %v638_v25, %v589_v55  ;;  %v645_v34 = vadd.f32 %v643_v26, %v594_v56  ;;  %v646_v35 = vadd.f32 %v644_v27, %v595_v57  ;;  %v648_v38 = vstv %s2521_s8  ;;  %s2565_s8 = sld [smem:[#allocation3 + $0x45]] }
  0x82   : > { %v654_v39 = vstv %s2523_s9  ;;  %v663_v40 = vstv %s2525_s15  ;;  %v669_v41 = vstv %s2527_s16  ;;  %v649_v42 = vmul.f32 %v1816_v58, %v648_v38  ;;  %s2573_s9 = sld [smem:[#allocation3 + $0x46]]  ;;  %s2575_s15 = sld [smem:[#allocation3 + $0x47]] }
  0x83   : > { %v650_v43 = vmul.f32 %v1817_v59, %v648_v38  ;;  %v655_v44 = vmul.f32 %v1816_v58, %v654_v39  ;;  %v656_v45 = vmul.f32 %v1817_v59, %v654_v39  ;;  %v664_v46 = vmul.f32 %v1826_v36, %v663_v40  ;;  %s2577_s16 = sld [smem:[#allocation3 + $0x48]] }
  0x84   : > { %v665_v47 = vmul.f32 %v1827_v37, %v663_v40  ;;  %v670_v48 = vmul.f32 %v1826_v36, %v669_v41  ;;  %v671_v49 = vmul.f32 %v1827_v37, %v669_v41  ;;  %v651_v50 = vadd.f32 %v649_v42, %v600_v8 }
  0x85   : > { %v652_v51 = vadd.f32 %v650_v43, %v601_v9  ;;  %v657_v52 = vadd.f32 %v655_v44, %v606_v10  ;;  %v658_v53 = vadd.f32 %v656_v45, %v607_v11  ;;  %v666_v54 = vadd.f32 %v664_v46, %v615_v12 }
  0x86   : > { %v667_v55 = vadd.f32 %v665_v47, %v616_v13  ;;  %v672_v56 = vadd.f32 %v670_v48, %v621_v14  ;;  %v673_v57 = vadd.f32 %v671_v49, %v622_v15  ;;  %v675_v58 = vstv %s2533_s18  ;;  %v1836_v14 = vld [vmem:[%s2397_s1 + $0x20] sm:$0xff]  ;;  %v1837_v15 = vld [vmem:[%s2397_s1 + $0x28] sm:$0xff]  ;;  %s2579_s18 = sld [smem:[#allocation3 + $0x49]] }
  0x87   : > { %v681_v59 = vstv %s2535_s3  ;;  %v687_v60 = vstv %s2537_s20  ;;  %v693_v61 = vstv %s2539_s23  ;;  %v676_v62 = vmul.f32 %v1826_v36, %v675_v58  ;;  %s2585_s3 = sld [smem:[#allocation3 + $0x4a]]  ;;  %s2587_s20 = sld [smem:[#allocation3 + $0x4b]] }
  0x88   : > { %v677_v63 = vmul.f32 %v1827_v37, %v675_v58  ;;  %v682_v0 = vmul.f32 %v1826_v36, %v681_v59  ;;  %v683_v1 = vmul.f32 %v1827_v37, %v681_v59  ;;  %v688_v2 = vmul.f32 %v1826_v36, %v687_v60  ;;  %s2589_s23 = sld [smem:[#allocation3 + $0x4c]] }
  0x89   : > { %v689_v3 = vmul.f32 %v1827_v37, %v687_v60  ;;  %v694_v4 = vmul.f32 %v1826_v36, %v693_v61  ;;  %v695_v5 = vmul.f32 %v1827_v37, %v693_v61  ;;  %v678_v6 = vadd.f32 %v676_v62, %v627_v28 }
  0x8a   : > { %v679_v7 = vadd.f32 %v677_v63, %v628_v29  ;;  %v684_v8 = vadd.f32 %v682_v0, %v633_v30  ;;  %v685_v9 = vadd.f32 %v683_v1, %v634_v31  ;;  %v690_v10 = vadd.f32 %v688_v2, %v639_v32 }
  0x8b   : > { %v691_v11 = vadd.f32 %v689_v3, %v640_v33  ;;  %v696_v12 = vadd.f32 %v694_v4, %v645_v34  ;;  %v697_v13 = vadd.f32 %v695_v5, %v646_v35  ;;  %v699_v16 = vstv %s2547_s0  ;;  %s2591_s0 = sld [smem:[#allocation3 + $0x4d]] }
  0x8c   : > { %v705_v17 = vstv %s2549_s24  ;;  %v714_v18 = vstv %s2551_s25  ;;  %v720_v19 = vstv %s2553_s26  ;;  %v700_v20 = vmul.f32 %v1826_v36, %v699_v16  ;;  %s2599_s24 = sld [smem:[#allocation3 + $0x4e]]  ;;  %s2601_s25 = sld [smem:[#allocation3 + $0x4f]] }
  0x8d   : > { %v701_v21 = vmul.f32 %v1827_v37, %v699_v16  ;;  %v706_v22 = vmul.f32 %v1826_v36, %v705_v17  ;;  %v707_v23 = vmul.f32 %v1827_v37, %v705_v17  ;;  %v715_v24 = vmul.f32 %v1836_v14, %v714_v18  ;;  %s2603_s26 = sld [smem:[#allocation3 + $0x50]] }
  0x8e   : > { %v716_v25 = vmul.f32 %v1837_v15, %v714_v18  ;;  %v721_v26 = vmul.f32 %v1836_v14, %v720_v19  ;;  %v722_v27 = vmul.f32 %v1837_v15, %v720_v19  ;;  %v702_v28 = vadd.f32 %v700_v20, %v651_v50 }
  0x8f   : > { %v703_v29 = vadd.f32 %v701_v21, %v652_v51  ;;  %v708_v30 = vadd.f32 %v706_v22, %v657_v52  ;;  %v709_v31 = vadd.f32 %v707_v23, %v658_v53  ;;  %v717_v32 = vadd.f32 %v715_v24, %v666_v54 }
  0x90   : > { %v718_v33 = vadd.f32 %v716_v25, %v667_v55  ;;  %v723_v34 = vadd.f32 %v721_v26, %v672_v56  ;;  %v724_v35 = vadd.f32 %v722_v27, %v673_v57  ;;  %v726_v36 = vstv %s2559_s27  ;;  %v1846_v56 = vld [vmem:[%s2327_s30 + $0x30] sm:$0xff]  ;;  %v1847_v57 = vld [vmem:[%s2327_s30 + $0x38] sm:$0xff]  ;;  %s2605_s27 = sld [smem:[#allocation3 + $0x51]] }
  0x91   : > { %v732_v37 = vstv %s2561_s28  ;;  %v738_v38 = vstv %s2563_s7  ;;  %v744_v39 = vstv %s2565_s8  ;;  %v727_v40 = vmul.f32 %v1836_v14, %v726_v36  ;;  %s2611_s28 = sld [smem:[#allocation3 + $0x52]]  ;;  %s2613_s7 = sld [smem:[#allocation3 + $0x53]] }
  0x92   : > { %v728_v41 = vmul.f32 %v1837_v15, %v726_v36  ;;  %v733_v42 = vmul.f32 %v1836_v14, %v732_v37  ;;  %v734_v43 = vmul.f32 %v1837_v15, %v732_v37  ;;  %v739_v44 = vmul.f32 %v1836_v14, %v738_v38  ;;  %s2615_s8 = sld [smem:[#allocation3 + $0x54]] }
  0x93   : > { %v740_v45 = vmul.f32 %v1837_v15, %v738_v38  ;;  %v745_v46 = vmul.f32 %v1836_v14, %v744_v39  ;;  %v746_v47 = vmul.f32 %v1837_v15, %v744_v39  ;;  %v729_v48 = vadd.f32 %v727_v40, %v678_v6 }
  0x94   : > { %v730_v49 = vadd.f32 %v728_v41, %v679_v7  ;;  %v735_v50 = vadd.f32 %v733_v42, %v684_v8  ;;  %v736_v51 = vadd.f32 %v734_v43, %v685_v9  ;;  %v741_v52 = vadd.f32 %v739_v44, %v690_v10 }
  0x95   : > { %v742_v53 = vadd.f32 %v740_v45, %v691_v11  ;;  %v747_v54 = vadd.f32 %v745_v46, %v696_v12  ;;  %v748_v55 = vadd.f32 %v746_v47, %v697_v13  ;;  %v750_v58 = vstv %s2573_s9  ;;  %s2617_s9 = sld [smem:[#allocation3 + $0x55]] }
  0x96   : > { %v756_v59 = vstv %s2575_s15  ;;  %v765_v60 = vstv %s2577_s16  ;;  %v771_v61 = vstv %s2579_s18  ;;  %v751_v62 = vmul.f32 %v1836_v14, %v750_v58  ;;  %s2625_s15 = sld [smem:[#allocation3 + $0x56]]  ;;  %s2627_s16 = sld [smem:[#allocation3 + $0x57]] }
  0x97   : > { %v752_v63 = vmul.f32 %v1837_v15, %v750_v58  ;;  %v757_v0 = vmul.f32 %v1836_v14, %v756_v59  ;;  %v758_v1 = vmul.f32 %v1837_v15, %v756_v59  ;;  %v766_v2 = vmul.f32 %v1846_v56, %v765_v60  ;;  %s2629_s18 = sld [smem:[#allocation3 + $0x58]] }
  0x98   : > { %v767_v3 = vmul.f32 %v1847_v57, %v765_v60  ;;  %v772_v4 = vmul.f32 %v1846_v56, %v771_v61  ;;  %v773_v5 = vmul.f32 %v1847_v57, %v771_v61  ;;  %v753_v6 = vadd.f32 %v751_v62, %v702_v28 }
  0x99   : > { %v754_v7 = vadd.f32 %v752_v63, %v703_v29  ;;  %v759_v8 = vadd.f32 %v757_v0, %v708_v30  ;;  %v760_v9 = vadd.f32 %v758_v1, %v709_v31  ;;  %v768_v10 = vadd.f32 %v766_v2, %v717_v32 }
  0x9a   : > { %v769_v11 = vadd.f32 %v767_v3, %v718_v33  ;;  %v774_v12 = vadd.f32 %v772_v4, %v723_v34  ;;  %v775_v13 = vadd.f32 %v773_v5, %v724_v35  ;;  %v777_v14 = vstv %s2585_s3  ;;  %v1856_v34 = vld [vmem:[%s2369_s29 + $0x30] sm:$0xff]  ;;  %v1857_v35 = vld [vmem:[%s2369_s29 + $0x38] sm:$0xff]  ;;  %s2631_s3 = sld [smem:[#allocation3 + $0x59]] }
  0x9b   : > { %v783_v15 = vstv %s2587_s20  ;;  %v789_v16 = vstv %s2589_s23  ;;  %v795_v17 = vstv %s2591_s0  ;;  %v778_v18 = vmul.f32 %v1846_v56, %v777_v14  ;;  %s2637_s20 = sld [smem:[#allocation3 + $0x5a]]  ;;  %s2639_s23 = sld [smem:[#allocation3 + $0x5b]] }
  0x9c   : > { %v779_v19 = vmul.f32 %v1847_v57, %v777_v14  ;;  %v784_v20 = vmul.f32 %v1846_v56, %v783_v15  ;;  %v785_v21 = vmul.f32 %v1847_v57, %v783_v15  ;;  %v790_v22 = vmul.f32 %v1846_v56, %v789_v16  ;;  %s2641_s0 = sld [smem:[#allocation3 + $0x5c]] }
  0x9d   : > { %v791_v23 = vmul.f32 %v1847_v57, %v789_v16  ;;  %v796_v24 = vmul.f32 %v1846_v56, %v795_v17  ;;  %v797_v25 = vmul.f32 %v1847_v57, %v795_v17  ;;  %v780_v26 = vadd.f32 %v778_v18, %v729_v48 }
  0x9e   : > { %v781_v27 = vadd.f32 %v779_v19, %v730_v49  ;;  %v786_v28 = vadd.f32 %v784_v20, %v735_v50  ;;  %v787_v29 = vadd.f32 %v785_v21, %v736_v51  ;;  %v792_v30 = vadd.f32 %v790_v22, %v741_v52 }
  0x9f   : > { %v793_v31 = vadd.f32 %v791_v23, %v742_v53  ;;  %v798_v32 = vadd.f32 %v796_v24, %v747_v54  ;;  %v799_v33 = vadd.f32 %v797_v25, %v748_v55  ;;  %v801_v36 = vstv %s2599_s24  ;;  %s2643_s24 = sld [smem:[#allocation3 + $0x5d]] }
  0xa0   : > { %v807_v37 = vstv %s2601_s25  ;;  %v816_v38 = vstv %s2603_s26  ;;  %v822_v39 = vstv %s2605_s27  ;;  %v802_v40 = vmul.f32 %v1846_v56, %v801_v36  ;;  %s2651_s25 = sld [smem:[#allocation3 + $0x5e]]  ;;  %s2653_s26 = sld [smem:[#allocation3 + $0x5f]] }
  0xa1   : > { %v803_v41 = vmul.f32 %v1847_v57, %v801_v36  ;;  %v808_v42 = vmul.f32 %v1846_v56, %v807_v37  ;;  %v809_v43 = vmul.f32 %v1847_v57, %v807_v37  ;;  %v817_v44 = vmul.f32 %v1856_v34, %v816_v38  ;;  %s2655_s27 = sld [smem:[#allocation3 + $0x60]] }
  0xa2   : > { %v818_v45 = vmul.f32 %v1857_v35, %v816_v38  ;;  %v823_v46 = vmul.f32 %v1856_v34, %v822_v39  ;;  %v824_v47 = vmul.f32 %v1857_v35, %v822_v39  ;;  %v804_v48 = vadd.f32 %v802_v40, %v753_v6 }
  0xa3   : > { %v805_v49 = vadd.f32 %v803_v41, %v754_v7  ;;  %v810_v50 = vadd.f32 %v808_v42, %v759_v8  ;;  %v811_v51 = vadd.f32 %v809_v43, %v760_v9  ;;  %v819_v52 = vadd.f32 %v817_v44, %v768_v10 }
  0xa4   : > { %v820_v53 = vadd.f32 %v818_v45, %v769_v11  ;;  %v825_v54 = vadd.f32 %v823_v46, %v774_v12  ;;  %v826_v55 = vadd.f32 %v824_v47, %v775_v13  ;;  %v828_v56 = vstv %s2611_s28  ;;  %v1866_v12 = vld [vmem:[%s2397_s1 + $0x30] sm:$0xff]  ;;  %v1867_v13 = vld [vmem:[%s2397_s1 + $0x38] sm:$0xff]  ;;  %s2657_s28 = sld [smem:[#allocation3 + $0x61]] }
  0xa5   : > { %v834_v57 = vstv %s2613_s7  ;;  %v840_v58 = vstv %s2615_s8  ;;  %v846_v59 = vstv %s2617_s9  ;;  %v829_v60 = vmul.f32 %v1856_v34, %v828_v56  ;;  %s2663_s7 = sld [smem:[#allocation3 + $0x62]]  ;;  %s2665_s8 = sld [smem:[#allocation3 + $0x63]] }
  0xa6   : > { %v830_v61 = vmul.f32 %v1857_v35, %v828_v56  ;;  %v835_v62 = vmul.f32 %v1856_v34, %v834_v57  ;;  %v836_v63 = vmul.f32 %v1857_v35, %v834_v57  ;;  %v841_v0 = vmul.f32 %v1856_v34, %v840_v58  ;;  %s2667_s9 = sld [smem:[#allocation3 + $0x64]] }
  0xa7   : > { %v842_v1 = vmul.f32 %v1857_v35, %v840_v58  ;;  %v847_v2 = vmul.f32 %v1856_v34, %v846_v59  ;;  %v848_v3 = vmul.f32 %v1857_v35, %v846_v59  ;;  %v831_v4 = vadd.f32 %v829_v60, %v780_v26 }
  0xa8   : > { %v832_v5 = vadd.f32 %v830_v61, %v781_v27  ;;  %v837_v6 = vadd.f32 %v835_v62, %v786_v28  ;;  %v838_v7 = vadd.f32 %v836_v63, %v787_v29  ;;  %v843_v8 = vadd.f32 %v841_v0, %v792_v30 }
  0xa9   : > { %v844_v9 = vadd.f32 %v842_v1, %v793_v31  ;;  %v849_v10 = vadd.f32 %v847_v2, %v798_v32  ;;  %v850_v11 = vadd.f32 %v848_v3, %v799_v33  ;;  %v852_v14 = vstv %s2625_s15  ;;  %s2669_s15 = sld [smem:[#allocation3 + $0x65]] }
  0xaa   : > { %v858_v15 = vstv %s2627_s16  ;;  %v867_v16 = vstv %s2629_s18  ;;  %v873_v17 = vstv %s2631_s3  ;;  %v853_v18 = vmul.f32 %v1856_v34, %v852_v14  ;;  %s2677_s16 = sld [smem:[#allocation3 + $0x66]]  ;;  %s2679_s18 = sld [smem:[#allocation3 + $0x67]] }
  0xab   : > { %v854_v19 = vmul.f32 %v1857_v35, %v852_v14  ;;  %v859_v20 = vmul.f32 %v1856_v34, %v858_v15  ;;  %v860_v21 = vmul.f32 %v1857_v35, %v858_v15  ;;  %v868_v22 = vmul.f32 %v1866_v12, %v867_v16  ;;  %s2681_s3 = sld [smem:[#allocation3 + $0x68]] }
  0xac   : > { %v869_v23 = vmul.f32 %v1867_v13, %v867_v16  ;;  %v874_v24 = vmul.f32 %v1866_v12, %v873_v17  ;;  %v875_v25 = vmul.f32 %v1867_v13, %v873_v17  ;;  %v855_v26 = vadd.f32 %v853_v18, %v804_v48 }
  0xad   : > { %v856_v27 = vadd.f32 %v854_v19, %v805_v49  ;;  %v861_v28 = vadd.f32 %v859_v20, %v810_v50  ;;  %v862_v29 = vadd.f32 %v860_v21, %v811_v51  ;;  %v870_v30 = vadd.f32 %v868_v22, %v819_v52 }
  0xae   : > { %v871_v31 = vadd.f32 %v869_v23, %v820_v53  ;;  %v876_v32 = vadd.f32 %v874_v24, %v825_v54  ;;  %v877_v33 = vadd.f32 %v875_v25, %v826_v55  ;;  %v879_v34 = vstv %s2637_s20  ;;  %v1876_v54 = vld [vmem:[%s2327_s30 + $0x40] sm:$0xff]  ;;  %v1877_v55 = vld [vmem:[%s2327_s30 + $0x48] sm:$0xff]  ;;  %s2683_s20 = sld [smem:[#allocation3 + $0x69]] }
  0xaf   : > { %v885_v35 = vstv %s2639_s23  ;;  %v891_v36 = vstv %s2641_s0  ;;  %v897_v37 = vstv %s2643_s24  ;;  %v880_v38 = vmul.f32 %v1866_v12, %v879_v34  ;;  %s2689_s23 = sld [smem:[#allocation3 + $0x6a]]  ;;  %s2691_s0 = sld [smem:[#allocation3 + $0x6b]] }
  0xb0   : > { %v881_v39 = vmul.f32 %v1867_v13, %v879_v34  ;;  %v886_v40 = vmul.f32 %v1866_v12, %v885_v35  ;;  %v887_v41 = vmul.f32 %v1867_v13, %v885_v35  ;;  %v892_v42 = vmul.f32 %v1866_v12, %v891_v36  ;;  %s2693_s24 = sld [smem:[#allocation3 + $0x6c]] }
  0xb1   : > { %v893_v43 = vmul.f32 %v1867_v13, %v891_v36  ;;  %v898_v44 = vmul.f32 %v1866_v12, %v897_v37  ;;  %v899_v45 = vmul.f32 %v1867_v13, %v897_v37  ;;  %v882_v46 = vadd.f32 %v880_v38, %v831_v4 }
  0xb2   : > { %v883_v47 = vadd.f32 %v881_v39, %v832_v5  ;;  %v888_v48 = vadd.f32 %v886_v40, %v837_v6  ;;  %v889_v49 = vadd.f32 %v887_v41, %v838_v7  ;;  %v894_v50 = vadd.f32 %v892_v42, %v843_v8 }
  0xb3   : > { %v895_v51 = vadd.f32 %v893_v43, %v844_v9  ;;  %v900_v52 = vadd.f32 %v898_v44, %v849_v10  ;;  %v901_v53 = vadd.f32 %v899_v45, %v850_v11  ;;  %v903_v56 = vstv %s2651_s25  ;;  %s2695_s25 = sld [smem:[#allocation3 + $0x6d]] }
  0xb4   : > { %v909_v57 = vstv %s2653_s26  ;;  %v918_v58 = vstv %s2655_s27  ;;  %v924_v59 = vstv %s2657_s28  ;;  %v904_v60 = vmul.f32 %v1866_v12, %v903_v56  ;;  %s2703_s26 = sld [smem:[#allocation3 + $0x6e]]  ;;  %s2705_s27 = sld [smem:[#allocation3 + $0x6f]] }
  0xb5   : > { %v905_v61 = vmul.f32 %v1867_v13, %v903_v56  ;;  %v910_v62 = vmul.f32 %v1866_v12, %v909_v57  ;;  %v911_v63 = vmul.f32 %v1867_v13, %v909_v57  ;;  %v919_v0 = vmul.f32 %v1876_v54, %v918_v58  ;;  %s2707_s28 = sld [smem:[#allocation3 + $0x70]] }
  0xb6   : > { %v920_v1 = vmul.f32 %v1877_v55, %v918_v58  ;;  %v925_v2 = vmul.f32 %v1876_v54, %v924_v59  ;;  %v926_v3 = vmul.f32 %v1877_v55, %v924_v59  ;;  %v906_v4 = vadd.f32 %v904_v60, %v855_v26 }
  0xb7   : > { %v907_v5 = vadd.f32 %v905_v61, %v856_v27  ;;  %v912_v6 = vadd.f32 %v910_v62, %v861_v28  ;;  %v913_v7 = vadd.f32 %v911_v63, %v862_v29  ;;  %v921_v8 = vadd.f32 %v919_v0, %v870_v30 }
  0xb8   : > { %v922_v9 = vadd.f32 %v920_v1, %v871_v31  ;;  %v927_v10 = vadd.f32 %v925_v2, %v876_v32  ;;  %v928_v11 = vadd.f32 %v926_v3, %v877_v33  ;;  %v930_v12 = vstv %s2663_s7  ;;  %v1886_v32 = vld [vmem:[%s2369_s29 + $0x40] sm:$0xff]  ;;  %v1887_v33 = vld [vmem:[%s2369_s29 + $0x48] sm:$0xff]  ;;  %s2709_s7 = sld [smem:[#allocation3 + $0x71]] }
  0xb9   : > { %v936_v13 = vstv %s2665_s8  ;;  %v942_v14 = vstv %s2667_s9  ;;  %v948_v15 = vstv %s2669_s15  ;;  %v931_v16 = vmul.f32 %v1876_v54, %v930_v12  ;;  %s2715_s8 = sld [smem:[#allocation3 + $0x72]]  ;;  %s2717_s9 = sld [smem:[#allocation3 + $0x73]] }
  0xba   : > { %v932_v17 = vmul.f32 %v1877_v55, %v930_v12  ;;  %v937_v18 = vmul.f32 %v1876_v54, %v936_v13  ;;  %v938_v19 = vmul.f32 %v1877_v55, %v936_v13  ;;  %v943_v20 = vmul.f32 %v1876_v54, %v942_v14  ;;  %s2719_s15 = sld [smem:[#allocation3 + $0x74]] }
  0xbb   : > { %v944_v21 = vmul.f32 %v1877_v55, %v942_v14  ;;  %v949_v22 = vmul.f32 %v1876_v54, %v948_v15  ;;  %v950_v23 = vmul.f32 %v1877_v55, %v948_v15  ;;  %v933_v24 = vadd.f32 %v931_v16, %v882_v46 }
  0xbc   : > { %v934_v25 = vadd.f32 %v932_v17, %v883_v47  ;;  %v939_v26 = vadd.f32 %v937_v18, %v888_v48  ;;  %v940_v27 = vadd.f32 %v938_v19, %v889_v49  ;;  %v945_v28 = vadd.f32 %v943_v20, %v894_v50 }
  0xbd   : > { %v946_v29 = vadd.f32 %v944_v21, %v895_v51  ;;  %v951_v30 = vadd.f32 %v949_v22, %v900_v52  ;;  %v952_v31 = vadd.f32 %v950_v23, %v901_v53  ;;  %v954_v34 = vstv %s2677_s16  ;;  %s2721_s16 = sld [smem:[#allocation3 + $0x75]] }
  0xbe   : > { %v960_v35 = vstv %s2679_s18  ;;  %v969_v36 = vstv %s2681_s3  ;;  %v975_v37 = vstv %s2683_s20  ;;  %v955_v38 = vmul.f32 %v1876_v54, %v954_v34  ;;  %s2729_s18 = sld [smem:[#allocation3 + $0x76]]  ;;  %s2731_s3 = sld [smem:[#allocation3 + $0x77]] }
  0xbf   : > { %v956_v39 = vmul.f32 %v1877_v55, %v954_v34  ;;  %v961_v40 = vmul.f32 %v1876_v54, %v960_v35  ;;  %v962_v41 = vmul.f32 %v1877_v55, %v960_v35  ;;  %v970_v42 = vmul.f32 %v1886_v32, %v969_v36  ;;  %s2733_s20 = sld [smem:[#allocation3 + $0x78]] }
  0xc0   : > { %v971_v43 = vmul.f32 %v1887_v33, %v969_v36  ;;  %v976_v44 = vmul.f32 %v1886_v32, %v975_v37  ;;  %v977_v45 = vmul.f32 %v1887_v33, %v975_v37  ;;  %v957_v46 = vadd.f32 %v955_v38, %v906_v4 }
  0xc1   : > { %v958_v47 = vadd.f32 %v956_v39, %v907_v5  ;;  %v963_v48 = vadd.f32 %v961_v40, %v912_v6  ;;  %v964_v49 = vadd.f32 %v962_v41, %v913_v7  ;;  %v972_v50 = vadd.f32 %v970_v42, %v921_v8 }
  0xc2   : > { %v973_v51 = vadd.f32 %v971_v43, %v922_v9  ;;  %v978_v52 = vadd.f32 %v976_v44, %v927_v10  ;;  %v979_v53 = vadd.f32 %v977_v45, %v928_v11  ;;  %v981_v54 = vstv %s2689_s23  ;;  %v1896_v10 = vld [vmem:[%s2397_s1 + $0x40] sm:$0xff]  ;;  %v1897_v11 = vld [vmem:[%s2397_s1 + $0x48] sm:$0xff]  ;;  %s2735_s23 = sld [smem:[#allocation3 + $0x79]] }
  0xc3   : > { %v987_v55 = vstv %s2691_s0  ;;  %v993_v56 = vstv %s2693_s24  ;;  %v999_v57 = vstv %s2695_s25  ;;  %v982_v58 = vmul.f32 %v1886_v32, %v981_v54  ;;  %s2741_s0 = sld [smem:[#allocation3 + $0x7a]]  ;;  %s2743_s24 = sld [smem:[#allocation3 + $0x7b]] }
  0xc4   : > { %v983_v59 = vmul.f32 %v1887_v33, %v981_v54  ;;  %v988_v60 = vmul.f32 %v1886_v32, %v987_v55  ;;  %v989_v61 = vmul.f32 %v1887_v33, %v987_v55  ;;  %v994_v62 = vmul.f32 %v1886_v32, %v993_v56  ;;  %s2745_s25 = sld [smem:[#allocation3 + $0x7c]] }
  0xc5   : > { %v995_v63 = vmul.f32 %v1887_v33, %v993_v56  ;;  %v1000_v0 = vmul.f32 %v1886_v32, %v999_v57  ;;  %v1001_v1 = vmul.f32 %v1887_v33, %v999_v57  ;;  %v984_v2 = vadd.f32 %v982_v58, %v933_v24 }
  0xc6   : > { %v985_v3 = vadd.f32 %v983_v59, %v934_v25  ;;  %v990_v4 = vadd.f32 %v988_v60, %v939_v26  ;;  %v991_v5 = vadd.f32 %v989_v61, %v940_v27  ;;  %v996_v6 = vadd.f32 %v994_v62, %v945_v28 }
  0xc7   : > { %v997_v7 = vadd.f32 %v995_v63, %v946_v29  ;;  %v1002_v8 = vadd.f32 %v1000_v0, %v951_v30  ;;  %v1003_v9 = vadd.f32 %v1001_v1, %v952_v31  ;;  %v1005_v12 = vstv %s2703_s26  ;;  %s2747_s26 = sld [smem:[#allocation3 + $0x7d]] }
  0xc8   : > { %v1011_v13 = vstv %s2705_s27  ;;  %v1020_v14 = vstv %s2707_s28  ;;  %v1026_v15 = vstv %s2709_s7  ;;  %v1006_v16 = vmul.f32 %v1886_v32, %v1005_v12  ;;  %s2755_s27 = sld [smem:[#allocation3 + $0x7e]]  ;;  %s2757_s28 = sld [smem:[#allocation3 + $0x7f]] }
  0xc9   : > { %v1007_v17 = vmul.f32 %v1887_v33, %v1005_v12  ;;  %v1012_v18 = vmul.f32 %v1886_v32, %v1011_v13  ;;  %v1013_v19 = vmul.f32 %v1887_v33, %v1011_v13  ;;  %v1021_v20 = vmul.f32 %v1896_v10, %v1020_v14  ;;  %s2759_s7 = sld [smem:[#allocation3 + $0x80]] }
  0xca   : > { %v1022_v21 = vmul.f32 %v1897_v11, %v1020_v14  ;;  %v1027_v22 = vmul.f32 %v1896_v10, %v1026_v15  ;;  %v1028_v23 = vmul.f32 %v1897_v11, %v1026_v15  ;;  %v1008_v24 = vadd.f32 %v1006_v16, %v957_v46 }
  0xcb   : > { %v1009_v25 = vadd.f32 %v1007_v17, %v958_v47  ;;  %v1014_v26 = vadd.f32 %v1012_v18, %v963_v48  ;;  %v1015_v27 = vadd.f32 %v1013_v19, %v964_v49  ;;  %v1023_v28 = vadd.f32 %v1021_v20, %v972_v50 }
  0xcc   : > { %v1024_v29 = vadd.f32 %v1022_v21, %v973_v51  ;;  %v1029_v30 = vadd.f32 %v1027_v22, %v978_v52  ;;  %v1030_v31 = vadd.f32 %v1028_v23, %v979_v53  ;;  %v1032_v32 = vstv %s2715_s8  ;;  %v1906_v52 = vld [vmem:[%s2327_s30 + $0x50] sm:$0xff]  ;;  %v1907_v53 = vld [vmem:[%s2327_s30 + $0x58] sm:$0xff]  ;;  %s2761_s8 = sld [smem:[#allocation3 + $0x81]] }
  0xcd   : > { %v1038_v33 = vstv %s2717_s9  ;;  %v1044_v34 = vstv %s2719_s15  ;;  %v1050_v35 = vstv %s2721_s16  ;;  %v1033_v36 = vmul.f32 %v1896_v10, %v1032_v32  ;;  %s2767_s9 = sld [smem:[#allocation3 + $0x82]]  ;;  %s2769_s15 = sld [smem:[#allocation3 + $0x83]] }
  0xce   : > { %v1034_v37 = vmul.f32 %v1897_v11, %v1032_v32  ;;  %v1039_v38 = vmul.f32 %v1896_v10, %v1038_v33  ;;  %v1040_v39 = vmul.f32 %v1897_v11, %v1038_v33  ;;  %v1045_v40 = vmul.f32 %v1896_v10, %v1044_v34  ;;  %s2771_s16 = sld [smem:[#allocation3 + $0x84]] }
  0xcf   : > { %v1046_v41 = vmul.f32 %v1897_v11, %v1044_v34  ;;  %v1051_v42 = vmul.f32 %v1896_v10, %v1050_v35  ;;  %v1052_v43 = vmul.f32 %v1897_v11, %v1050_v35  ;;  %v1035_v44 = vadd.f32 %v1033_v36, %v984_v2 }
  0xd0   : > { %v1036_v45 = vadd.f32 %v1034_v37, %v985_v3  ;;  %v1041_v46 = vadd.f32 %v1039_v38, %v990_v4  ;;  %v1042_v47 = vadd.f32 %v1040_v39, %v991_v5  ;;  %v1047_v48 = vadd.f32 %v1045_v40, %v996_v6 }
  0xd1   : > { %v1048_v49 = vadd.f32 %v1046_v41, %v997_v7  ;;  %v1053_v50 = vadd.f32 %v1051_v42, %v1002_v8  ;;  %v1054_v51 = vadd.f32 %v1052_v43, %v1003_v9  ;;  %v1056_v54 = vstv %s2729_s18  ;;  %s2773_s18 = sld [smem:[#allocation3 + $0x85]] }
  0xd2   : > { %v1062_v55 = vstv %s2731_s3  ;;  %v1071_v56 = vstv %s2733_s20  ;;  %v1077_v57 = vstv %s2735_s23  ;;  %v1057_v58 = vmul.f32 %v1896_v10, %v1056_v54  ;;  %s2781_s3 = sld [smem:[#allocation3 + $0x86]]  ;;  %s2783_s20 = sld [smem:[#allocation3 + $0x87]] }
  0xd3   : > { %v1058_v59 = vmul.f32 %v1897_v11, %v1056_v54  ;;  %v1063_v60 = vmul.f32 %v1896_v10, %v1062_v55  ;;  %v1064_v61 = vmul.f32 %v1897_v11, %v1062_v55  ;;  %v1072_v62 = vmul.f32 %v1906_v52, %v1071_v56  ;;  %s2785_s23 = sld [smem:[#allocation3 + $0x88]] }
  0xd4   : > { %v1073_v63 = vmul.f32 %v1907_v53, %v1071_v56  ;;  %v1078_v0 = vmul.f32 %v1906_v52, %v1077_v57  ;;  %v1079_v1 = vmul.f32 %v1907_v53, %v1077_v57  ;;  %v1059_v2 = vadd.f32 %v1057_v58, %v1008_v24 }
  0xd5   : > { %v1060_v3 = vadd.f32 %v1058_v59, %v1009_v25  ;;  %v1065_v4 = vadd.f32 %v1063_v60, %v1014_v26  ;;  %v1066_v5 = vadd.f32 %v1064_v61, %v1015_v27  ;;  %v1074_v6 = vadd.f32 %v1072_v62, %v1023_v28 }
  0xd6   : > { %v1075_v7 = vadd.f32 %v1073_v63, %v1024_v29  ;;  %v1080_v8 = vadd.f32 %v1078_v0, %v1029_v30  ;;  %v1081_v9 = vadd.f32 %v1079_v1, %v1030_v31  ;;  %v1083_v10 = vstv %s2741_s0  ;;  %v1916_v30 = vld [vmem:[%s2369_s29 + $0x50] sm:$0xff]  ;;  %v1917_v31 = vld [vmem:[%s2369_s29 + $0x58] sm:$0xff]  ;;  %s2787_s0 = sld [smem:[#allocation3 + $0x89]] }
  0xd7   : > { %v1089_v11 = vstv %s2743_s24  ;;  %v1095_v12 = vstv %s2745_s25  ;;  %v1101_v13 = vstv %s2747_s26  ;;  %v1084_v14 = vmul.f32 %v1906_v52, %v1083_v10  ;;  %s2793_s24 = sld [smem:[#allocation3 + $0x8a]]  ;;  %s2795_s25 = sld [smem:[#allocation3 + $0x8b]] }
  0xd8   : > { %v1085_v15 = vmul.f32 %v1907_v53, %v1083_v10  ;;  %v1090_v16 = vmul.f32 %v1906_v52, %v1089_v11  ;;  %v1091_v17 = vmul.f32 %v1907_v53, %v1089_v11  ;;  %v1096_v18 = vmul.f32 %v1906_v52, %v1095_v12  ;;  %s2797_s26 = sld [smem:[#allocation3 + $0x8c]] }
  0xd9   : > { %v1097_v19 = vmul.f32 %v1907_v53, %v1095_v12  ;;  %v1102_v20 = vmul.f32 %v1906_v52, %v1101_v13  ;;  %v1103_v21 = vmul.f32 %v1907_v53, %v1101_v13  ;;  %v1086_v22 = vadd.f32 %v1084_v14, %v1035_v44 }
  0xda   : > { %v1087_v23 = vadd.f32 %v1085_v15, %v1036_v45  ;;  %v1092_v24 = vadd.f32 %v1090_v16, %v1041_v46  ;;  %v1093_v25 = vadd.f32 %v1091_v17, %v1042_v47  ;;  %v1098_v26 = vadd.f32 %v1096_v18, %v1047_v48 }
  0xdb   : > { %v1099_v27 = vadd.f32 %v1097_v19, %v1048_v49  ;;  %v1104_v28 = vadd.f32 %v1102_v20, %v1053_v50  ;;  %v1105_v29 = vadd.f32 %v1103_v21, %v1054_v51  ;;  %v1107_v32 = vstv %s2755_s27  ;;  %s2799_s27 = sld [smem:[#allocation3 + $0x8d]] }
  0xdc   : > { %v1113_v33 = vstv %s2757_s28  ;;  %v1122_v34 = vstv %s2759_s7  ;;  %v1128_v35 = vstv %s2761_s8  ;;  %v1108_v36 = vmul.f32 %v1906_v52, %v1107_v32  ;;  %s2807_s28 = sld [smem:[#allocation3 + $0x8e]]  ;;  %s2809_s7 = sld [smem:[#allocation3 + $0x8f]] }
  0xdd   : > { %v1109_v37 = vmul.f32 %v1907_v53, %v1107_v32  ;;  %v1114_v38 = vmul.f32 %v1906_v52, %v1113_v33  ;;  %v1115_v39 = vmul.f32 %v1907_v53, %v1113_v33  ;;  %v1123_v40 = vmul.f32 %v1916_v30, %v1122_v34  ;;  %s2811_s8 = sld [smem:[#allocation3 + $0x90]] }
  0xde   : > { %v1124_v41 = vmul.f32 %v1917_v31, %v1122_v34  ;;  %v1129_v42 = vmul.f32 %v1916_v30, %v1128_v35  ;;  %v1130_v43 = vmul.f32 %v1917_v31, %v1128_v35  ;;  %v1110_v44 = vadd.f32 %v1108_v36, %v1059_v2 }
  0xdf   : > { %v1111_v45 = vadd.f32 %v1109_v37, %v1060_v3  ;;  %v1116_v46 = vadd.f32 %v1114_v38, %v1065_v4  ;;  %v1117_v47 = vadd.f32 %v1115_v39, %v1066_v5  ;;  %v1125_v48 = vadd.f32 %v1123_v40, %v1074_v6 }
  0xe0   : > { %v1126_v49 = vadd.f32 %v1124_v41, %v1075_v7  ;;  %v1131_v50 = vadd.f32 %v1129_v42, %v1080_v8  ;;  %v1132_v51 = vadd.f32 %v1130_v43, %v1081_v9  ;;  %v1134_v52 = vstv %s2767_s9  ;;  %v1926_v8 = vld [vmem:[%s2397_s1 + $0x50] sm:$0xff]  ;;  %v1927_v9 = vld [vmem:[%s2397_s1 + $0x58] sm:$0xff]  ;;  %s2813_s9 = sld [smem:[#allocation3 + $0x91]] }
  0xe1   : > { %v1140_v53 = vstv %s2769_s15  ;;  %v1146_v54 = vstv %s2771_s16  ;;  %v1152_v55 = vstv %s2773_s18  ;;  %v1135_v56 = vmul.f32 %v1916_v30, %v1134_v52  ;;  %s2819_s15 = sld [smem:[#allocation3 + $0x92]]  ;;  %s2821_s16 = sld [smem:[#allocation3 + $0x93]] }
  0xe2   : > { %v1136_v57 = vmul.f32 %v1917_v31, %v1134_v52  ;;  %v1141_v58 = vmul.f32 %v1916_v30, %v1140_v53  ;;  %v1142_v59 = vmul.f32 %v1917_v31, %v1140_v53  ;;  %v1147_v60 = vmul.f32 %v1916_v30, %v1146_v54  ;;  %s2823_s18 = sld [smem:[#allocation3 + $0x94]] }
  0xe3   : > { %v1148_v61 = vmul.f32 %v1917_v31, %v1146_v54  ;;  %v1153_v62 = vmul.f32 %v1916_v30, %v1152_v55  ;;  %v1154_v63 = vmul.f32 %v1917_v31, %v1152_v55  ;;  %v1137_v0 = vadd.f32 %v1135_v56, %v1086_v22 }
  0xe4   : > { %v1138_v1 = vadd.f32 %v1136_v57, %v1087_v23  ;;  %v1143_v2 = vadd.f32 %v1141_v58, %v1092_v24  ;;  %v1144_v3 = vadd.f32 %v1142_v59, %v1093_v25  ;;  %v1149_v4 = vadd.f32 %v1147_v60, %v1098_v26 }
  0xe5   : > { %v1150_v5 = vadd.f32 %v1148_v61, %v1099_v27  ;;  %v1155_v6 = vadd.f32 %v1153_v62, %v1104_v28  ;;  %v1156_v7 = vadd.f32 %v1154_v63, %v1105_v29  ;;  %v1158_v10 = vstv %s2781_s3  ;;  %s2825_s3 = sld [smem:[#allocation3 + $0x95]] }
  0xe6   : > { %v1164_v11 = vstv %s2783_s20  ;;  %v1173_v12 = vstv %s2785_s23  ;;  %v1179_v13 = vstv %s2787_s0  ;;  %v1159_v14 = vmul.f32 %v1916_v30, %v1158_v10  ;;  %s2833_s20 = sld [smem:[#allocation3 + $0x96]]  ;;  %s2835_s23 = sld [smem:[#allocation3 + $0x97]] }
  0xe7   : > { %v1160_v15 = vmul.f32 %v1917_v31, %v1158_v10  ;;  %v1165_v16 = vmul.f32 %v1916_v30, %v1164_v11  ;;  %v1166_v17 = vmul.f32 %v1917_v31, %v1164_v11  ;;  %v1174_v18 = vmul.f32 %v1926_v8, %v1173_v12  ;;  %s2837_s0 = sld [smem:[#allocation3 + $0x98]] }
  0xe8   : > { %v1175_v19 = vmul.f32 %v1927_v9, %v1173_v12  ;;  %v1180_v20 = vmul.f32 %v1926_v8, %v1179_v13  ;;  %v1181_v21 = vmul.f32 %v1927_v9, %v1179_v13  ;;  %v1161_v22 = vadd.f32 %v1159_v14, %v1110_v44 }
  0xe9   : > { %v1162_v23 = vadd.f32 %v1160_v15, %v1111_v45  ;;  %v1167_v24 = vadd.f32 %v1165_v16, %v1116_v46  ;;  %v1168_v25 = vadd.f32 %v1166_v17, %v1117_v47  ;;  %v1176_v26 = vadd.f32 %v1174_v18, %v1125_v48 }
  0xea   : > { %v1177_v27 = vadd.f32 %v1175_v19, %v1126_v49  ;;  %v1182_v28 = vadd.f32 %v1180_v20, %v1131_v50  ;;  %v1183_v29 = vadd.f32 %v1181_v21, %v1132_v51  ;;  %v1185_v30 = vstv %s2793_s24  ;;  %v1936_v50 = vld [vmem:[%s2327_s30 + $0x60] sm:$0xff]  ;;  %v1937_v51 = vld [vmem:[%s2327_s30 + $0x68] sm:$0xff]  ;;  %s2839_s24 = sld [smem:[#allocation3 + $0x99]] }
  0xeb   : > { %v1191_v31 = vstv %s2795_s25  ;;  %v1197_v32 = vstv %s2797_s26  ;;  %v1203_v33 = vstv %s2799_s27  ;;  %v1186_v34 = vmul.f32 %v1926_v8, %v1185_v30  ;;  %s2845_s25 = sld [smem:[#allocation3 + $0x9a]]  ;;  %s2847_s26 = sld [smem:[#allocation3 + $0x9b]] }
  0xec   : > { %v1187_v35 = vmul.f32 %v1927_v9, %v1185_v30  ;;  %v1192_v36 = vmul.f32 %v1926_v8, %v1191_v31  ;;  %v1193_v37 = vmul.f32 %v1927_v9, %v1191_v31  ;;  %v1198_v38 = vmul.f32 %v1926_v8, %v1197_v32  ;;  %s2849_s27 = sld [smem:[#allocation3 + $0x9c]] }
  0xed   : > { %v1199_v39 = vmul.f32 %v1927_v9, %v1197_v32  ;;  %v1204_v40 = vmul.f32 %v1926_v8, %v1203_v33  ;;  %v1205_v41 = vmul.f32 %v1927_v9, %v1203_v33  ;;  %v1188_v42 = vadd.f32 %v1186_v34, %v1137_v0 }
  0xee   : > { %v1189_v43 = vadd.f32 %v1187_v35, %v1138_v1  ;;  %v1194_v44 = vadd.f32 %v1192_v36, %v1143_v2  ;;  %v1195_v45 = vadd.f32 %v1193_v37, %v1144_v3  ;;  %v1200_v46 = vadd.f32 %v1198_v38, %v1149_v4 }
  0xef   : > { %v1201_v47 = vadd.f32 %v1199_v39, %v1150_v5  ;;  %v1206_v48 = vadd.f32 %v1204_v40, %v1155_v6  ;;  %v1207_v49 = vadd.f32 %v1205_v41, %v1156_v7  ;;  %v1209_v52 = vstv %s2807_s28  ;;  %s2851_s28 = sld [smem:[#allocation3 + $0x9d]] }
  0xf0   : > { %v1215_v53 = vstv %s2809_s7  ;;  %v1224_v54 = vstv %s2811_s8  ;;  %v1230_v55 = vstv %s2813_s9  ;;  %v1210_v56 = vmul.f32 %v1926_v8, %v1209_v52  ;;  %s2859_s7 = sld [smem:[#allocation3 + $0x9e]]  ;;  %s2861_s8 = sld [smem:[#allocation3 + $0x9f]] }
  0xf1   : > { %v1211_v57 = vmul.f32 %v1927_v9, %v1209_v52  ;;  %v1216_v58 = vmul.f32 %v1926_v8, %v1215_v53  ;;  %v1217_v59 = vmul.f32 %v1927_v9, %v1215_v53  ;;  %v1225_v60 = vmul.f32 %v1936_v50, %v1224_v54  ;;  %s2863_s9 = sld [smem:[#allocation3 + $0xa0]] }
  0xf2   : > { %v1226_v61 = vmul.f32 %v1937_v51, %v1224_v54  ;;  %v1231_v62 = vmul.f32 %v1936_v50, %v1230_v55  ;;  %v1232_v63 = vmul.f32 %v1937_v51, %v1230_v55  ;;  %v1212_v0 = vadd.f32 %v1210_v56, %v1161_v22 }
  0xf3   : > { %v1213_v1 = vadd.f32 %v1211_v57, %v1162_v23  ;;  %v1218_v2 = vadd.f32 %v1216_v58, %v1167_v24  ;;  %v1219_v3 = vadd.f32 %v1217_v59, %v1168_v25  ;;  %v1227_v4 = vadd.f32 %v1225_v60, %v1176_v26 }
  0xf4   : > { %v1228_v5 = vadd.f32 %v1226_v61, %v1177_v27  ;;  %v1233_v6 = vadd.f32 %v1231_v62, %v1182_v28  ;;  %v1234_v7 = vadd.f32 %v1232_v63, %v1183_v29  ;;  %v1236_v8 = vstv %s2819_s15  ;;  %v1946_v28 = vld [vmem:[%s2369_s29 + $0x60] sm:$0xff]  ;;  %v1947_v29 = vld [vmem:[%s2369_s29 + $0x68] sm:$0xff]  ;;  %s2865_s15 = sld [smem:[#allocation3 + $0xa1]] }
  0xf5   : > { %v1242_v9 = vstv %s2821_s16  ;;  %v1248_v10 = vstv %s2823_s18  ;;  %v1254_v11 = vstv %s2825_s3  ;;  %v1237_v12 = vmul.f32 %v1936_v50, %v1236_v8  ;;  %s2871_s16 = sld [smem:[#allocation3 + $0xa2]]  ;;  %s2873_s18 = sld [smem:[#allocation3 + $0xa3]] }
  0xf6   : > { %v1238_v13 = vmul.f32 %v1937_v51, %v1236_v8  ;;  %v1243_v14 = vmul.f32 %v1936_v50, %v1242_v9  ;;  %v1244_v15 = vmul.f32 %v1937_v51, %v1242_v9  ;;  %v1249_v16 = vmul.f32 %v1936_v50, %v1248_v10  ;;  %s2875_s3 = sld [smem:[#allocation3 + $0xa4]] }
  0xf7   : > { %v1250_v17 = vmul.f32 %v1937_v51, %v1248_v10  ;;  %v1255_v18 = vmul.f32 %v1936_v50, %v1254_v11  ;;  %v1256_v19 = vmul.f32 %v1937_v51, %v1254_v11  ;;  %v1239_v20 = vadd.f32 %v1237_v12, %v1188_v42 }
  0xf8   : > { %v1240_v21 = vadd.f32 %v1238_v13, %v1189_v43  ;;  %v1245_v22 = vadd.f32 %v1243_v14, %v1194_v44  ;;  %v1246_v23 = vadd.f32 %v1244_v15, %v1195_v45  ;;  %v1251_v24 = vadd.f32 %v1249_v16, %v1200_v46 }
  0xf9   : > { %v1252_v25 = vadd.f32 %v1250_v17, %v1201_v47  ;;  %v1257_v26 = vadd.f32 %v1255_v18, %v1206_v48  ;;  %v1258_v27 = vadd.f32 %v1256_v19, %v1207_v49  ;;  %v1260_v30 = vstv %s2833_s20  ;;  %s2877_s20 = sld [smem:[#allocation3 + $0xa5]] }
  0xfa   : > { %v1266_v31 = vstv %s2835_s23  ;;  %v1275_v32 = vstv %s2837_s0  ;;  %v1281_v33 = vstv %s2839_s24  ;;  %v1261_v34 = vmul.f32 %v1936_v50, %v1260_v30  ;;  %s2885_s23 = sld [smem:[#allocation3 + $0xa6]]  ;;  %s2887_s0 = sld [smem:[#allocation3 + $0xa7]] }
  0xfb   : > { %v1262_v35 = vmul.f32 %v1937_v51, %v1260_v30  ;;  %v1267_v36 = vmul.f32 %v1936_v50, %v1266_v31  ;;  %v1268_v37 = vmul.f32 %v1937_v51, %v1266_v31  ;;  %v1276_v38 = vmul.f32 %v1946_v28, %v1275_v32  ;;  %s2889_s24 = sld [smem:[#allocation3 + $0xa8]] }
  0xfc   : > { %v1277_v39 = vmul.f32 %v1947_v29, %v1275_v32  ;;  %v1282_v40 = vmul.f32 %v1946_v28, %v1281_v33  ;;  %v1283_v41 = vmul.f32 %v1947_v29, %v1281_v33  ;;  %v1263_v42 = vadd.f32 %v1261_v34, %v1212_v0 }
  0xfd   : > { %v1264_v43 = vadd.f32 %v1262_v35, %v1213_v1  ;;  %v1269_v44 = vadd.f32 %v1267_v36, %v1218_v2  ;;  %v1270_v45 = vadd.f32 %v1268_v37, %v1219_v3  ;;  %v1278_v46 = vadd.f32 %v1276_v38, %v1227_v4 }
  0xfe   : > { %v1279_v47 = vadd.f32 %v1277_v39, %v1228_v5  ;;  %v1284_v48 = vadd.f32 %v1282_v40, %v1233_v6  ;;  %v1285_v49 = vadd.f32 %v1283_v41, %v1234_v7  ;;  %v1287_v50 = vstv %s2845_s25  ;;  %v1956_v6 = vld [vmem:[%s2397_s1 + $0x60] sm:$0xff]  ;;  %v1957_v7 = vld [vmem:[%s2397_s1 + $0x68] sm:$0xff]  ;;  %s2891_s25 = sld [smem:[#allocation3 + $0xa9]] }
  0xff   : > { %v1293_v51 = vstv %s2847_s26  ;;  %v1299_v52 = vstv %s2849_s27  ;;  %v1305_v53 = vstv %s2851_s28  ;;  %v1288_v54 = vmul.f32 %v1946_v28, %v1287_v50  ;;  %s2897_s26 = sld [smem:[#allocation3 + $0xaa]]  ;;  %s2899_s27 = sld [smem:[#allocation3 + $0xab]] }
 0x100   : > { %v1289_v55 = vmul.f32 %v1947_v29, %v1287_v50  ;;  %v1294_v56 = vmul.f32 %v1946_v28, %v1293_v51  ;;  %v1295_v57 = vmul.f32 %v1947_v29, %v1293_v51  ;;  %v1300_v58 = vmul.f32 %v1946_v28, %v1299_v52  ;;  %s2901_s28 = sld [smem:[#allocation3 + $0xac]] }
 0x101   : > { %v1301_v59 = vmul.f32 %v1947_v29, %v1299_v52  ;;  %v1306_v60 = vmul.f32 %v1946_v28, %v1305_v53  ;;  %v1307_v61 = vmul.f32 %v1947_v29, %v1305_v53  ;;  %v1290_v62 = vadd.f32 %v1288_v54, %v1239_v20 }
 0x102   : > { %v1291_v63 = vadd.f32 %v1289_v55, %v1240_v21  ;;  %v1296_v0 = vadd.f32 %v1294_v56, %v1245_v22  ;;  %v1297_v1 = vadd.f32 %v1295_v57, %v1246_v23  ;;  %v1302_v2 = vadd.f32 %v1300_v58, %v1251_v24 }
 0x103   : > { %v1303_v3 = vadd.f32 %v1301_v59, %v1252_v25  ;;  %v1308_v4 = vadd.f32 %v1306_v60, %v1257_v26  ;;  %v1309_v5 = vadd.f32 %v1307_v61, %v1258_v27  ;;  %v1311_v8 = vstv %s2859_s7  ;;  %s2903_s7 = sld [smem:[#allocation3 + $0xad]] }
 0x104   : > { %v1317_v9 = vstv %s2861_s8  ;;  %v1326_v10 = vstv %s2863_s9  ;;  %v1332_v11 = vstv %s2865_s15  ;;  %v1312_v12 = vmul.f32 %v1946_v28, %v1311_v8  ;;  %s2911_s8 = sld [smem:[#allocation3 + $0xae]]  ;;  %s2913_s9 = sld [smem:[#allocation3 + $0xaf]] }
 0x105   : > { %v1313_v13 = vmul.f32 %v1947_v29, %v1311_v8  ;;  %v1318_v14 = vmul.f32 %v1946_v28, %v1317_v9  ;;  %v1319_v15 = vmul.f32 %v1947_v29, %v1317_v9  ;;  %v1327_v16 = vmul.f32 %v1956_v6, %v1326_v10  ;;  %s2917_s15 = sld [smem:[#allocation3 + $0xb1]] }
 0x106   : > { %v1328_v17 = vmul.f32 %v1957_v7, %v1326_v10  ;;  %v1333_v18 = vmul.f32 %v1956_v6, %v1332_v11  ;;  %v1334_v19 = vmul.f32 %v1957_v7, %v1332_v11  ;;  %v1314_v20 = vadd.f32 %v1312_v12, %v1263_v42 }
 0x107   : > { %v1315_v21 = vadd.f32 %v1313_v13, %v1264_v43  ;;  %v1320_v22 = vadd.f32 %v1318_v14, %v1269_v44  ;;  %v1321_v23 = vadd.f32 %v1319_v15, %v1270_v45  ;;  %v1329_v24 = vadd.f32 %v1327_v16, %v1278_v46 }
 0x108   : > { %v1330_v25 = vadd.f32 %v1328_v17, %v1279_v47  ;;  %v1335_v26 = vadd.f32 %v1333_v18, %v1284_v48  ;;  %v1336_v27 = vadd.f32 %v1334_v19, %v1285_v49  ;;  %v1338_v28 = vstv %s2871_s16  ;;  %v1966_v48 = vld [vmem:[%s2327_s30 + $0x70] sm:$0xff]  ;;  %v1967_v49 = vld [vmem:[%s2327_s30 + $0x78] sm:$0xff]  ;;  %s2915_s30 = sld [smem:[#allocation3 + $0xb0]]  ;;  %s2923_s16 = sld [smem:[#allocation3 + $0xb2]] }
 0x109   : > { %v1344_v29 = vstv %s2873_s18  ;;  %v1350_v30 = vstv %s2875_s3  ;;  %v1356_v31 = vstv %s2877_s20  ;;  %v1339_v32 = vmul.f32 %v1956_v6, %v1338_v28  ;;  %s2925_s18 = sld [smem:[#allocation3 + $0xb3]]  ;;  %s2927_s3 = sld [smem:[#allocation3 + $0xb4]] }
 0x10a   : > { %v1340_v33 = vmul.f32 %v1957_v7, %v1338_v28  ;;  %v1345_v34 = vmul.f32 %v1956_v6, %v1344_v29  ;;  %v1346_v35 = vmul.f32 %v1957_v7, %v1344_v29  ;;  %v1351_v36 = vmul.f32 %v1956_v6, %v1350_v30  ;;  %s2929_s20 = sld [smem:[#allocation3 + $0xb5]] }
 0x10b   : > { %v1352_v37 = vmul.f32 %v1957_v7, %v1350_v30  ;;  %v1357_v38 = vmul.f32 %v1956_v6, %v1356_v31  ;;  %v1358_v39 = vmul.f32 %v1957_v7, %v1356_v31  ;;  %v1341_v40 = vadd.f32 %v1339_v32, %v1290_v62 }
 0x10c   : > { %v1342_v41 = vadd.f32 %v1340_v33, %v1291_v63  ;;  %v1347_v42 = vadd.f32 %v1345_v34, %v1296_v0  ;;  %v1348_v43 = vadd.f32 %v1346_v35, %v1297_v1  ;;  %v1353_v44 = vadd.f32 %v1351_v36, %v1302_v2 }
 0x10d   : > { %v1354_v45 = vadd.f32 %v1352_v37, %v1303_v3  ;;  %v1359_v46 = vadd.f32 %v1357_v38, %v1308_v4  ;;  %v1360_v47 = vadd.f32 %v1358_v39, %v1309_v5  ;;  %v1362_v50 = vstv %s2885_s23  ;;  %s2937_s23 = sld [smem:[#allocation3 + $0xb6]] }
 0x10e   : > { %v1368_v51 = vstv %s2887_s0  ;;  %v1377_v52 = vstv %s2889_s24  ;;  %v1383_v53 = vstv %s2891_s25  ;;  %v1363_v54 = vmul.f32 %v1956_v6, %v1362_v50  ;;  %s2939_s0 = sld [smem:[#allocation3 + $0xb7]]  ;;  %s2943_s24 = sld [smem:[#allocation3 + $0xb9]] }
 0x10f   : > { %v1364_v55 = vmul.f32 %v1957_v7, %v1362_v50  ;;  %v1369_v56 = vmul.f32 %v1956_v6, %v1368_v51  ;;  %v1370_v57 = vmul.f32 %v1957_v7, %v1368_v51  ;;  %v1378_v58 = vmul.f32 %v1966_v48, %v1377_v52  ;;  %s2949_s25 = sld [smem:[#allocation3 + $0xba]] }
 0x110   : > { %v1379_v59 = vmul.f32 %v1967_v49, %v1377_v52  ;;  %v1384_v60 = vmul.f32 %v1966_v48, %v1383_v53  ;;  %v1385_v61 = vmul.f32 %v1967_v49, %v1383_v53  ;;  %v1365_v62 = vadd.f32 %v1363_v54, %v1314_v20 }
 0x111   : > { %v1366_v63 = vadd.f32 %v1364_v55, %v1315_v21  ;;  %v1371_v0 = vadd.f32 %v1369_v56, %v1320_v22  ;;  %v1372_v1 = vadd.f32 %v1370_v57, %v1321_v23  ;;  %v1380_v2 = vadd.f32 %v1378_v58, %v1329_v24 }
 0x112   : > { %v1381_v3 = vadd.f32 %v1379_v59, %v1330_v25  ;;  %v1386_v4 = vadd.f32 %v1384_v60, %v1335_v26  ;;  %v1387_v5 = vadd.f32 %v1385_v61, %v1336_v27  ;;  %v1389_v6 = vstv %s2897_s26  ;;  %v1976_v26 = vld [vmem:[%s2369_s29 + $0x70] sm:$0xff]  ;;  %v1977_v27 = vld [vmem:[%s2369_s29 + $0x78] sm:$0xff]  ;;  %s2941_s29 = sld [smem:[#allocation3 + $0xb8]]  ;;  %s2951_s26 = sld [smem:[#allocation3 + $0xbb]] }
 0x113   : > { %v1395_v7 = vstv %s2899_s27  ;;  %v1401_v8 = vstv %s2901_s28  ;;  %v1407_v9 = vstv %s2903_s7  ;;  %v1390_v10 = vmul.f32 %v1966_v48, %v1389_v6  ;;  %s2953_s27 = sld [smem:[#allocation3 + $0xbc]]  ;;  %s2955_s28 = sld [smem:[#allocation3 + $0xbd]] }
 0x114   : > { %v1391_v11 = vmul.f32 %v1967_v49, %v1389_v6  ;;  %v1396_v12 = vmul.f32 %v1966_v48, %v1395_v7  ;;  %v1397_v13 = vmul.f32 %v1967_v49, %v1395_v7  ;;  %v1402_v14 = vmul.f32 %v1966_v48, %v1401_v8  ;;  %s2963_s7 = sld [smem:[#allocation3 + $0xbe]] }
 0x115   : > { %v1403_v15 = vmul.f32 %v1967_v49, %v1401_v8  ;;  %v1408_v16 = vmul.f32 %v1966_v48, %v1407_v9  ;;  %v1409_v17 = vmul.f32 %v1967_v49, %v1407_v9  ;;  %v1392_v18 = vadd.f32 %v1390_v10, %v1341_v40 }
 0x116   : > { %v1393_v19 = vadd.f32 %v1391_v11, %v1342_v41  ;;  %v1398_v20 = vadd.f32 %v1396_v12, %v1347_v42  ;;  %v1399_v21 = vadd.f32 %v1397_v13, %v1348_v43  ;;  %v1404_v22 = vadd.f32 %v1402_v14, %v1353_v44 }
 0x117   : > { %v1405_v23 = vadd.f32 %v1403_v15, %v1354_v45  ;;  %v1410_v24 = vadd.f32 %v1408_v16, %v1359_v46  ;;  %v1411_v25 = vadd.f32 %v1409_v17, %v1360_v47  ;;  %v1413_v28 = vstv %s2911_s8  ;;  %s2965_s8 = sld [smem:[#allocation3 + $0xbf]] }
 0x118   : > { %v1419_v29 = vstv %s2913_s9  ;;  %v1428_v30 = vstv %s2915_s30  ;;  %v1434_v31 = vstv %s2917_s15  ;;  %v1414_v32 = vmul.f32 %v1966_v48, %v1413_v28  ;;  %s2969_s9 = sld [smem:[#allocation5 + $0x1]]  ;;  %s2975_s30 = sld [smem:[#allocation5 + $0x2]] }
 0x119   : > { %v1415_v33 = vmul.f32 %v1967_v49, %v1413_v28  ;;  %v1420_v34 = vmul.f32 %v1966_v48, %v1419_v29  ;;  %v1421_v35 = vmul.f32 %v1967_v49, %v1419_v29  ;;  %v1429_v36 = vmul.f32 %v1976_v26, %v1428_v30  ;;  %s255_s15 = sand.u32 1, %s2186_s11  }
 0x11a   : > { %v1430_v37 = vmul.f32 %v1977_v27, %v1428_v30  ;;  %v1435_v38 = vmul.f32 %v1976_v26, %v1434_v31  ;;  %v1436_v39 = vmul.f32 %v1977_v27, %v1434_v31  ;;  %v1416_v40 = vadd.f32 %v1414_v32, %v1365_v62 }
 0x11b   : > { %v1417_v41 = vadd.f32 %v1415_v33, %v1366_v63  ;;  %v1422_v42 = vadd.f32 %v1420_v34, %v1371_v0  ;;  %v1423_v43 = vadd.f32 %v1421_v35, %v1372_v1  ;;  %v1431_v44 = vadd.f32 %v1429_v36, %v1380_v2 }
 0x11c   : > { %v1432_v45 = vadd.f32 %v1430_v37, %v1381_v3  ;;  %v1437_v46 = vadd.f32 %v1435_v38, %v1386_v4  ;;  %v1438_v47 = vadd.f32 %v1436_v39, %v1387_v5  ;;  %v1440_v48 = vstv %s2923_s16  ;;  %v1986_v4 = vld [vmem:[%s2397_s1 + $0x70] sm:$0xff]  ;;  %v1987_v5 = vld [vmem:[%s2397_s1 + $0x78] sm:$0xff]  ;;  %s2967_s1 = sld [smem:[#allocation5]]  ;;  %s2986_s16 = sld [smem:[#allocation5 + $0x3]] }
 0x11d   : > { %v1446_v49 = vstv %s2925_s18  ;;  %v1452_v50 = vstv %s2927_s3  ;;  %v1458_v51 = vstv %s2929_s20  ;;  %v1441_v52 = vmul.f32 %v1976_v26, %v1440_v48  ;;  %s1749_s18 = sshll.u32 %s255_s15, 7  ;;  %s2992_s3 = sld [smem:[#allocation5 + $0x4]] }
 0x11e   : > { %v1442_v53 = vmul.f32 %v1977_v27, %v1440_v48  ;;  %v1447_v54 = vmul.f32 %v1976_v26, %v1446_v49  ;;  %v1448_v55 = vmul.f32 %v1977_v27, %v1446_v49  ;;  %v1453_v56 = vmul.f32 %v1976_v26, %v1452_v50  ;;  %s3004_s20 = sld [smem:[#allocation5 + $0x5]] }
 0x11f   : > { %v1454_v57 = vmul.f32 %v1977_v27, %v1452_v50  ;;  %v1459_v58 = vmul.f32 %v1976_v26, %v1458_v51  ;;  %v1460_v59 = vmul.f32 %v1977_v27, %v1458_v51  ;;  %v1443_v60 = vadd.f32 %v1441_v52, %v1392_v18 }
 0x120   : > { %v1444_v61 = vadd.f32 %v1442_v53, %v1393_v19  ;;  %v1449_v62 = vadd.f32 %v1447_v54, %v1398_v20  ;;  %v1450_v63 = vadd.f32 %v1448_v55, %v1399_v21  ;;  %v1455_v0 = vadd.f32 %v1453_v56, %v1404_v22 }
 0x121   : > { %v1456_v1 = vadd.f32 %v1454_v57, %v1405_v23  ;;  %v1461_v2 = vadd.f32 %v1459_v58, %v1410_v24  ;;  %v1462_v3 = vadd.f32 %v1460_v59, %v1411_v25  ;;  %v1464_v6 = vstv %s2937_s23  ;;  %s3006_s23 = sld [smem:[#allocation5 + $0x6]] }
 0x122   : > { %v1470_v7 = vstv %s2939_s0  ;;  %v1479_v8 = vstv %s2941_s29  ;;  %v1485_v9 = vstv %s2943_s24  ;;  %v1465_v10 = vmul.f32 %v1976_v26, %v1464_v6  ;;  %s3009_s0 = sld [smem:[#allocation5 + $0x7]]  ;;  %s3015_s29 = scalar_lea.vmem [#allocation6], %s1749_s18 }
 0x123   : > { %v1466_v11 = vmul.f32 %v1977_v27, %v1464_v6  ;;  %v1471_v12 = vmul.f32 %v1976_v26, %v1470_v7  ;;  %v1472_v13 = vmul.f32 %v1977_v27, %v1470_v7  ;;  %v1480_v14 = vmul.f32 %v1986_v4, %v1479_v8  ;;  %s2025_s24 = sshll.u32 %s2194_s12, 11 }
 0x124   : > { %v1481_v15 = vmul.f32 %v1987_v5, %v1479_v8  ;;  %v1486_v16 = vmul.f32 %v1986_v4, %v1485_v9  ;;  %v1487_v17 = vmul.f32 %v1987_v5, %v1485_v9  ;;  %v1467_v18 = vadd.f32 %v1465_v10, %v1416_v40 }
 0x125   : > { %v1468_v19 = vadd.f32 %v1466_v11, %v1417_v41  ;;  %v1473_v20 = vadd.f32 %v1471_v12, %v1422_v42  ;;  %v1474_v21 = vadd.f32 %v1472_v13, %v1423_v43  ;;  %v1482_v22 = vadd.f32 %v1480_v14, %v1431_v44 }
 0x126   : > { %v1483_v23 = vadd.f32 %v1481_v15, %v1432_v45  ;;  %v1488_v24 = vadd.f32 %v1486_v16, %v1437_v46  ;;  %v1489_v25 = vadd.f32 %v1487_v17, %v1438_v47  ;;  %v1491_v26 = vstv %s2949_s25  ;;  %s1629_s25 = sshll.u32 %s3015_s29, 4  ;;  %s3072_s25 = int_to_ptr.vmem [resolvable:$true] %s1629_s25 }
 0x127   : > { %v1497_v27 = vstv %s2951_s26  ;;  %v1503_v28 = vstv %s2953_s27  ;;  %v1509_v29 = vstv %s2955_s28  ;;  %v1492_v30 = vmul.f32 %v1986_v4, %v1491_v26  ;;  %s3070_s27 = scalar_lea.hbm %s3142_s6, %s2025_s24  ;;  %s3092_s28 = scalar_lea.sflag [#allocation7], %s255_s15 }
 0x128   : > { %v1493_v31 = vmul.f32 %v1987_v5, %v1491_v26  ;;  %v1498_v32 = vmul.f32 %v1986_v4, %v1497_v27  ;;  %v1499_v33 = vmul.f32 %v1987_v5, %v1497_v27  ;;  %v1504_v34 = vmul.f32 %v1986_v4, %v1503_v28 }
 0x129   : > { %v1505_v35 = vmul.f32 %v1987_v5, %v1503_v28  ;;  %v1510_v36 = vmul.f32 %v1986_v4, %v1509_v29  ;;  %v1511_v37 = vmul.f32 %v1987_v5, %v1509_v29  ;;  %v1494_v38 = vadd.f32 %v1492_v30, %v1443_v60 }
 0x12a   : > { %v1495_v39 = vadd.f32 %v1493_v31, %v1444_v61  ;;  %v1500_v40 = vadd.f32 %v1498_v32, %v1449_v62  ;;  %v1501_v41 = vadd.f32 %v1499_v33, %v1450_v63  ;;  %v2978_v42 = vadd.f32 %v1504_v34, %v1455_v0 }
 0x12b   : > { %v2980_v43 = vadd.f32 %v1505_v35, %v1456_v1  ;;  %v2982_v44 = vadd.f32 %v1510_v36, %v1461_v2  ;;  %v2984_v45 = vadd.f32 %v1511_v37, %v1462_v3  ;;  %v1515_v46 = vstv %s2963_s7  ;;  %s2122_s7 = scalar_lea.vmem %s3072_s25, 2048 }
 0x12c   : > { %v1521_v47 = vstv %s2965_s8  ;;  %vm1526_vm0 = vcmp.ge.f32.partialorder %v1482_v22, 0.0  ;;  %vm1527_vm1 = vcmp.ge.f32.partialorder %v1483_v23, 0.0  ;;  %v1516_v48 = vmul.f32 %v1986_v4, %v1515_v46  ;;  %p2123_p13 = scmp.ne.s32.totalorder %s3072_s25, %s2122_s7  ;;  %s2207_s8 = smov [#allocation6]  }
 0x12d   : > { %v1517_v49 = vmul.f32 %v1987_v5, %v1515_v46  ;;  %v1522_v50 = vmul.f32 %v1986_v4, %v1521_v47  ;;  %v1523_v51 = vmul.f32 %v1987_v5, %v1521_v47  ;;  %v1529_v52 = vstv %s2967_s1  ;;  %s2126_s1 = sshll.u32 %s2207_s8, 4  ;;  %s2127_s1 = int_to_ptr.vmem [resolvable:$false] %s2126_s1 }
 0x12e   : > { %vm1536_vm2 = vcmp.ge.f32.partialorder %v1488_v24, 0.0  ;;  %vm1537_vm3 = vcmp.ge.f32.partialorder %v1489_v25, 0.0  ;;  %v1539_v53 = vstv %s2969_s9  ;;  %v2996_v54 = vadd.f32 %v1516_v48, %v1467_v18  ;;  %p2124_p0 = pnand %p2123_p13, %p2294_p5  ;;  %s2128_s9 = scalar_lea.vmem %s2127_s1, 4096 }
 0x12f   : > { %v2998_v55 = vadd.f32 %v1517_v49, %v1468_v19  ;;  %v3000_v56 = vadd.f32 %v1522_v50, %v1473_v20  ;;  %v3002_v57 = vadd.f32 %v1523_v51, %v1474_v21  ;;  %v1530_v58 = vmul.f32 %v1529_v52, %v1482_v22  ;;  %p2129_p2 = scmp.lt.s32.totalorder %s3072_s25, %s2127_s1  ;;  %p2130_p3 = scmp.lt.s32.totalorder %s2128_s9, %s2122_s7 }
 0x130   : > { %v1531_v59 = vmul.f32 %v1529_v52, %v1483_v23  ;;  %v1540_v60 = vmul.f32 %v1539_v53, %v1488_v24  ;;  %v1541_v61 = vmul.f32 %v1539_v53, %v1489_v25  ;;  %vm1547_vm4 = vcmp.ge.f32.partialorder %v1494_v38, 0.0  ;;  %p2125_p1 = pneg %p2124_p0 }
 0x131   : > { %vm1548_vm5 = vcmp.ge.f32.partialorder %v1495_v39, 0.0  ;;  %v1550_v62 = vstv %s2975_s30  ;;  %vm1558_vm6 = vcmp.ge.f32.partialorder %v1500_v40, 0.0  ;;  %v1532_v63 = vsel %vm1526_vm0, %v1482_v22, %v1530_v58  ;;  %p2131_p4 = por %p2130_p3, %p2129_p2 }
 0x132   : > { %v1533_v0 = vsel %vm1527_vm1, %v1483_v23, %v1531_v59  ;;  %v1542_v1 = vsel %vm1536_vm2, %v1488_v24, %v1540_v60  ;;  %v1543_v2 = vsel %vm1537_vm3, %v1489_v25, %v1541_v61  ;;  %1534 = vst [vmem:[%s3015_s29] sm:$0xff] %v1532_v63  ;;  %v1551_v3 = vmul.f32 %v1550_v62, %v1494_v38 }
 0x133   : > { %1535 = vst [vmem:[%s3015_s29 + $0x8] sm:$0xff] %v1533_v0  ;;  %1997 = vst [vmem:[%s3015_s29 + $0x10] sm:$0xff] %v1542_v1  ;;  %v1552_v4 = vmul.f32 %v1550_v62, %v1495_v39  ;;  %vm1559_vm7 = vcmp.ge.f32.partialorder %v1501_v41, 0.0  ;;  %v1561_v5 = vstv %s2986_s16  ;;  %vm1569_vm8 = vcmp.ge.f32.partialorder %v2978_v42, 0.0  ;;  %p2132_p6 = pnand %p2131_p4, %p2125_p1 }
 0x134   : > { %1998 = vst [vmem:[%s3015_s29 + $0x18] sm:$0xff] %v1543_v2  ;;  %v1562_v6 = vmul.f32 %v1561_v5, %v1500_v40  ;;  %v1563_v7 = vmul.f32 %v1561_v5, %v1501_v41  ;;  %vm1570_vm9 = vcmp.ge.f32.partialorder %v2980_v43, 0.0  ;;  %v1553_v8 = vsel %vm1547_vm4, %v1494_v38, %v1551_v3 }
 0x135   : > { %v1554_v9 = vsel %vm1548_vm5, %v1495_v39, %v1552_v4  ;;  %v1572_v10 = vstv %s2992_s3  ;;  %vm1580_vm10 = vcmp.ge.f32.partialorder %v2982_v44, 0.0  ;;  %2000 = vst [vmem:[%s3015_s29 + $0x20] sm:$0xff] %v1553_v8  ;;  %vm1581_vm11 = vcmp.ge.f32.partialorder %v2984_v45, 0.0 }
 0x136   : > { %2001 = vst [vmem:[%s3015_s29 + $0x28] sm:$0xff] %v1554_v9  ;;  %v1564_v11 = vsel %vm1558_vm6, %v1500_v40, %v1562_v6  ;;  %v1565_v12 = vsel %vm1559_vm7, %v1501_v41, %v1563_v7  ;;  %v1573_v13 = vmul.f32 %v1572_v10, %v2978_v42  ;;  %v1574_v14 = vmul.f32 %v1572_v10, %v2980_v43 }
 0x137   : > { %2003 = vst [vmem:[%s3015_s29 + $0x30] sm:$0xff] %v1564_v11  ;;  %2004 = vst [vmem:[%s3015_s29 + $0x38] sm:$0xff] %v1565_v12  ;;  %v1583_v15 = vstv %s3004_s20  ;;  %vm1591_vm12 = vcmp.ge.f32.partialorder %v2996_v54, 0.0  ;;  %vm1592_vm13 = vcmp.ge.f32.partialorder %v2998_v55, 0.0  ;;  %v1594_v20 = vstv %s3006_s23 }
 0x138   : > { %v1575_v16 = vsel %vm1569_vm8, %v2978_v42, %v1573_v13  ;;  %v1576_v17 = vsel %vm1570_vm9, %v2980_v43, %v1574_v14  ;;  %v1584_v18 = vmul.f32 %v1583_v15, %v2982_v44  ;;  %v1585_v19 = vmul.f32 %v1583_v15, %v2984_v45 }
 0x139   : > { %2006 = vst [vmem:[%s3015_s29 + $0x40] sm:$0xff] %v1575_v16  ;;  %2007 = vst [vmem:[%s3015_s29 + $0x48] sm:$0xff] %v1576_v17  ;;  %vm1602_vm14 = vcmp.ge.f32.partialorder %v3000_v56, 0.0  ;;  %vm1603_vm15 = vcmp.ge.f32.partialorder %v3002_v57, 0.0  ;;  %v1605_v21 = vstv %s3009_s0  ;;  %v1595_v24 = vmul.f32 %v1594_v20, %v2996_v54 }
 0x13a   : > { %v1586_v22 = vsel %vm1580_vm10, %v2982_v44, %v1584_v18  ;;  %v1587_v23 = vsel %vm1581_vm11, %v2984_v45, %v1585_v19  ;;  %v1596_v25 = vmul.f32 %v1594_v20, %v2998_v55  ;;  %v1606_v26 = vmul.f32 %v1605_v21, %v3000_v56 }
 0x13b   : > { %2009 = vst [vmem:[%s3015_s29 + $0x50] sm:$0xff] %v1586_v22  ;;  %2010 = vst [vmem:[%s3015_s29 + $0x58] sm:$0xff] %v1587_v23  ;;  %v1607_v27 = vmul.f32 %v1605_v21, %v3002_v57  ;;  %v1597_v28 = vsel %vm1591_vm12, %v2996_v54, %v1595_v24 }
 0x13c   : > { %v1598_v29 = vsel %vm1592_vm13, %v2998_v55, %v1596_v25  ;;  %2012 = vst [vmem:[%s3015_s29 + $0x60] sm:$0xff] %v1597_v28  ;;  %v1608_v30 = vsel %vm1602_vm14, %v3000_v56, %v1606_v26 }
 0x13d   : > { %2013 = vst [vmem:[%s3015_s29 + $0x68] sm:$0xff] %v1598_v29  ;;  %v1609_v31 = vsel %vm1603_vm15, %v3002_v57, %v1607_v27  ;;  %2015 = vst [vmem:[%s3015_s29 + $0x70] sm:$0xff] %v1608_v30 }
 0x13e   : > { %2016 = vst [vmem:[%s3015_s29 + $0x78] sm:$0xff] %v1609_v31 }
 0x13f   : > { %2135 = shalt.err (!%p2132_p6)
}
 0x140   : > { %s2136_s30 = scalar_lea.hbm %s3070_s27, 2048  ;;  %s2140_s18 = scalar_lea.hbm %s3142_s6, 4096 }
 0x141   : > { %p2137_p7 = scmp.ne.s32.totalorder %s3070_s27, %s2136_s30  ;;  %p2141_p11 = scmp.lt.u32.totalorder %s3070_s27, %s3142_s6 }
 0x142   : > { %p2142_p12 = scmp.lt.u32.totalorder %s2140_s18, %s2136_s30  ;;  %p2144_p0 = scmp.lt.u32.totalorder %s2136_s30, %s3070_s27 }
 0x143   : > { %p2138_p8 = pnand %p2137_p7, %p2294_p5 }
 0x144   : > { %p2143_p13 = por %p2142_p12, %p2141_p11 }
 0x145   : > { %p2139_p10 = pneg %p2138_p8 }
 0x146   : > { %p2145_p1 = por %p2144_p0, %p2143_p13 }
 0x148   : > { %p2146_p2 = pnand %p2145_p1, %p2139_p10 }
 0x14a   : > { %2149 = shalt.err (!%p2146_p2)
}
 0x14b   : > { %s2208_s23 = smov 128   ;;  %s2209_s0 = smov 8  }
 0x14c   : > { %2026 = dma.vmem_to_hbm [thread:$0]  (%p2294_p5), %s3072_s25, 2048, %s3070_s27, %s3092_s28, %s2208_s23, %s2208_s23, %s2209_s0  }
 0x14d PF: > { %p2032_p3 = scmp.ge.s32.totalorder %s2202_s14, 2  ;;  %s1644_s29 = sand.u32 1, %s2182_s10  }
 0x14e   : > { %s1645_s24 = scalar_lea.sflag [#allocation7], %s1644_s29 }
 0x14f   : > { %p2029_p4 = pnand %p2032_p3, %p2301_p9 }
 0x151   : > { %2177 = dma.done.wait (!%p2029_p4), %s1645_s24, 2048  }
 0x152   : > { %2179 = vsyncadd (!%p2029_p4), %s1645_s24, 4294965248  ;;  %s33_s14 = sadd.s32 1, %s2202_s14   ;;  %s3149_s10 = smov %s2186_s11 }
 0x153   : > { %p30_p6 = scmp.ge.s32.totalorder %s33_s14, 4   ;;  %s3150_s11 = smov %s2190_s2 }
 0x154   : > { %s3151_s2 = smov %s2307_s22  ;;  %s3152_s12 = smov %s2198_s13 }
 0x155   : > { %s3153_s13 = smov %s3155_s17  ;;  %32 = sbr.rel (!%p30_p6) target bundleno = 40 (0x28), region = 101 }
 0x15c   :  { %1650 = vsyncpa [#allocation7], 1 }
 0x15d   :  { %1652 = vsyncpa [#allocation7 + $0x1], 1 }

</bundles_post_ra>
